<compile_context>
chip_gen: v6e
topology: v6e:2x2x1
jax: 0.10.0
libtpu: 0.0.40
codegen_flags: <defaults>
</compile_context>

<pallas_src>
import jax
import jax.numpy as jnp
import numpy as np
from jax.experimental import pallas as pl
from jax.experimental.pallas import tpu as pltpu

OUT_PAD = 128   # lane-dense padded logit width (real logits in cols 0:2)
N_CLS = 2


def _round_up(x, m):
    return ((x + m - 1) // m) * m


# ----------------------------- kernel ---------------------------------------

def _make_kernel(fusion_dim):
    F = fusion_dim

    def kernel(text_ref, imgs_ref, imgm_ref, imgd_ref,
               tw_ref, iws_ref, iwm_ref, iwd_ref,
               mws_ref, mwm_ref, mwd_ref,
               vecs_ref, cw1_ref, cb1_ref, cw2_ref, cb2_ref,
               out_ref):
        f32 = jnp.float32
        bf16 = jnp.bfloat16

        text = text_ref[...].astype(bf16)                      # [TB, D_text]

        # adaptive_avg_pool2d((1,1)).flatten(1) == mean over flattened H*W
        # (the lane axis). Accumulate in f32 directly from the f32 input --
        # no full-tile dtype copy (v5e has no bf16 VPU path).
        # NOTE: the [TB, C] result moves C from sublanes to lanes (one small
        # XLU relayout per stage); negligible vs the image DMA / MXU work.
        def pool(ref):
            hw = ref.shape[-1]
            return jnp.sum(ref[...], axis=-1) * (1.0 / hw)     # [TB, C] f32

        img_s = pool(imgs_ref)
        img_m = pool(imgm_ref)
        img_d = pool(imgd_ref)

        # Packed small params: per mixer rows = (text_b, img_b, mixer_b, gamma, beta)
        vecs = vecs_ref[...]                                    # [16, F] f32

        # One fused text-projection matmul for all three mixers: [TB, 3F]
        tp_all = jnp.dot(text, tw_ref[...], preferred_element_type=f32)

        def mixer(idx, img_pooled, iw_ref, mw_ref):
            base = idx * 5
            t_b = vecs[base + 0:base + 1, :]
            i_b = vecs[base + 1:base + 2, :]
            m_b = vecs[base + 2:base + 3, :]
            g   = vecs[base + 3:base + 4, :]
            be  = vecs[base + 4:base + 5, :]

            tp = tp_all[:, idx * F:(idx + 1) * F] + t_b         # lane-aligned slice
            ip = jnp.dot(img_pooled.astype(bf16), iw_ref[...],
                         preferred_element_type=f32) + i_b
            # cat([tp, ip], dim=1) @ W  ==  tp @ W[:F] + ip @ W[F:]   (exact)
            mw = mw_ref[...]
            h = (jnp.dot(tp.astype(bf16), mw[:F, :], preferred_element_type=f32)
                 + jnp.dot(ip.astype(bf16), mw[F:, :], preferred_element_type=f32)
                 + m_b)
            h = jnp.maximum(h, 0.0)
            mean = jnp.mean(h, axis=-1, keepdims=True)
            var = jnp.mean((h - mean) ** 2, axis=-1, keepdims=True)
            return (h - mean) * jax.lax.rsqrt(var + 1e-5) * g + be

        fs = mixer(0, img_s, iws_ref, mws_ref)
        fm = mixer(1, img_m, iwm_ref, mwm_ref)
        fd = mixer(2, img_d, iwd_ref, mwd_ref)

        # Classifier layer 1 as a split-K matmul (== cat([fs,fm,fd],1) @ W1):
        # no [TB,3F] scratch store/reload, f32 accumulation throughout.
        cw1 = cw1_ref[...]
        h = (jnp.dot(fs.astype(bf16), cw1[0 * F:1 * F, :], preferred_element_type=f32)
             + jnp.dot(fm.astype(bf16), cw1[1 * F:2 * F, :], preferred_element_type=f32)
             + jnp.dot(fd.astype(bf16), cw1[2 * F:3 * F, :], preferred_element_type=f32)
             + cb1_ref[...])
        h = jnp.maximum(h, 0.0)
        # TODO(synk): Dropout(0.5) is identity in eval/inference; training-mode RNG mask omitted.
        out_ref[...] = (jnp.dot(h.astype(bf16), cw2_ref[...],
                                preferred_element_type=f32) + cb2_ref[...])

    return kernel


# ----------------------------- wrapper ---------------------------------------

def mpfn_forward(text_feat, img_s2, img_s5, img_s8, params, *,
                 target_batch_tile=256):
    """params: packed tuple from init_params (kernel order).

    target_batch_tile: desired rows per grid step (256 for v6e/v7x, 128 is a
    good choice for v5e); it is capped by the VMEM budget and the batch size.
    """
    (tw_all, iw_s, iw_m, iw_d, mw_s, mw_m, mw_d,
     vecs, c_w1, c_b1, c_w2p, c_b2p) = params
    fusion_dim = vecs.shape[1]
    out_pad = c_w2p.shape[1]

    B = text_feat.shape[0]

    # [B, C, H*W] is a free reshape of NCHW (no transpose). Keep the native
    # f32 dtype: a wrapper-side bf16 cast would be an extra full HBM
    # read+write of the largest tensors; the kernel downcasts in VMEM.
    def prep_img(img):
        b, c, h, w = img.shape
        return img.reshape(b, c, h * w).astype(jnp.float32)

    text = text_feat.astype(jnp.float32)
    xs, xm, xd = prep_img(img_s2), prep_img(img_s5), prep_img(img_s8)

    # Only pad tiny batches up to the sublane minimum (cheap). Large batches
    # are never copied: the ragged last block is masked by Pallas and padded
    # output rows are sliced off (rows are independent, so garbage / NaN in
    # the pad region cannot contaminate valid rows).
    if B < 8:
        pad = 8 - B
        text = jnp.pad(text, ((0, pad), (0, 0)))
        xs = jnp.pad(xs, ((0, pad), (0, 0), (0, 0)))
        xm = jnp.pad(xm, ((0, pad), (0, 0), (0, 0)))
        xd = jnp.pad(xd, ((0, pad), (0, 0), (0, 0)))
    B_eff = text.shape[0]

    weights = (tw_all, iw_s, iw_m, iw_d, mw_s, mw_m, mw_d,
               vecs, c_w1, c_b1, c_w2p, c_b2p)

    # ---- generation-aware VMEM budget & batch-tile selection ----------------
    try:
        vmem_cap = int(pltpu.get_tpu_info().vmem_capacity_bytes)
    except Exception:                                   # noqa: BLE001
        vmem_cap = 64 * 1024 * 1024                     # conservative (v7x-sized)
    vmem_limit = int(0.80 * vmem_cap)                   # ~100 MiB on 128 MiB parts, ~51 MiB on v7x

    weight_bytes = sum(int(w.size) * w.dtype.itemsize for w in weights)
    # per-batch-row bytes of the pipelined (double-buffered) f32 operands
    row_bytes = 2 * 4 * (text.shape[1]
                         + xs.shape[1] * xs.shape[2]
                         + xm.shape[1] * xm.shape[2]
                         + xd.shape[1] * xd.shape[2]
                         + out_pad)
    tile_budget = vmem_limit - weight_bytes - (4 << 20)     # headroom
    tb_cap = max(8, (tile_budget // row_bytes) // 8 * 8)
    # TODO(synk): if tb_cap collapses on v7x (64 MiB) because of the shallow
    # stage's H*W, add a second "arbitrary" grid axis that chunks H*W and
    # accumulates partial pool sums in a [TB, C] scratch instead of shrinking TB.

    TB = int(min(target_batch_tile, tb_cap, _round_up(B_eff, 8)))
    TB = max(8, (TB // 8) * 8)
    # Megacore: ensure >=2 grid steps when the batch allows it (v7x 2 TCs).
    if B_eff > 8 and pl.cdiv(B_eff, TB) < 2:
        TB = max(8, _round_up(pl.cdiv(B_eff, 2), 8))
    grid = (pl.cdiv(B_eff, TB),)

    # ---- specs ---------------------------------------------------------------
    def batch_spec(arr):
        nd = arr.ndim
        return pl.BlockSpec((TB,) + arr.shape[1:],
                            lambda b, _nd=nd: (b,) + (0,) * (_nd - 1))

    def const_spec(arr, single_buffer):
        nd = arr.ndim
        idx = lambda b, _nd=nd: (0,) * _nd
        if single_buffer:
            # Weight blocks never change across grid steps; single-buffer them
            # so the freed VMEM goes to a bigger batch tile (v7x: 64 MiB).
            return pl.BlockSpec(arr.shape, idx, pipeline_mode=pl.Buffered(1))
        return pl.BlockSpec(arr.shape, idx)

    def run(single_buffer_weights):
        in_specs = ([batch_spec(text), batch_spec(xs), batch_spec(xm), batch_spec(xd)]
                    + [const_spec(w, single_buffer_weights) for w in weights])
        return pl.pallas_call(
            _make_kernel(fusion_dim),
            out_shape=jax.ShapeDtypeStruct((B_eff, out_pad), jnp.float32),
            grid_spec=pltpu.PrefetchScalarGridSpec(
                num_scalar_prefetch=0,
                grid=grid,
                in_specs=in_specs,
                out_specs=pl.BlockSpec((TB, out_pad), lambda b: (b, 0))),
            compiler_params=pltpu.CompilerParams(
                dimension_semantics=("parallel",),      # v7x: shard batch over 2 TCs
                vmem_limit_bytes=vmem_limit),
        )(text, xs, xm, xd, *weights)

    try:
        out_padded = run(single_buffer_weights=True)
    except Exception:                                   # noqa: BLE001
        # Fallback for jax builds that reject pipeline_mode on the top-level
        # pallas_call pipeline: identical kernel, default double-buffering.
        out_padded = run(single_buffer_weights=False)

    return out_padded[:B, :N_CLS]


# ------------------------ pure-JAX reference ----------------------------------

def mpfn_reference(text_feat, img_s2, img_s5, img_s8, params):
    (tw_all, iw_s, iw_m, iw_d, mw_s, mw_m, mw_d,
     vecs, c_w1, c_b1, c_w2p, c_b2p) = params
    F = vecs.shape[1]
    bf16, f32 = jnp.bfloat16, jnp.float32

    def pool(img):  # NCHW adaptive avg pool (1,1) + flatten, in f32
        return jnp.mean(img.astype(f32), axis=(2, 3))

    tp_all = jnp.dot(text_feat.astype(bf16), tw_all, preferred_element_type=f32)

    def mixer(idx, img, iw, mw):
        base = idx * 5
        t_b, i_b, m_b, g, be = (vecs[base + k:base + k + 1, :] for k in range(5))
        tp = tp_all[:, idx * F:(idx + 1) * F] + t_b
        ip = jnp.dot(pool(img).astype(bf16), iw, preferred_element_type=f32) + i_b
        comb = jnp.concatenate([tp, ip], axis=-1)           # torch-style cat+Linear
        h = jnp.dot(comb.astype(bf16), mw, preferred_element_type=f32) + m_b
        h = jnp.maximum(h, 0.0)
        mean = jnp.mean(h, axis=-1, keepdims=True)
        var = jnp.mean((h - mean) ** 2, axis=-1, keepdims=True)
        return (h - mean) * jax.lax.rsqrt(var + 1e-5) * g + be

    fs = mixer(0, img_s2, iw_s, mw_s)
    fm = mixer(1, img_s5, iw_m, mw_m)
    fd = mixer(2, img_s8, iw_d, mw_d)
    final = jnp.concatenate([fs, fm, fd], axis=-1)
    h = jnp.maximum(jnp.dot(final.astype(bf16), c_w1,
                            preferred_element_type=f32) + c_b1, 0.0)
    logits_p = jnp.dot(h.astype(bf16), c_w2p, preferred_element_type=f32) + c_b2p
    return logits_p[:, :N_CLS]


# ----------------------------- params ----------------------------------------

def init_params(key, text_dim, img_dims, fusion_dim, hidden=512,
                n_cls=N_CLS, out_pad=OUT_PAD):
    # fusion_dim should be a multiple of 128 so every in-kernel slice / store
    # is lane-aligned (LayerNorm over F makes zero-padding F non-trivial).
    F = fusion_dim
    keys = iter(jax.random.split(key, 32))

    def w(shape, scale=0.05):   # matmul weights in bf16 (MXU-native, half DMA)
        return (scale * jax.random.normal(next(keys), shape, jnp.float32)
                ).astype(jnp.bfloat16)

    def bvec(scale=0.05):       # biases / LN params stay f32
        return (scale * jax.random.normal(next(keys), (F,))).astype(jnp.float32)

    # Fused text-proj weight [D_text, 3F] (shallow | mid | deep)
    tw_all = jnp.concatenate([w((text_dim, F)) for _ in range(3)], axis=1)
    iw = tuple(w((d, F)) for d in img_dims)             # image_proj weights
    mw = tuple(w((2 * F, F)) for _ in range(3))         # mixer Linear(2F, F)

    rows = []
    for _ in range(3):                                  # per-mixer small params
        rows += [bvec(), bvec(), bvec(),
                 jnp.ones((F,), jnp.float32), jnp.zeros((F,), jnp.float32)]
    rows.append(jnp.zeros((F,), jnp.float32))           # pad to 16 rows
    vecs = jnp.stack(rows, axis=0)                      # [16, F] f32

    c_w1 = w((3 * F, hidden))
    c_b1 = (0.05 * jax.random.normal(next(keys), (1, hidden))).astype(jnp.float32)
    c_w2 = w((hidden, n_cls))
    c_w2p = jnp.zeros((hidden, out_pad), jnp.bfloat16).at[:, :n_cls].set(c_w2)
    c_b2 = (0.05 * jax.random.normal(next(keys), (1, n_cls))).astype(jnp.float32)
    c_b2p = jnp.zeros((1, out_pad), jnp.float32).at[:, :n_cls].set(c_b2)

    return (tw_all, iw[0], iw[1], iw[2], mw[0], mw[1], mw[2],
            vecs, c_w1, c_b1, c_w2p, c_b2p)


# ----------------------------- main -------------------------------------------

if __name__ == "__main__":
    # Small synthetic config (stand-ins for BERT_DIM / IMG_*_DIM / FUSION_DIM).
    # FUSION_DIM is a lane multiple (128) per the layout requirement above.
    B = 2
    BERT_DIM = 32
    IMG_SHALLOW_DIM, IMG_MID_DIM, IMG_DEEP_DIM = 16, 24, 32
    FUSION_DIM = 128

    key = jax.random.PRNGKey(0)
    k_text, k_s2, k_s5, k_s8, k_params = jax.random.split(key, 5)

    # Stand-ins for backbone outputs (BERT pooler + EfficientNet stage maps, NCHW)
    text_feat = jax.random.normal(k_text, (B, BERT_DIM), jnp.float32)
    img_s2 = jax.random.normal(k_s2, (B, IMG_SHALLOW_DIM, 16, 16), jnp.float32)
    img_s5 = jax.random.normal(k_s5, (B, IMG_MID_DIM, 8, 8), jnp.float32)
    img_s8 = jax.random.normal(k_s8, (B, IMG_DEEP_DIM, 4, 4), jnp.float32)

    params = init_params(k_params, BERT_DIM,
                         (IMG_SHALLOW_DIM, IMG_MID_DIM, IMG_DEEP_DIM), FUSION_DIM)

    logits = mpfn_forward(text_feat, img_s2, img_s5, img_s8, params)
    logits = jax.block_until_ready(logits)

    ref = mpfn_reference(text_feat, img_s2, img_s5, img_s8, params)
    assert logits.shape == (B, N_CLS), logits.shape
    np.testing.assert_allclose(np.asarray(logits), np.asarray(ref),
                               rtol=2e-2, atol=2e-2)
    print("KERNEL_OK")
</pallas_src>

<mosaic_0001>
module attributes {stable_mosaic.version = 11 : i64} {
  func.func @kernel(%arg0: i32, %arg1: memref<8x32xf32, #tpu.memory_space<vmem>>, %arg2: memref<8x16x256xf32, #tpu.memory_space<vmem>>, %arg3: memref<8x24x64xf32, #tpu.memory_space<vmem>>, %arg4: memref<8x32x16xf32, #tpu.memory_space<vmem>>, %arg5: memref<32x384xbf16, #tpu.memory_space<vmem>>, %arg6: memref<16x128xbf16, #tpu.memory_space<vmem>>, %arg7: memref<24x128xbf16, #tpu.memory_space<vmem>>, %arg8: memref<32x128xbf16, #tpu.memory_space<vmem>>, %arg9: memref<256x128xbf16, #tpu.memory_space<vmem>>, %arg10: memref<256x128xbf16, #tpu.memory_space<vmem>>, %arg11: memref<256x128xbf16, #tpu.memory_space<vmem>>, %arg12: memref<16x128xf32, #tpu.memory_space<vmem>>, %arg13: memref<384x512xbf16, #tpu.memory_space<vmem>>, %arg14: memref<1x512xf32, #tpu.memory_space<vmem>>, %arg15: memref<512x128xbf16, #tpu.memory_space<vmem>>, %arg16: memref<1x128xf32, #tpu.memory_space<vmem>>, %arg17: memref<8x128xf32, #tpu.memory_space<vmem>>) attributes {dimension_semantics = [#tpu.dimension_semantics<parallel>], iteration_bounds = array<i64: 1>, scalar_prefetch = 0 : i64, scratch_operands = 0 : i64, tpu.core_type = #tpu.core_type<tc>, window_params = [{transform_indices = @transform_0, window_bounds = array<i64: 8, 32>}, {transform_indices = @transform_1, window_bounds = array<i64: 8, 16, 256>}, {transform_indices = @transform_2, window_bounds = array<i64: 8, 24, 64>}, {transform_indices = @transform_3, window_bounds = array<i64: 8, 32, 16>}, {pipeline_mode = #tpu.pipeline_mode<synchronous>, transform_indices = @transform_4, window_bounds = array<i64: 32, 384>}, {pipeline_mode = #tpu.pipeline_mode<synchronous>, transform_indices = @transform_5, window_bounds = array<i64: 16, 128>}, {pipeline_mode = #tpu.pipeline_mode<synchronous>, transform_indices = @transform_6, window_bounds = array<i64: 24, 128>}, {pipeline_mode = #tpu.pipeline_mode<synchronous>, transform_indices = @transform_7, window_bounds = array<i64: 32, 128>}, {pipeline_mode = #tpu.pipeline_mode<synchronous>, transform_indices = @transform_8, window_bounds = array<i64: 256, 128>}, {pipeline_mode = #tpu.pipeline_mode<synchronous>, transform_indices = @transform_9, window_bounds = array<i64: 256, 128>}, {pipeline_mode = #tpu.pipeline_mode<synchronous>, transform_indices = @transform_10, window_bounds = array<i64: 256, 128>}, {pipeline_mode = #tpu.pipeline_mode<synchronous>, transform_indices = @transform_11, window_bounds = array<i64: 16, 128>}, {pipeline_mode = #tpu.pipeline_mode<synchronous>, transform_indices = @transform_12, window_bounds = array<i64: 384, 512>}, {pipeline_mode = #tpu.pipeline_mode<synchronous>, transform_indices = @transform_13, window_bounds = array<i64: 1, 512>}, {pipeline_mode = #tpu.pipeline_mode<synchronous>, transform_indices = @transform_14, window_bounds = array<i64: 512, 128>}, {pipeline_mode = #tpu.pipeline_mode<synchronous>, transform_indices = @transform_15, window_bounds = array<i64: 1, 128>}, {transform_indices = @transform_16, window_bounds = array<i64: 8, 128>}]} {
    %c0 = arith.constant 0 : index
    %c0_0 = arith.constant 0 : index
    %0 = vector.load %arg1[%c0, %c0_0] : memref<8x32xf32, #tpu.memory_space<vmem>>, vector<8x32xf32>
    %1 = arith.truncf %0 : vector<8x32xf32> to vector<8x32xbf16>
    %c0_1 = arith.constant 0 : index
    %c0_2 = arith.constant 0 : index
    %c0_3 = arith.constant 0 : index
    %2 = vector.load %arg2[%c0_1, %c0_2, %c0_3] : memref<8x16x256xf32, #tpu.memory_space<vmem>>, vector<8x16x256xf32>
    %cst = arith.constant dense<0.000000e+00> : vector<8x16xf32>
    %3 = vector.multi_reduction <add>, %2, %cst [2] : vector<8x16x256xf32> to vector<8x16xf32>
    %cst_4 = arith.constant 3.906250e-03 : f32
    %4 = vector.broadcast %cst_4 : f32 to vector<8x16xf32>
    %5 = arith.mulf %3, %4 : vector<8x16xf32>
    %c0_5 = arith.constant 0 : index
    %c0_6 = arith.constant 0 : index
    %c0_7 = arith.constant 0 : index
    %6 = vector.load %arg3[%c0_5, %c0_6, %c0_7] : memref<8x24x64xf32, #tpu.memory_space<vmem>>, vector<8x24x64xf32>
    %cst_8 = arith.constant dense<0.000000e+00> : vector<8x24xf32>
    %7 = vector.multi_reduction <add>, %6, %cst_8 [2] : vector<8x24x64xf32> to vector<8x24xf32>
    %cst_9 = arith.constant 1.562500e-02 : f32
    %8 = vector.broadcast %cst_9 : f32 to vector<8x24xf32>
    %9 = arith.mulf %7, %8 : vector<8x24xf32>
    %c0_10 = arith.constant 0 : index
    %c0_11 = arith.constant 0 : index
    %c0_12 = arith.constant 0 : index
    %10 = vector.load %arg4[%c0_10, %c0_11, %c0_12] : memref<8x32x16xf32, #tpu.memory_space<vmem>>, vector<8x32x16xf32>
    %cst_13 = arith.constant dense<0.000000e+00> : vector<8x32xf32>
    %11 = vector.multi_reduction <add>, %10, %cst_13 [2] : vector<8x32x16xf32> to vector<8x32xf32>
    %cst_14 = arith.constant 6.250000e-02 : f32
    %12 = vector.broadcast %cst_14 : f32 to vector<8x32xf32>
    %13 = arith.mulf %11, %12 : vector<8x32xf32>
    %c0_15 = arith.constant 0 : index
    %c0_16 = arith.constant 0 : index
    %14 = vector.load %arg12[%c0_15, %c0_16] : memref<16x128xf32, #tpu.memory_space<vmem>>, vector<16x128xf32>
    %c0_17 = arith.constant 0 : index
    %c0_18 = arith.constant 0 : index
    %15 = vector.load %arg5[%c0_17, %c0_18] : memref<32x384xbf16, #tpu.memory_space<vmem>>, vector<32x384xbf16>
    %cst_19 = arith.constant dense<0.000000e+00> : vector<8x384xf32>
    %16 = tpu.matmul %1, %15, %cst_19 {dimension_numbers = #tpu.dot_dimension_numbers<[1], [0], [0], [1], [0, 0, 1, 1], [], []>} : vector<8x32xbf16>, vector<32x384xbf16>, vector<8x384xf32> -> vector<8x384xf32>
    %17 = vector.extract_strided_slice %14 {offsets = [0, 0], sizes = [1, 128], strides = [1, 1]} : vector<16x128xf32> to vector<1x128xf32>
    %18 = vector.extract_strided_slice %14 {offsets = [1, 0], sizes = [1, 128], strides = [1, 1]} : vector<16x128xf32> to vector<1x128xf32>
    %19 = vector.extract_strided_slice %14 {offsets = [2, 0], sizes = [1, 128], strides = [1, 1]} : vector<16x128xf32> to vector<1x128xf32>
    %20 = vector.extract_strided_slice %14 {offsets = [3, 0], sizes = [1, 128], strides = [1, 1]} : vector<16x128xf32> to vector<1x128xf32>
    %21 = vector.extract_strided_slice %14 {offsets = [4, 0], sizes = [1, 128], strides = [1, 1]} : vector<16x128xf32> to vector<1x128xf32>
    %22 = vector.extract_strided_slice %16 {offsets = [0, 0], sizes = [8, 128], strides = [1, 1]} : vector<8x384xf32> to vector<8x128xf32>
    %23 = vector.broadcast %17 : vector<1x128xf32> to vector<8x128xf32>
    %24 = arith.addf %22, %23 : vector<8x128xf32>
    %25 = arith.truncf %5 : vector<8x16xf32> to vector<8x16xbf16>
    %c0_20 = arith.constant 0 : index
    %c0_21 = arith.constant 0 : index
    %26 = vector.load %arg6[%c0_20, %c0_21] : memref<16x128xbf16, #tpu.memory_space<vmem>>, vector<16x128xbf16>
    %cst_22 = arith.constant dense<0.000000e+00> : vector<8x128xf32>
    %27 = tpu.matmul %25, %26, %cst_22 {dimension_numbers = #tpu.dot_dimension_numbers<[1], [0], [0], [1], [0, 0, 1, 1], [], []>} : vector<8x16xbf16>, vector<16x128xbf16>, vector<8x128xf32> -> vector<8x128xf32>
    %28 = vector.broadcast %18 : vector<1x128xf32> to vector<8x128xf32>
    %29 = arith.addf %27, %28 : vector<8x128xf32>
    %c0_23 = arith.constant 0 : index
    %c0_24 = arith.constant 0 : index
    %30 = vector.load %arg9[%c0_23, %c0_24] : memref<256x128xbf16, #tpu.memory_space<vmem>>, vector<256x128xbf16>
    %31 = arith.truncf %24 : vector<8x128xf32> to vector<8x128xbf16>
    %32 = vector.extract_strided_slice %30 {offsets = [0, 0], sizes = [128, 128], strides = [1, 1]} : vector<256x128xbf16> to vector<128x128xbf16>
    %cst_25 = arith.constant dense<0.000000e+00> : vector<8x128xf32>
    %33 = tpu.matmul %31, %32, %cst_25 {dimension_numbers = #tpu.dot_dimension_numbers<[1], [0], [0], [1], [0, 0, 1, 1], [], []>} : vector<8x128xbf16>, vector<128x128xbf16>, vector<8x128xf32> -> vector<8x128xf32>
    %34 = arith.truncf %29 : vector<8x128xf32> to vector<8x128xbf16>
    %35 = vector.extract_strided_slice %30 {offsets = [128, 0], sizes = [128, 128], strides = [1, 1]} : vector<256x128xbf16> to vector<128x128xbf16>
    %cst_26 = arith.constant dense<0.000000e+00> : vector<8x128xf32>
    %36 = tpu.matmul %34, %35, %cst_26 {dimension_numbers = #tpu.dot_dimension_numbers<[1], [0], [0], [1], [0, 0, 1, 1], [], []>} : vector<8x128xbf16>, vector<128x128xbf16>, vector<8x128xf32> -> vector<8x128xf32>
    %37 = arith.addf %33, %36 : vector<8x128xf32>
    %38 = vector.broadcast %19 : vector<1x128xf32> to vector<8x128xf32>
    %39 = arith.addf %37, %38 : vector<8x128xf32>
    %cst_27 = arith.constant 0.000000e+00 : f32
    %40 = vector.broadcast %cst_27 : f32 to vector<8x128xf32>
    %41 = arith.maximumf %39, %40 : vector<8x128xf32>
    %cst_28 = arith.constant dense<0.000000e+00> : vector<8xf32>
    %42 = vector.multi_reduction <add>, %41, %cst_28 [1] : vector<8x128xf32> to vector<8xf32>
    %43 = vector.shape_cast %42 : vector<8xf32> to vector<8x1xf32>
    %cst_29 = arith.constant 1.280000e+02 : f32
    %44 = vector.broadcast %cst_29 : f32 to vector<8x1xf32>
    %45 = arith.divf %43, %44 : vector<8x1xf32>
    %46 = vector.broadcast %45 : vector<8x1xf32> to vector<8x128xf32>
    %47 = arith.subf %41, %46 : vector<8x128xf32>
    %48 = arith.mulf %47, %47 : vector<8x128xf32>
    %cst_30 = arith.constant dense<0.000000e+00> : vector<8xf32>
    %49 = vector.multi_reduction <add>, %48, %cst_30 [1] : vector<8x128xf32> to vector<8xf32>
    %50 = vector.shape_cast %49 : vector<8xf32> to vector<8x1xf32>
    %cst_31 = arith.constant 1.280000e+02 : f32
    %51 = vector.broadcast %cst_31 : f32 to vector<8x1xf32>
    %52 = arith.divf %50, %51 : vector<8x1xf32>
    %53 = vector.broadcast %45 : vector<8x1xf32> to vector<8x128xf32>
    %54 = arith.subf %41, %53 : vector<8x128xf32>
    %cst_32 = arith.constant 9.99999974E-6 : f32
    %55 = vector.broadcast %cst_32 : f32 to vector<8x1xf32>
    %56 = arith.addf %52, %55 : vector<8x1xf32>
    %57 = math.rsqrt %56 : vector<8x1xf32>
    %58 = vector.broadcast %57 : vector<8x1xf32> to vector<8x128xf32>
    %59 = arith.mulf %54, %58 : vector<8x128xf32>
    %60 = vector.broadcast %20 : vector<1x128xf32> to vector<8x128xf32>
    %61 = arith.mulf %59, %60 : vector<8x128xf32>
    %62 = vector.broadcast %21 : vector<1x128xf32> to vector<8x128xf32>
    %63 = arith.addf %61, %62 : vector<8x128xf32>
    %64 = vector.extract_strided_slice %14 {offsets = [5, 0], sizes = [1, 128], strides = [1, 1]} : vector<16x128xf32> to vector<1x128xf32>
    %65 = vector.extract_strided_slice %14 {offsets = [6, 0], sizes = [1, 128], strides = [1, 1]} : vector<16x128xf32> to vector<1x128xf32>
    %66 = vector.extract_strided_slice %14 {offsets = [7, 0], sizes = [1, 128], strides = [1, 1]} : vector<16x128xf32> to vector<1x128xf32>
    %67 = vector.extract_strided_slice %14 {offsets = [8, 0], sizes = [1, 128], strides = [1, 1]} : vector<16x128xf32> to vector<1x128xf32>
    %68 = vector.extract_strided_slice %14 {offsets = [9, 0], sizes = [1, 128], strides = [1, 1]} : vector<16x128xf32> to vector<1x128xf32>
    %69 = vector.extract_strided_slice %16 {offsets = [0, 128], sizes = [8, 128], strides = [1, 1]} : vector<8x384xf32> to vector<8x128xf32>
    %70 = vector.broadcast %64 : vector<1x128xf32> to vector<8x128xf32>
    %71 = arith.addf %69, %70 : vector<8x128xf32>
    %72 = arith.truncf %9 : vector<8x24xf32> to vector<8x24xbf16>
    %c0_33 = arith.constant 0 : index
    %c0_34 = arith.constant 0 : index
    %73 = vector.load %arg7[%c0_33, %c0_34] : memref<24x128xbf16, #tpu.memory_space<vmem>>, vector<24x128xbf16>
    %cst_35 = arith.constant dense<0.000000e+00> : vector<8x128xf32>
    %74 = tpu.matmul %72, %73, %cst_35 {dimension_numbers = #tpu.dot_dimension_numbers<[1], [0], [0], [1], [0, 0, 1, 1], [], []>} : vector<8x24xbf16>, vector<24x128xbf16>, vector<8x128xf32> -> vector<8x128xf32>
    %75 = vector.broadcast %65 : vector<1x128xf32> to vector<8x128xf32>
    %76 = arith.addf %74, %75 : vector<8x128xf32>
    %c0_36 = arith.constant 0 : index
    %c0_37 = arith.constant 0 : index
    %77 = vector.load %arg10[%c0_36, %c0_37] : memref<256x128xbf16, #tpu.memory_space<vmem>>, vector<256x128xbf16>
    %78 = arith.truncf %71 : vector<8x128xf32> to vector<8x128xbf16>
    %79 = vector.extract_strided_slice %77 {offsets = [0, 0], sizes = [128, 128], strides = [1, 1]} : vector<256x128xbf16> to vector<128x128xbf16>
    %cst_38 = arith.constant dense<0.000000e+00> : vector<8x128xf32>
    %80 = tpu.matmul %78, %79, %cst_38 {dimension_numbers = #tpu.dot_dimension_numbers<[1], [0], [0], [1], [0, 0, 1, 1], [], []>} : vector<8x128xbf16>, vector<128x128xbf16>, vector<8x128xf32> -> vector<8x128xf32>
    %81 = arith.truncf %76 : vector<8x128xf32> to vector<8x128xbf16>
    %82 = vector.extract_strided_slice %77 {offsets = [128, 0], sizes = [128, 128], strides = [1, 1]} : vector<256x128xbf16> to vector<128x128xbf16>
    %cst_39 = arith.constant dense<0.000000e+00> : vector<8x128xf32>
    %83 = tpu.matmul %81, %82, %cst_39 {dimension_numbers = #tpu.dot_dimension_numbers<[1], [0], [0], [1], [0, 0, 1, 1], [], []>} : vector<8x128xbf16>, vector<128x128xbf16>, vector<8x128xf32> -> vector<8x128xf32>
    %84 = arith.addf %80, %83 : vector<8x128xf32>
    %85 = vector.broadcast %66 : vector<1x128xf32> to vector<8x128xf32>
    %86 = arith.addf %84, %85 : vector<8x128xf32>
    %cst_40 = arith.constant 0.000000e+00 : f32
    %87 = vector.broadcast %cst_40 : f32 to vector<8x128xf32>
    %88 = arith.maximumf %86, %87 : vector<8x128xf32>
    %cst_41 = arith.constant dense<0.000000e+00> : vector<8xf32>
    %89 = vector.multi_reduction <add>, %88, %cst_41 [1] : vector<8x128xf32> to vector<8xf32>
    %90 = vector.shape_cast %89 : vector<8xf32> to vector<8x1xf32>
    %cst_42 = arith.constant 1.280000e+02 : f32
    %91 = vector.broadcast %cst_42 : f32 to vector<8x1xf32>
    %92 = arith.divf %90, %91 : vector<8x1xf32>
    %93 = vector.broadcast %92 : vector<8x1xf32> to vector<8x128xf32>
    %94 = arith.subf %88, %93 : vector<8x128xf32>
    %95 = arith.mulf %94, %94 : vector<8x128xf32>
    %cst_43 = arith.constant dense<0.000000e+00> : vector<8xf32>
    %96 = vector.multi_reduction <add>, %95, %cst_43 [1] : vector<8x128xf32> to vector<8xf32>
    %97 = vector.shape_cast %96 : vector<8xf32> to vector<8x1xf32>
    %cst_44 = arith.constant 1.280000e+02 : f32
    %98 = vector.broadcast %cst_44 : f32 to vector<8x1xf32>
    %99 = arith.divf %97, %98 : vector<8x1xf32>
    %100 = vector.broadcast %92 : vector<8x1xf32> to vector<8x128xf32>
    %101 = arith.subf %88, %100 : vector<8x128xf32>
    %cst_45 = arith.constant 9.99999974E-6 : f32
    %102 = vector.broadcast %cst_45 : f32 to vector<8x1xf32>
    %103 = arith.addf %99, %102 : vector<8x1xf32>
    %104 = math.rsqrt %103 : vector<8x1xf32>
    %105 = vector.broadcast %104 : vector<8x1xf32> to vector<8x128xf32>
    %106 = arith.mulf %101, %105 : vector<8x128xf32>
    %107 = vector.broadcast %67 : vector<1x128xf32> to vector<8x128xf32>
    %108 = arith.mulf %106, %107 : vector<8x128xf32>
    %109 = vector.broadcast %68 : vector<1x128xf32> to vector<8x128xf32>
    %110 = arith.addf %108, %109 : vector<8x128xf32>
    %111 = vector.extract_strided_slice %14 {offsets = [10, 0], sizes = [1, 128], strides = [1, 1]} : vector<16x128xf32> to vector<1x128xf32>
    %112 = vector.extract_strided_slice %14 {offsets = [11, 0], sizes = [1, 128], strides = [1, 1]} : vector<16x128xf32> to vector<1x128xf32>
    %113 = vector.extract_strided_slice %14 {offsets = [12, 0], sizes = [1, 128], strides = [1, 1]} : vector<16x128xf32> to vector<1x128xf32>
    %114 = vector.extract_strided_slice %14 {offsets = [13, 0], sizes = [1, 128], strides = [1, 1]} : vector<16x128xf32> to vector<1x128xf32>
    %115 = vector.extract_strided_slice %14 {offsets = [14, 0], sizes = [1, 128], strides = [1, 1]} : vector<16x128xf32> to vector<1x128xf32>
    %116 = vector.extract_strided_slice %16 {offsets = [0, 256], sizes = [8, 128], strides = [1, 1]} : vector<8x384xf32> to vector<8x128xf32>
    %117 = vector.broadcast %111 : vector<1x128xf32> to vector<8x128xf32>
    %118 = arith.addf %116, %117 : vector<8x128xf32>
    %119 = arith.truncf %13 : vector<8x32xf32> to vector<8x32xbf16>
    %c0_46 = arith.constant 0 : index
    %c0_47 = arith.constant 0 : index
    %120 = vector.load %arg8[%c0_46, %c0_47] : memref<32x128xbf16, #tpu.memory_space<vmem>>, vector<32x128xbf16>
    %cst_48 = arith.constant dense<0.000000e+00> : vector<8x128xf32>
    %121 = tpu.matmul %119, %120, %cst_48 {dimension_numbers = #tpu.dot_dimension_numbers<[1], [0], [0], [1], [0, 0, 1, 1], [], []>} : vector<8x32xbf16>, vector<32x128xbf16>, vector<8x128xf32> -> vector<8x128xf32>
    %122 = vector.broadcast %112 : vector<1x128xf32> to vector<8x128xf32>
    %123 = arith.addf %121, %122 : vector<8x128xf32>
    %c0_49 = arith.constant 0 : index
    %c0_50 = arith.constant 0 : index
    %124 = vector.load %arg11[%c0_49, %c0_50] : memref<256x128xbf16, #tpu.memory_space<vmem>>, vector<256x128xbf16>
    %125 = arith.truncf %118 : vector<8x128xf32> to vector<8x128xbf16>
    %126 = vector.extract_strided_slice %124 {offsets = [0, 0], sizes = [128, 128], strides = [1, 1]} : vector<256x128xbf16> to vector<128x128xbf16>
    %cst_51 = arith.constant dense<0.000000e+00> : vector<8x128xf32>
    %127 = tpu.matmul %125, %126, %cst_51 {dimension_numbers = #tpu.dot_dimension_numbers<[1], [0], [0], [1], [0, 0, 1, 1], [], []>} : vector<8x128xbf16>, vector<128x128xbf16>, vector<8x128xf32> -> vector<8x128xf32>
    %128 = arith.truncf %123 : vector<8x128xf32> to vector<8x128xbf16>
    %129 = vector.extract_strided_slice %124 {offsets = [128, 0], sizes = [128, 128], strides = [1, 1]} : vector<256x128xbf16> to vector<128x128xbf16>
    %cst_52 = arith.constant dense<0.000000e+00> : vector<8x128xf32>
    %130 = tpu.matmul %128, %129, %cst_52 {dimension_numbers = #tpu.dot_dimension_numbers<[1], [0], [0], [1], [0, 0, 1, 1], [], []>} : vector<8x128xbf16>, vector<128x128xbf16>, vector<8x128xf32> -> vector<8x128xf32>
    %131 = arith.addf %127, %130 : vector<8x128xf32>
    %132 = vector.broadcast %113 : vector<1x128xf32> to vector<8x128xf32>
    %133 = arith.addf %131, %132 : vector<8x128xf32>
    %cst_53 = arith.constant 0.000000e+00 : f32
    %134 = vector.broadcast %cst_53 : f32 to vector<8x128xf32>
    %135 = arith.maximumf %133, %134 : vector<8x128xf32>
    %cst_54 = arith.constant dense<0.000000e+00> : vector<8xf32>
    %136 = vector.multi_reduction <add>, %135, %cst_54 [1] : vector<8x128xf32> to vector<8xf32>
    %137 = vector.shape_cast %136 : vector<8xf32> to vector<8x1xf32>
    %cst_55 = arith.constant 1.280000e+02 : f32
    %138 = vector.broadcast %cst_55 : f32 to vector<8x1xf32>
    %139 = arith.divf %137, %138 : vector<8x1xf32>
    %140 = vector.broadcast %139 : vector<8x1xf32> to vector<8x128xf32>
    %141 = arith.subf %135, %140 : vector<8x128xf32>
    %142 = arith.mulf %141, %141 : vector<8x128xf32>
    %cst_56 = arith.constant dense<0.000000e+00> : vector<8xf32>
    %143 = vector.multi_reduction <add>, %142, %cst_56 [1] : vector<8x128xf32> to vector<8xf32>
    %144 = vector.shape_cast %143 : vector<8xf32> to vector<8x1xf32>
    %cst_57 = arith.constant 1.280000e+02 : f32
    %145 = vector.broadcast %cst_57 : f32 to vector<8x1xf32>
    %146 = arith.divf %144, %145 : vector<8x1xf32>
    %147 = vector.broadcast %139 : vector<8x1xf32> to vector<8x128xf32>
    %148 = arith.subf %135, %147 : vector<8x128xf32>
    %cst_58 = arith.constant 9.99999974E-6 : f32
    %149 = vector.broadcast %cst_58 : f32 to vector<8x1xf32>
    %150 = arith.addf %146, %149 : vector<8x1xf32>
    %151 = math.rsqrt %150 : vector<8x1xf32>
    %152 = vector.broadcast %151 : vector<8x1xf32> to vector<8x128xf32>
    %153 = arith.mulf %148, %152 : vector<8x128xf32>
    %154 = vector.broadcast %114 : vector<1x128xf32> to vector<8x128xf32>
    %155 = arith.mulf %153, %154 : vector<8x128xf32>
    %156 = vector.broadcast %115 : vector<1x128xf32> to vector<8x128xf32>
    %157 = arith.addf %155, %156 : vector<8x128xf32>
    %c0_59 = arith.constant 0 : index
    %c0_60 = arith.constant 0 : index
    %158 = vector.load %arg13[%c0_59, %c0_60] : memref<384x512xbf16, #tpu.memory_space<vmem>>, vector<384x512xbf16>
    %159 = arith.truncf %63 : vector<8x128xf32> to vector<8x128xbf16>
    %160 = vector.extract_strided_slice %158 {offsets = [0, 0], sizes = [128, 512], strides = [1, 1]} : vector<384x512xbf16> to vector<128x512xbf16>
    %cst_61 = arith.constant dense<0.000000e+00> : vector<8x512xf32>
    %161 = tpu.matmul %159, %160, %cst_61 {dimension_numbers = #tpu.dot_dimension_numbers<[1], [0], [0], [1], [0, 0, 1, 1], [], []>} : vector<8x128xbf16>, vector<128x512xbf16>, vector<8x512xf32> -> vector<8x512xf32>
    %162 = arith.truncf %110 : vector<8x128xf32> to vector<8x128xbf16>
    %163 = vector.extract_strided_slice %158 {offsets = [128, 0], sizes = [128, 512], strides = [1, 1]} : vector<384x512xbf16> to vector<128x512xbf16>
    %cst_62 = arith.constant dense<0.000000e+00> : vector<8x512xf32>
    %164 = tpu.matmul %162, %163, %cst_62 {dimension_numbers = #tpu.dot_dimension_numbers<[1], [0], [0], [1], [0, 0, 1, 1], [], []>} : vector<8x128xbf16>, vector<128x512xbf16>, vector<8x512xf32> -> vector<8x512xf32>
    %165 = arith.addf %161, %164 : vector<8x512xf32>
    %166 = arith.truncf %157 : vector<8x128xf32> to vector<8x128xbf16>
    %167 = vector.extract_strided_slice %158 {offsets = [256, 0], sizes = [128, 512], strides = [1, 1]} : vector<384x512xbf16> to vector<128x512xbf16>
    %cst_63 = arith.constant dense<0.000000e+00> : vector<8x512xf32>
    %168 = tpu.matmul %166, %167, %cst_63 {dimension_numbers = #tpu.dot_dimension_numbers<[1], [0], [0], [1], [0, 0, 1, 1], [], []>} : vector<8x128xbf16>, vector<128x512xbf16>, vector<8x512xf32> -> vector<8x512xf32>
    %169 = arith.addf %165, %168 : vector<8x512xf32>
    %c0_64 = arith.constant 0 : index
    %c0_65 = arith.constant 0 : index
    %170 = vector.load %arg14[%c0_64, %c0_65] : memref<1x512xf32, #tpu.memory_space<vmem>>, vector<1x512xf32>
    %171 = vector.broadcast %170 : vector<1x512xf32> to vector<8x512xf32>
    %172 = arith.addf %169, %171 : vector<8x512xf32>
    %cst_66 = arith.constant 0.000000e+00 : f32
    %173 = vector.broadcast %cst_66 : f32 to vector<8x512xf32>
    %174 = arith.maximumf %172, %173 : vector<8x512xf32>
    %175 = arith.truncf %174 : vector<8x512xf32> to vector<8x512xbf16>
    %c0_67 = arith.constant 0 : index
    %c0_68 = arith.constant 0 : index
    %176 = vector.load %arg15[%c0_67, %c0_68] : memref<512x128xbf16, #tpu.memory_space<vmem>>, vector<512x128xbf16>
    %cst_69 = arith.constant dense<0.000000e+00> : vector<8x128xf32>
    %177 = tpu.matmul %175, %176, %cst_69 {dimension_numbers = #tpu.dot_dimension_numbers<[1], [0], [0], [1], [0, 0, 1, 1], [], []>} : vector<8x512xbf16>, vector<512x128xbf16>, vector<8x128xf32> -> vector<8x128xf32>
    %c0_70 = arith.constant 0 : index
    %c0_71 = arith.constant 0 : index
    %178 = vector.load %arg16[%c0_70, %c0_71] : memref<1x128xf32, #tpu.memory_space<vmem>>, vector<1x128xf32>
    %179 = vector.broadcast %178 : vector<1x128xf32> to vector<8x128xf32>
    %180 = arith.addf %177, %179 : vector<8x128xf32>
    %c0_72 = arith.constant 0 : index
    %c0_73 = arith.constant 0 : index
    %181 = vector.load %arg17[%c0_72, %c0_73] : memref<8x128xf32, #tpu.memory_space<vmem>>, vector<8x128xf32>
    tpu.vector_store %arg17[%c0_72, %c0_73], %180 {strides = array<i32>} : memref<8x128xf32, #tpu.memory_space<vmem>>, vector<8x128xf32>,
    return
  }
  func.func @transform_0(%arg0: i32) -> (i32, i32) {
    %c0_i32 = arith.constant 0 : i32
    %c0_i32_0 = arith.constant 0 : i32
    return %arg0, %c0_i32 : i32, i32
  }
  func.func @transform_1(%arg0: i32) -> (i32, i32, i32) {
    %c0_i32 = arith.constant 0 : i32
    %c0_i32_0 = arith.constant 0 : i32
    %c0_i32_1 = arith.constant 0 : i32
    return %arg0, %c0_i32, %c0_i32_0 : i32, i32, i32
  }
  func.func @transform_2(%arg0: i32) -> (i32, i32, i32) {
    %c0_i32 = arith.constant 0 : i32
    %c0_i32_0 = arith.constant 0 : i32
    %c0_i32_1 = arith.constant 0 : i32
    return %arg0, %c0_i32, %c0_i32_0 : i32, i32, i32
  }
  func.func @transform_3(%arg0: i32) -> (i32, i32, i32) {
    %c0_i32 = arith.constant 0 : i32
    %c0_i32_0 = arith.constant 0 : i32
    %c0_i32_1 = arith.constant 0 : i32
    return %arg0, %c0_i32, %c0_i32_0 : i32, i32, i32
  }
  func.func @transform_4(%arg0: i32) -> (i32, i32) {
    %c0_i32 = arith.constant 0 : i32
    %c0_i32_0 = arith.constant 0 : i32
    %c0_i32_1 = arith.constant 0 : i32
    return %c0_i32, %c0_i32_0 : i32, i32
  }
  func.func @transform_5(%arg0: i32) -> (i32, i32) {
    %c0_i32 = arith.constant 0 : i32
    %c0_i32_0 = arith.constant 0 : i32
    %c0_i32_1 = arith.constant 0 : i32
    return %c0_i32, %c0_i32_0 : i32, i32
  }
  func.func @transform_6(%arg0: i32) -> (i32, i32) {
    %c0_i32 = arith.constant 0 : i32
    %c0_i32_0 = arith.constant 0 : i32
    %c0_i32_1 = arith.constant 0 : i32
    return %c0_i32, %c0_i32_0 : i32, i32
  }
  func.func @transform_7(%arg0: i32) -> (i32, i32) {
    %c0_i32 = arith.constant 0 : i32
    %c0_i32_0 = arith.constant 0 : i32
    %c0_i32_1 = arith.constant 0 : i32
    return %c0_i32, %c0_i32_0 : i32, i32
  }
  func.func @transform_8(%arg0: i32) -> (i32, i32) {
    %c0_i32 = arith.constant 0 : i32
    %c0_i32_0 = arith.constant 0 : i32
    %c0_i32_1 = arith.constant 0 : i32
    return %c0_i32, %c0_i32_0 : i32, i32
  }
  func.func @transform_9(%arg0: i32) -> (i32, i32) {
    %c0_i32 = arith.constant 0 : i32
    %c0_i32_0 = arith.constant 0 : i32
    %c0_i32_1 = arith.constant 0 : i32
    return %c0_i32, %c0_i32_0 : i32, i32
  }
  func.func @transform_10(%arg0: i32) -> (i32, i32) {
    %c0_i32 = arith.constant 0 : i32
    %c0_i32_0 = arith.constant 0 : i32
    %c0_i32_1 = arith.constant 0 : i32
    return %c0_i32, %c0_i32_0 : i32, i32
  }
  func.func @transform_11(%arg0: i32) -> (i32, i32) {
    %c0_i32 = arith.constant 0 : i32
    %c0_i32_0 = arith.constant 0 : i32
    %c0_i32_1 = arith.constant 0 : i32
    return %c0_i32, %c0_i32_0 : i32, i32
  }
  func.func @transform_12(%arg0: i32) -> (i32, i32) {
    %c0_i32 = arith.constant 0 : i32
    %c0_i32_0 = arith.constant 0 : i32
    %c0_i32_1 = arith.constant 0 : i32
    return %c0_i32, %c0_i32_0 : i32, i32
  }
  func.func @transform_13(%arg0: i32) -> (i32, i32) {
    %c0_i32 = arith.constant 0 : i32
    %c0_i32_0 = arith.constant 0 : i32
    %c0_i32_1 = arith.constant 0 : i32
    return %c0_i32, %c0_i32_0 : i32, i32
  }
  func.func @transform_14(%arg0: i32) -> (i32, i32) {
    %c0_i32 = arith.constant 0 : i32
    %c0_i32_0 = arith.constant 0 : i32
    %c0_i32_1 = arith.constant 0 : i32
    return %c0_i32, %c0_i32_0 : i32, i32
  }
  func.func @transform_15(%arg0: i32) -> (i32, i32) {
    %c0_i32 = arith.constant 0 : i32
    %c0_i32_0 = arith.constant 0 : i32
    %c0_i32_1 = arith.constant 0 : i32
    return %c0_i32, %c0_i32_0 : i32, i32
  }
  func.func @transform_16(%arg0: i32) -> (i32, i32) {
    %c0_i32 = arith.constant 0 : i32
    %c0_i32_0 = arith.constant 0 : i32
    return %arg0, %c0_i32 : i32, i32
  }
}

module attributes {stable_mosaic.version = 11 : i64} {
  func.func @kernel(%arg0: i32, %arg1: memref<8x32xf32, #tpu.memory_space<vmem>>, %arg2: memref<8x16x256xf32, #tpu.memory_space<vmem>>, %arg3: memref<8x24x64xf32, #tpu.memory_space<vmem>>, %arg4: memref<8x32x16xf32, #tpu.memory_space<vmem>>, %arg5: memref<32x384xbf16, #tpu.memory_space<vmem>>, %arg6: memref<16x128xbf16, #tpu.memory_space<vmem>>, %arg7: memref<24x128xbf16, #tpu.memory_space<vmem>>, %arg8: memref<32x128xbf16, #tpu.memory_space<vmem>>, %arg9: memref<256x128xbf16, #tpu.memory_space<vmem>>, %arg10: memref<256x128xbf16, #tpu.memory_space<vmem>>, %arg11: memref<256x128xbf16, #tpu.memory_space<vmem>>, %arg12: memref<16x128xf32, #tpu.memory_space<vmem>>, %arg13: memref<384x512xbf16, #tpu.memory_space<vmem>>, %arg14: memref<1x512xf32, #tpu.memory_space<vmem>>, %arg15: memref<512x128xbf16, #tpu.memory_space<vmem>>, %arg16: memref<1x128xf32, #tpu.memory_space<vmem>>, %arg17: memref<8x128xf32, #tpu.memory_space<vmem>>) attributes {dimension_semantics = [#tpu.dimension_semantics<parallel>], iteration_bounds = array<i64: 1>, scalar_prefetch = 0 : i64, scratch_operands = 0 : i64, tpu.core_type = #tpu.core_type<tc>, window_params = [{transform_indices = @transform_0, window_bounds = array<i64: 8, 32>}, {transform_indices = @transform_1, window_bounds = array<i64: 8, 16, 256>}, {transform_indices = @transform_2, window_bounds = array<i64: 8, 24, 64>}, {transform_indices = @transform_3, window_bounds = array<i64: 8, 32, 16>}, {pipeline_mode = #tpu.pipeline_mode<synchronous>, transform_indices = @transform_4, window_bounds = array<i64: 32, 384>}, {pipeline_mode = #tpu.pipeline_mode<synchronous>, transform_indices = @transform_5, window_bounds = array<i64: 16, 128>}, {pipeline_mode = #tpu.pipeline_mode<synchronous>, transform_indices = @transform_6, window_bounds = array<i64: 24, 128>}, {pipeline_mode = #tpu.pipeline_mode<synchronous>, transform_indices = @transform_7, window_bounds = array<i64: 32, 128>}, {pipeline_mode = #tpu.pipeline_mode<synchronous>, transform_indices = @transform_8, window_bounds = array<i64: 256, 128>}, {pipeline_mode = #tpu.pipeline_mode<synchronous>, transform_indices = @transform_9, window_bounds = array<i64: 256, 128>}, {pipeline_mode = #tpu.pipeline_mode<synchronous>, transform_indices = @transform_10, window_bounds = array<i64: 256, 128>}, {pipeline_mode = #tpu.pipeline_mode<synchronous>, transform_indices = @transform_11, window_bounds = array<i64: 16, 128>}, {pipeline_mode = #tpu.pipeline_mode<synchronous>, transform_indices = @transform_12, window_bounds = array<i64: 384, 512>}, {pipeline_mode = #tpu.pipeline_mode<synchronous>, transform_indices = @transform_13, window_bounds = array<i64: 1, 512>}, {pipeline_mode = #tpu.pipeline_mode<synchronous>, transform_indices = @transform_14, window_bounds = array<i64: 512, 128>}, {pipeline_mode = #tpu.pipeline_mode<synchronous>, transform_indices = @transform_15, window_bounds = array<i64: 1, 128>}, {transform_indices = @transform_16, window_bounds = array<i64: 8, 128>}]} {
    %c0 = arith.constant 0 : index
    %c0_0 = arith.constant 0 : index
    %0 = vector.load %arg1[%c0, %c0_0] : memref<8x32xf32, #tpu.memory_space<vmem>>, vector<8x32xf32>
    %1 = arith.truncf %0 : vector<8x32xf32> to vector<8x32xbf16>
    %c0_1 = arith.constant 0 : index
    %c0_2 = arith.constant 0 : index
    %c0_3 = arith.constant 0 : index
    %2 = vector.load %arg2[%c0_1, %c0_2, %c0_3] : memref<8x16x256xf32, #tpu.memory_space<vmem>>, vector<8x16x256xf32>
    %cst = arith.constant dense<0.000000e+00> : vector<8x16xf32>
    %3 = vector.multi_reduction <add>, %2, %cst [2] : vector<8x16x256xf32> to vector<8x16xf32>
    %cst_4 = arith.constant 3.906250e-03 : f32
    %4 = vector.broadcast %cst_4 : f32 to vector<8x16xf32>
    %5 = arith.mulf %3, %4 : vector<8x16xf32>
    %c0_5 = arith.constant 0 : index
    %c0_6 = arith.constant 0 : index
    %c0_7 = arith.constant 0 : index
    %6 = vector.load %arg3[%c0_5, %c0_6, %c0_7] : memref<8x24x64xf32, #tpu.memory_space<vmem>>, vector<8x24x64xf32>
    %cst_8 = arith.constant dense<0.000000e+00> : vector<8x24xf32>
    %7 = vector.multi_reduction <add>, %6, %cst_8 [2] : vector<8x24x64xf32> to vector<8x24xf32>
    %cst_9 = arith.constant 1.562500e-02 : f32
    %8 = vector.broadcast %cst_9 : f32 to vector<8x24xf32>
    %9 = arith.mulf %7, %8 : vector<8x24xf32>
    %c0_10 = arith.constant 0 : index
    %c0_11 = arith.constant 0 : index
    %c0_12 = arith.constant 0 : index
    %10 = vector.load %arg4[%c0_10, %c0_11, %c0_12] : memref<8x32x16xf32, #tpu.memory_space<vmem>>, vector<8x32x16xf32>
    %cst_13 = arith.constant dense<0.000000e+00> : vector<8x32xf32>
    %11 = vector.multi_reduction <add>, %10, %cst_13 [2] : vector<8x32x16xf32> to vector<8x32xf32>
    %cst_14 = arith.constant 6.250000e-02 : f32
    %12 = vector.broadcast %cst_14 : f32 to vector<8x32xf32>
    %13 = arith.mulf %11, %12 : vector<8x32xf32>
    %c0_15 = arith.constant 0 : index
    %c0_16 = arith.constant 0 : index
    %14 = vector.load %arg12[%c0_15, %c0_16] : memref<16x128xf32, #tpu.memory_space<vmem>>, vector<16x128xf32>
    %c0_17 = arith.constant 0 : index
    %c0_18 = arith.constant 0 : index
    %15 = vector.load %arg5[%c0_17, %c0_18] : memref<32x384xbf16, #tpu.memory_space<vmem>>, vector<32x384xbf16>
    %cst_19 = arith.constant dense<0.000000e+00> : vector<8x384xf32>
    %16 = tpu.matmul %1, %15, %cst_19 {dimension_numbers = #tpu.dot_dimension_numbers<[1], [0], [0], [1], [0, 0, 1, 1], [], []>} : vector<8x32xbf16>, vector<32x384xbf16>, vector<8x384xf32> -> vector<8x384xf32>
    %17 = vector.extract_strided_slice %14 {offsets = [0, 0], sizes = [1, 128], strides = [1, 1]} : vector<16x128xf32> to vector<1x128xf32>
    %18 = vector.extract_strided_slice %14 {offsets = [1, 0], sizes = [1, 128], strides = [1, 1]} : vector<16x128xf32> to vector<1x128xf32>
    %19 = vector.extract_strided_slice %14 {offsets = [2, 0], sizes = [1, 128], strides = [1, 1]} : vector<16x128xf32> to vector<1x128xf32>
    %20 = vector.extract_strided_slice %14 {offsets = [3, 0], sizes = [1, 128], strides = [1, 1]} : vector<16x128xf32> to vector<1x128xf32>
    %21 = vector.extract_strided_slice %14 {offsets = [4, 0], sizes = [1, 128], strides = [1, 1]} : vector<16x128xf32> to vector<1x128xf32>
    %22 = vector.extract_strided_slice %16 {offsets = [0, 0], sizes = [8, 128], strides = [1, 1]} : vector<8x384xf32> to vector<8x128xf32>
    %23 = vector.broadcast %17 : vector<1x128xf32> to vector<8x128xf32>
    %24 = arith.addf %22, %23 : vector<8x128xf32>
    %25 = arith.truncf %5 : vector<8x16xf32> to vector<8x16xbf16>
    %c0_20 = arith.constant 0 : index
    %c0_21 = arith.constant 0 : index
    %26 = vector.load %arg6[%c0_20, %c0_21] : memref<16x128xbf16, #tpu.memory_space<vmem>>, vector<16x128xbf16>
    %cst_22 = arith.constant dense<0.000000e+00> : vector<8x128xf32>
    %27 = tpu.matmul %25, %26, %cst_22 {dimension_numbers = #tpu.dot_dimension_numbers<[1], [0], [0], [1], [0, 0, 1, 1], [], []>} : vector<8x16xbf16>, vector<16x128xbf16>, vector<8x128xf32> -> vector<8x128xf32>
    %28 = vector.broadcast %18 : vector<1x128xf32> to vector<8x128xf32>
    %29 = arith.addf %27, %28 : vector<8x128xf32>
    %c0_23 = arith.constant 0 : index
    %c0_24 = arith.constant 0 : index
    %30 = vector.load %arg9[%c0_23, %c0_24] : memref<256x128xbf16, #tpu.memory_space<vmem>>, vector<256x128xbf16>
    %31 = arith.truncf %24 : vector<8x128xf32> to vector<8x128xbf16>
    %32 = vector.extract_strided_slice %30 {offsets = [0, 0], sizes = [128, 128], strides = [1, 1]} : vector<256x128xbf16> to vector<128x128xbf16>
    %cst_25 = arith.constant dense<0.000000e+00> : vector<8x128xf32>
    %33 = tpu.matmul %31, %32, %cst_25 {dimension_numbers = #tpu.dot_dimension_numbers<[1], [0], [0], [1], [0, 0, 1, 1], [], []>} : vector<8x128xbf16>, vector<128x128xbf16>, vector<8x128xf32> -> vector<8x128xf32>
    %34 = arith.truncf %29 : vector<8x128xf32> to vector<8x128xbf16>
    %35 = vector.extract_strided_slice %30 {offsets = [128, 0], sizes = [128, 128], strides = [1, 1]} : vector<256x128xbf16> to vector<128x128xbf16>
    %cst_26 = arith.constant dense<0.000000e+00> : vector<8x128xf32>
    %36 = tpu.matmul %34, %35, %cst_26 {dimension_numbers = #tpu.dot_dimension_numbers<[1], [0], [0], [1], [0, 0, 1, 1], [], []>} : vector<8x128xbf16>, vector<128x128xbf16>, vector<8x128xf32> -> vector<8x128xf32>
    %37 = arith.addf %33, %36 : vector<8x128xf32>
    %38 = vector.broadcast %19 : vector<1x128xf32> to vector<8x128xf32>
    %39 = arith.addf %37, %38 : vector<8x128xf32>
    %cst_27 = arith.constant 0.000000e+00 : f32
    %40 = vector.broadcast %cst_27 : f32 to vector<8x128xf32>
    %41 = arith.maximumf %39, %40 : vector<8x128xf32>
    %cst_28 = arith.constant dense<0.000000e+00> : vector<8xf32>
    %42 = vector.multi_reduction <add>, %41, %cst_28 [1] : vector<8x128xf32> to vector<8xf32>
    %43 = vector.shape_cast %42 : vector<8xf32> to vector<8x1xf32>
    %cst_29 = arith.constant 1.280000e+02 : f32
    %44 = vector.broadcast %cst_29 : f32 to vector<8x1xf32>
    %45 = arith.divf %43, %44 : vector<8x1xf32>
    %46 = vector.broadcast %45 : vector<8x1xf32> to vector<8x128xf32>
    %47 = arith.subf %41, %46 : vector<8x128xf32>
    %48 = arith.mulf %47, %47 : vector<8x128xf32>
    %cst_30 = arith.constant dense<0.000000e+00> : vector<8xf32>
    %49 = vector.multi_reduction <add>, %48, %cst_30 [1] : vector<8x128xf32> to vector<8xf32>
    %50 = vector.shape_cast %49 : vector<8xf32> to vector<8x1xf32>
    %cst_31 = arith.constant 1.280000e+02 : f32
    %51 = vector.broadcast %cst_31 : f32 to vector<8x1xf32>
    %52 = arith.divf %50, %51 : vector<8x1xf32>
    %53 = vector.broadcast %45 : vector<8x1xf32> to vector<8x128xf32>
    %54 = arith.subf %41, %53 : vector<8x128xf32>
    %cst_32 = arith.constant 9.99999974E-6 : f32
    %55 = vector.broadcast %cst_32 : f32 to vector<8x1xf32>
    %56 = arith.addf %52, %55 : vector<8x1xf32>
    %57 = math.rsqrt %56 : vector<8x1xf32>
    %58 = vector.broadcast %57 : vector<8x1xf32> to vector<8x128xf32>
    %59 = arith.mulf %54, %58 : vector<8x128xf32>
    %60 = vector.broadcast %20 : vector<1x128xf32> to vector<8x128xf32>
    %61 = arith.mulf %59, %60 : vector<8x128xf32>
    %62 = vector.broadcast %21 : vector<1x128xf32> to vector<8x128xf32>
    %63 = arith.addf %61, %62 : vector<8x128xf32>
    %64 = vector.extract_strided_slice %14 {offsets = [5, 0], sizes = [1, 128], strides = [1, 1]} : vector<16x128xf32> to vector<1x128xf32>
    %65 = vector.extract_strided_slice %14 {offsets = [6, 0], sizes = [1, 128], strides = [1, 1]} : vector<16x128xf32> to vector<1x128xf32>
    %66 = vector.extract_strided_slice %14 {offsets = [7, 0], sizes = [1, 128], strides = [1, 1]} : vector<16x128xf32> to vector<1x128xf32>
    %67 = vector.extract_strided_slice %14 {offsets = [8, 0], sizes = [1, 128], strides = [1, 1]} : vector<16x128xf32> to vector<1x128xf32>
    %68 = vector.extract_strided_slice %14 {offsets = [9, 0], sizes = [1, 128], strides = [1, 1]} : vector<16x128xf32> to vector<1x128xf32>
    %69 = vector.extract_strided_slice %16 {offsets = [0, 128], sizes = [8, 128], strides = [1, 1]} : vector<8x384xf32> to vector<8x128xf32>
    %70 = vector.broadcast %64 : vector<1x128xf32> to vector<8x128xf32>
    %71 = arith.addf %69, %70 : vector<8x128xf32>
    %72 = arith.truncf %9 : vector<8x24xf32> to vector<8x24xbf16>
    %c0_33 = arith.constant 0 : index
    %c0_34 = arith.constant 0 : index
    %73 = vector.load %arg7[%c0_33, %c0_34] : memref<24x128xbf16, #tpu.memory_space<vmem>>, vector<24x128xbf16>
    %cst_35 = arith.constant dense<0.000000e+00> : vector<8x128xf32>
    %74 = tpu.matmul %72, %73, %cst_35 {dimension_numbers = #tpu.dot_dimension_numbers<[1], [0], [0], [1], [0, 0, 1, 1], [], []>} : vector<8x24xbf16>, vector<24x128xbf16>, vector<8x128xf32> -> vector<8x128xf32>
    %75 = vector.broadcast %65 : vector<1x128xf32> to vector<8x128xf32>
    %76 = arith.addf %74, %75 : vector<8x128xf32>
    %c0_36 = arith.constant 0 : index
    %c0_37 = arith.constant 0 : index
    %77 = vector.load %arg10[%c0_36, %c0_37] : memref<256x128xbf16, #tpu.memory_space<vmem>>, vector<256x128xbf16>
    %78 = arith.truncf %71 : vector<8x128xf32> to vector<8x128xbf16>
    %79 = vector.extract_strided_slice %77 {offsets = [0, 0], sizes = [128, 128], strides = [1, 1]} : vector<256x128xbf16> to vector<128x128xbf16>
    %cst_38 = arith.constant dense<0.000000e+00> : vector<8x128xf32>
    %80 = tpu.matmul %78, %79, %cst_38 {dimension_numbers = #tpu.dot_dimension_numbers<[1], [0], [0], [1], [0, 0, 1, 1], [], []>} : vector<8x128xbf16>, vector<128x128xbf16>, vector<8x128xf32> -> vector<8x128xf32>
    %81 = arith.truncf %76 : vector<8x128xf32> to vector<8x128xbf16>
    %82 = vector.extract_strided_slice %77 {offsets = [128, 0], sizes = [128, 128], strides = [1, 1]} : vector<256x128xbf16> to vector<128x128xbf16>
    %cst_39 = arith.constant dense<0.000000e+00> : vector<8x128xf32>
    %83 = tpu.matmul %81, %82, %cst_39 {dimension_numbers = #tpu.dot_dimension_numbers<[1], [0], [0], [1], [0, 0, 1, 1], [], []>} : vector<8x128xbf16>, vector<128x128xbf16>, vector<8x128xf32> -> vector<8x128xf32>
    %84 = arith.addf %80, %83 : vector<8x128xf32>
    %85 = vector.broadcast %66 : vector<1x128xf32> to vector<8x128xf32>
    %86 = arith.addf %84, %85 : vector<8x128xf32>
    %cst_40 = arith.constant 0.000000e+00 : f32
    %87 = vector.broadcast %cst_40 : f32 to vector<8x128xf32>
    %88 = arith.maximumf %86, %87 : vector<8x128xf32>
    %cst_41 = arith.constant dense<0.000000e+00> : vector<8xf32>
    %89 = vector.multi_reduction <add>, %88, %cst_41 [1] : vector<8x128xf32> to vector<8xf32>
    %90 = vector.shape_cast %89 : vector<8xf32> to vector<8x1xf32>
    %cst_42 = arith.constant 1.280000e+02 : f32
    %91 = vector.broadcast %cst_42 : f32 to vector<8x1xf32>
    %92 = arith.divf %90, %91 : vector<8x1xf32>
    %93 = vector.broadcast %92 : vector<8x1xf32> to vector<8x128xf32>
    %94 = arith.subf %88, %93 : vector<8x128xf32>
    %95 = arith.mulf %94, %94 : vector<8x128xf32>
    %cst_43 = arith.constant dense<0.000000e+00> : vector<8xf32>
    %96 = vector.multi_reduction <add>, %95, %cst_43 [1] : vector<8x128xf32> to vector<8xf32>
    %97 = vector.shape_cast %96 : vector<8xf32> to vector<8x1xf32>
    %cst_44 = arith.constant 1.280000e+02 : f32
    %98 = vector.broadcast %cst_44 : f32 to vector<8x1xf32>
    %99 = arith.divf %97, %98 : vector<8x1xf32>
    %100 = vector.broadcast %92 : vector<8x1xf32> to vector<8x128xf32>
    %101 = arith.subf %88, %100 : vector<8x128xf32>
    %cst_45 = arith.constant 9.99999974E-6 : f32
    %102 = vector.broadcast %cst_45 : f32 to vector<8x1xf32>
    %103 = arith.addf %99, %102 : vector<8x1xf32>
    %104 = math.rsqrt %103 : vector<8x1xf32>
    %105 = vector.broadcast %104 : vector<8x1xf32> to vector<8x128xf32>
    %106 = arith.mulf %101, %105 : vector<8x128xf32>
    %107 = vector.broadcast %67 : vector<1x128xf32> to vector<8x128xf32>
    %108 = arith.mulf %106, %107 : vector<8x128xf32>
    %109 = vector.broadcast %68 : vector<1x128xf32> to vector<8x128xf32>
    %110 = arith.addf %108, %109 : vector<8x128xf32>
    %111 = vector.extract_strided_slice %14 {offsets = [10, 0], sizes = [1, 128], strides = [1, 1]} : vector<16x128xf32> to vector<1x128xf32>
    %112 = vector.extract_strided_slice %14 {offsets = [11, 0], sizes = [1, 128], strides = [1, 1]} : vector<16x128xf32> to vector<1x128xf32>
    %113 = vector.extract_strided_slice %14 {offsets = [12, 0], sizes = [1, 128], strides = [1, 1]} : vector<16x128xf32> to vector<1x128xf32>
    %114 = vector.extract_strided_slice %14 {offsets = [13, 0], sizes = [1, 128], strides = [1, 1]} : vector<16x128xf32> to vector<1x128xf32>
    %115 = vector.extract_strided_slice %14 {offsets = [14, 0], sizes = [1, 128], strides = [1, 1]} : vector<16x128xf32> to vector<1x128xf32>
    %116 = vector.extract_strided_slice %16 {offsets = [0, 256], sizes = [8, 128], strides = [1, 1]} : vector<8x384xf32> to vector<8x128xf32>
    %117 = vector.broadcast %111 : vector<1x128xf32> to vector<8x128xf32>
    %118 = arith.addf %116, %117 : vector<8x128xf32>
    %119 = arith.truncf %13 : vector<8x32xf32> to vector<8x32xbf16>
    %c0_46 = arith.constant 0 : index
    %c0_47 = arith.constant 0 : index
    %120 = vector.load %arg8[%c0_46, %c0_47] : memref<32x128xbf16, #tpu.memory_space<vmem>>, vector<32x128xbf16>
    %cst_48 = arith.constant dense<0.000000e+00> : vector<8x128xf32>
    %121 = tpu.matmul %119, %120, %cst_48 {dimension_numbers = #tpu.dot_dimension_numbers<[1], [0], [0], [1], [0, 0, 1, 1], [], []>} : vector<8x32xbf16>, vector<32x128xbf16>, vector<8x128xf32> -> vector<8x128xf32>
    %122 = vector.broadcast %112 : vector<1x128xf32> to vector<8x128xf32>
    %123 = arith.addf %121, %122 : vector<8x128xf32>
    %c0_49 = arith.constant 0 : index
    %c0_50 = arith.constant 0 : index
    %124 = vector.load %arg11[%c0_49, %c0_50] : memref<256x128xbf16, #tpu.memory_space<vmem>>, vector<256x128xbf16>
    %125 = arith.truncf %118 : vector<8x128xf32> to vector<8x128xbf16>
    %126 = vector.extract_strided_slice %124 {offsets = [0, 0], sizes = [128, 128], strides = [1, 1]} : vector<256x128xbf16> to vector<128x128xbf16>
    %cst_51 = arith.constant dense<0.000000e+00> : vector<8x128xf32>
    %127 = tpu.matmul %125, %126, %cst_51 {dimension_numbers = #tpu.dot_dimension_numbers<[1], [0], [0], [1], [0, 0, 1, 1], [], []>} : vector<8x128xbf16>, vector<128x128xbf16>, vector<8x128xf32> -> vector<8x128xf32>
    %128 = arith.truncf %123 : vector<8x128xf32> to vector<8x128xbf16>
    %129 = vector.extract_strided_slice %124 {offsets = [128, 0], sizes = [128, 128], strides = [1, 1]} : vector<256x128xbf16> to vector<128x128xbf16>
    %cst_52 = arith.constant dense<0.000000e+00> : vector<8x128xf32>
    %130 = tpu.matmul %128, %129, %cst_52 {dimension_numbers = #tpu.dot_dimension_numbers<[1], [0], [0], [1], [0, 0, 1, 1], [], []>} : vector<8x128xbf16>, vector<128x128xbf16>, vector<8x128xf32> -> vector<8x128xf32>
    %131 = arith.addf %127, %130 : vector<8x128xf32>
    %132 = vector.broadcast %113 : vector<1x128xf32> to vector<8x128xf32>
    %133 = arith.addf %131, %132 : vector<8x128xf32>
    %cst_53 = arith.constant 0.000000e+00 : f32
    %134 = vector.broadcast %cst_53 : f32 to vector<8x128xf32>
    %135 = arith.maximumf %133, %134 : vector<8x128xf32>
    %cst_54 = arith.constant dense<0.000000e+00> : vector<8xf32>
    %136 = vector.multi_reduction <add>, %135, %cst_54 [1] : vector<8x128xf32> to vector<8xf32>
    %137 = vector.shape_cast %136 : vector<8xf32> to vector<8x1xf32>
    %cst_55 = arith.constant 1.280000e+02 : f32
    %138 = vector.broadcast %cst_55 : f32 to vector<8x1xf32>
    %139 = arith.divf %137, %138 : vector<8x1xf32>
    %140 = vector.broadcast %139 : vector<8x1xf32> to vector<8x128xf32>
    %141 = arith.subf %135, %140 : vector<8x128xf32>
    %142 = arith.mulf %141, %141 : vector<8x128xf32>
    %cst_56 = arith.constant dense<0.000000e+00> : vector<8xf32>
    %143 = vector.multi_reduction <add>, %142, %cst_56 [1] : vector<8x128xf32> to vector<8xf32>
    %144 = vector.shape_cast %143 : vector<8xf32> to vector<8x1xf32>
    %cst_57 = arith.constant 1.280000e+02 : f32
    %145 = vector.broadcast %cst_57 : f32 to vector<8x1xf32>
    %146 = arith.divf %144, %145 : vector<8x1xf32>
    %147 = vector.broadcast %139 : vector<8x1xf32> to vector<8x128xf32>
    %148 = arith.subf %135, %147 : vector<8x128xf32>
    %cst_58 = arith.constant 9.99999974E-6 : f32
    %149 = vector.broadcast %cst_58 : f32 to vector<8x1xf32>
    %150 = arith.addf %146, %149 : vector<8x1xf32>
    %151 = math.rsqrt %150 : vector<8x1xf32>
    %152 = vector.broadcast %151 : vector<8x1xf32> to vector<8x128xf32>
    %153 = arith.mulf %148, %152 : vector<8x128xf32>
    %154 = vector.broadcast %114 : vector<1x128xf32> to vector<8x128xf32>
    %155 = arith.mulf %153, %154 : vector<8x128xf32>
    %156 = vector.broadcast %115 : vector<1x128xf32> to vector<8x128xf32>
    %157 = arith.addf %155, %156 : vector<8x128xf32>
    %c0_59 = arith.constant 0 : index
    %c0_60 = arith.constant 0 : index
    %158 = vector.load %arg13[%c0_59, %c0_60] : memref<384x512xbf16, #tpu.memory_space<vmem>>, vector<384x512xbf16>
    %159 = arith.truncf %63 : vector<8x128xf32> to vector<8x128xbf16>
    %160 = vector.extract_strided_slice %158 {offsets = [0, 0], sizes = [128, 512], strides = [1, 1]} : vector<384x512xbf16> to vector<128x512xbf16>
    %cst_61 = arith.constant dense<0.000000e+00> : vector<8x512xf32>
    %161 = tpu.matmul %159, %160, %cst_61 {dimension_numbers = #tpu.dot_dimension_numbers<[1], [0], [0], [1], [0, 0, 1, 1], [], []>} : vector<8x128xbf16>, vector<128x512xbf16>, vector<8x512xf32> -> vector<8x512xf32>
    %162 = arith.truncf %110 : vector<8x128xf32> to vector<8x128xbf16>
    %163 = vector.extract_strided_slice %158 {offsets = [128, 0], sizes = [128, 512], strides = [1, 1]} : vector<384x512xbf16> to vector<128x512xbf16>
    %cst_62 = arith.constant dense<0.000000e+00> : vector<8x512xf32>
    %164 = tpu.matmul %162, %163, %cst_62 {dimension_numbers = #tpu.dot_dimension_numbers<[1], [0], [0], [1], [0, 0, 1, 1], [], []>} : vector<8x128xbf16>, vector<128x512xbf16>, vector<8x512xf32> -> vector<8x512xf32>
    %165 = arith.addf %161, %164 : vector<8x512xf32>
    %166 = arith.truncf %157 : vector<8x128xf32> to vector<8x128xbf16>
    %167 = vector.extract_strided_slice %158 {offsets = [256, 0], sizes = [128, 512], strides = [1, 1]} : vector<384x512xbf16> to vector<128x512xbf16>
    %cst_63 = arith.constant dense<0.000000e+00> : vector<8x512xf32>
    %168 = tpu.matmul %166, %167, %cst_63 {dimension_numbers = #tpu.dot_dimension_numbers<[1], [0], [0], [1], [0, 0, 1, 1], [], []>} : vector<8x128xbf16>, vector<128x512xbf16>, vector<8x512xf32> -> vector<8x512xf32>
    %169 = arith.addf %165, %168 : vector<8x512xf32>
    %c0_64 = arith.constant 0 : index
    %c0_65 = arith.constant 0 : index
    %170 = vector.load %arg14[%c0_64, %c0_65] : memref<1x512xf32, #tpu.memory_space<vmem>>, vector<1x512xf32>
    %171 = vector.broadcast %170 : vector<1x512xf32> to vector<8x512xf32>
    %172 = arith.addf %169, %171 : vector<8x512xf32>
    %cst_66 = arith.constant 0.000000e+00 : f32
    %173 = vector.broadcast %cst_66 : f32 to vector<8x512xf32>
    %174 = arith.maximumf %172, %173 : vector<8x512xf32>
    %175 = arith.truncf %174 : vector<8x512xf32> to vector<8x512xbf16>
    %c0_67 = arith.constant 0 : index
    %c0_68 = arith.constant 0 : index
    %176 = vector.load %arg15[%c0_67, %c0_68] : memref<512x128xbf16, #tpu.memory_space<vmem>>, vector<512x128xbf16>
    %cst_69 = arith.constant dense<0.000000e+00> : vector<8x128xf32>
    %177 = tpu.matmul %175, %176, %cst_69 {dimension_numbers = #tpu.dot_dimension_numbers<[1], [0], [0], [1], [0, 0, 1, 1], [], []>} : vector<8x512xbf16>, vector<512x128xbf16>, vector<8x128xf32> -> vector<8x128xf32>
    %c0_70 = arith.constant 0 : index
    %c0_71 = arith.constant 0 : index
    %178 = vector.load %arg16[%c0_70, %c0_71] : memref<1x128xf32, #tpu.memory_space<vmem>>, vector<1x128xf32>
    %179 = vector.broadcast %178 : vector<1x128xf32> to vector<8x128xf32>
    %180 = arith.addf %177, %179 : vector<8x128xf32>
    %c0_72 = arith.constant 0 : index
    %c0_73 = arith.constant 0 : index
    %181 = vector.load %arg17[%c0_72, %c0_73] : memref<8x128xf32, #tpu.memory_space<vmem>>, vector<8x128xf32>
    tpu.vector_store %arg17[%c0_72, %c0_73], %180 {strides = array<i32>} : memref<8x128xf32, #tpu.memory_space<vmem>>, vector<8x128xf32>,
    return
  }
  func.func @transform_0(%arg0: i32) -> (i32, i32) {
    %c0_i32 = arith.constant 0 : i32
    %c0_i32_0 = arith.constant 0 : i32
    return %arg0, %c0_i32 : i32, i32
  }
  func.func @transform_1(%arg0: i32) -> (i32, i32, i32) {
    %c0_i32 = arith.constant 0 : i32
    %c0_i32_0 = arith.constant 0 : i32
    %c0_i32_1 = arith.constant 0 : i32
    return %arg0, %c0_i32, %c0_i32_0 : i32, i32, i32
  }
  func.func @transform_2(%arg0: i32) -> (i32, i32, i32) {
    %c0_i32 = arith.constant 0 : i32
    %c0_i32_0 = arith.constant 0 : i32
    %c0_i32_1 = arith.constant 0 : i32
    return %arg0, %c0_i32, %c0_i32_0 : i32, i32, i32
  }
  func.func @transform_3(%arg0: i32) -> (i32, i32, i32) {
    %c0_i32 = arith.constant 0 : i32
    %c0_i32_0 = arith.constant 0 : i32
    %c0_i32_1 = arith.constant 0 : i32
    return %arg0, %c0_i32, %c0_i32_0 : i32, i32, i32
  }
  func.func @transform_4(%arg0: i32) -> (i32, i32) {
    %c0_i32 = arith.constant 0 : i32
    %c0_i32_0 = arith.constant 0 : i32
    %c0_i32_1 = arith.constant 0 : i32
    return %c0_i32, %c0_i32_0 : i32, i32
  }
  func.func @transform_5(%arg0: i32) -> (i32, i32) {
    %c0_i32 = arith.constant 0 : i32
    %c0_i32_0 = arith.constant 0 : i32
    %c0_i32_1 = arith.constant 0 : i32
    return %c0_i32, %c0_i32_0 : i32, i32
  }
  func.func @transform_6(%arg0: i32) -> (i32, i32) {
    %c0_i32 = arith.constant 0 : i32
    %c0_i32_0 = arith.constant 0 : i32
    %c0_i32_1 = arith.constant 0 : i32
    return %c0_i32, %c0_i32_0 : i32, i32
  }
  func.func @transform_7(%arg0: i32) -> (i32, i32) {
    %c0_i32 = arith.constant 0 : i32
    %c0_i32_0 = arith.constant 0 : i32
    %c0_i32_1 = arith.constant 0 : i32
    return %c0_i32, %c0_i32_0 : i32, i32
  }
  func.func @transform_8(%arg0: i32) -> (i32, i32) {
    %c0_i32 = arith.constant 0 : i32
    %c0_i32_0 = arith.constant 0 : i32
    %c0_i32_1 = arith.constant 0 : i32
    return %c0_i32, %c0_i32_0 : i32, i32
  }
  func.func @transform_9(%arg0: i32) -> (i32, i32) {
    %c0_i32 = arith.constant 0 : i32
    %c0_i32_0 = arith.constant 0 : i32
    %c0_i32_1 = arith.constant 0 : i32
    return %c0_i32, %c0_i32_0 : i32, i32
  }
  func.func @transform_10(%arg0: i32) -> (i32, i32) {
    %c0_i32 = arith.constant 0 : i32
    %c0_i32_0 = arith.constant 0 : i32
    %c0_i32_1 = arith.constant 0 : i32
    return %c0_i32, %c0_i32_0 : i32, i32
  }
  func.func @transform_11(%arg0: i32) -> (i32, i32) {
    %c0_i32 = arith.constant 0 : i32
    %c0_i32_0 = arith.constant 0 : i32
    %c0_i32_1 = arith.constant 0 : i32
    return %c0_i32, %c0_i32_0 : i32, i32
  }
  func.func @transform_12(%arg0: i32) -> (i32, i32) {
    %c0_i32 = arith.constant 0 : i32
    %c0_i32_0 = arith.constant 0 : i32
    %c0_i32_1 = arith.constant 0 : i32
    return %c0_i32, %c0_i32_0 : i32, i32
  }
  func.func @transform_13(%arg0: i32) -> (i32, i32) {
    %c0_i32 = arith.constant 0 : i32
    %c0_i32_0 = arith.constant 0 : i32
    %c0_i32_1 = arith.constant 0 : i32
    return %c0_i32, %c0_i32_0 : i32, i32
  }
  func.func @transform_14(%arg0: i32) -> (i32, i32) {
    %c0_i32 = arith.constant 0 : i32
    %c0_i32_0 = arith.constant 0 : i32
    %c0_i32_1 = arith.constant 0 : i32
    return %c0_i32, %c0_i32_0 : i32, i32
  }
  func.func @transform_15(%arg0: i32) -> (i32, i32) {
    %c0_i32 = arith.constant 0 : i32
    %c0_i32_0 = arith.constant 0 : i32
    %c0_i32_1 = arith.constant 0 : i32
    return %c0_i32, %c0_i32_0 : i32, i32
  }
  func.func @transform_16(%arg0: i32) -> (i32, i32) {
    %c0_i32 = arith.constant 0 : i32
    %c0_i32_0 = arith.constant 0 : i32
    return %arg0, %c0_i32 : i32, i32
  }
}

</mosaic_0001>

<bundles_post_ra>
// kernel: tpu_custom_call.1
= control target key start
LH: loop header
LB: loop body
LE: loop exit
PB: predicated region body
PF: predicated region fallthrough
CT: control target
= control target key end

     0   :  { %s5151_s0 = inlined_call_operand.hbm [shape: f32[8,32], index: 0, kind: input, shape index: {}]   ;;  %s5152_s1 = inlined_call_operand.vmem [shape: f32[8,16,256], index: 1, kind: input, shape index: {}]   ;;  %s5153_s2 = inlined_call_operand.hbm [shape: f32[8,24,64], index: 2, kind: input, shape index: {}]   ;;  %s5154_s3 = inlined_call_operand.vmem [shape: f32[8,32,16], index: 3, kind: input, shape index: {}]   ;;  %s5155_s4 = inlined_call_operand.hbm [shape: bf16[32,384], index: 4, kind: input, shape index: {}]   ;;  %s5156_s5 = inlined_call_operand.hbm [shape: bf16[16,128], index: 5, kind: input, shape index: {}]   ;;  %s5157_s6 = inlined_call_operand.hbm [shape: bf16[24,128], index: 6, kind: input, shape index: {}]   ;;  %s5158_s7 = inlined_call_operand.hbm [shape: bf16[32,128], index: 7, kind: input, shape index: {}]   ;;  %s5159_s8 = inlined_call_operand.vmem [shape: bf16[256,128], index: 8, kind: input, shape index: {}]   ;;  %s5160_s9 = inlined_call_operand.hbm [shape: bf16[256,128], index: 9, kind: input, shape index: {}]   ;;  %s5161_s10 = inlined_call_operand.hbm [shape: bf16[256,128], index: 10, kind: input, shape index: {}]   ;;  %s5162_s11 = inlined_call_operand.vmem [shape: f32[16,128], index: 11, kind: input, shape index: {}]   ;;  %s5163_s12 = inlined_call_operand.hbm [shape: bf16[384,512], index: 12, kind: input, shape index: {}]   ;;  %s5164_s13 = inlined_call_operand.vmem [shape: f32[1,512], index: 13, kind: input, shape index: {}]   ;;  %s5165_s14 = inlined_call_operand.hbm [shape: bf16[512,128], index: 14, kind: input, shape index: {}]   ;;  %s5166_s15 = inlined_call_operand.vmem [shape: f32[1,128], index: 15, kind: input, shape index: {}]   ;;  %s5167_s16 = inlined_call_operand.hbm [shape: f32[8,128], index: 16, kind: output, shape index: {}]  }
   0x1   :  { %5168 = sst [smem:[#allocation27_spill]] %s5151_s0 }
   0x2   :  { %21 = vsyncpa [#allocation3], 0 }
   0x3   :  { %22 = vsyncpa [#allocation6], 0 }
   0x4   :  { %23 = vsyncpa [#allocation9], 0 }
   0x5   :  { %24 = vsyncpa [#allocation12], 0 }
   0x6   :  { %25 = vsyncpa [#allocation15], 0 }
   0x7   :  { %26 = vsyncpa [#allocation18], 0 }
   0x8   :  { %27 = vsyncpa [#allocation4], 0  ;;  %s4311_s21 = smov [#allocation5]  }
   0x9   :  { %s45_s22 = sshll.u32 %s4311_s21, 4  ;;  %s46_s22 = int_to_ptr.vmem [resolvable:$true] %s45_s22 }
   0xa   :  { %s4085_s23 = scalar_lea.vmem %s46_s22, 3072  ;;  %p4090_p1 = scmp.lt.s32.totalorder %s46_s22, %s46_s22 }
   0xb   :  { %p4086_p0 = scmp.ne.s32.totalorder %s46_s22, %s4085_s23  ;;  %p4091_p2 = scmp.lt.s32.totalorder %s4085_s23, %s4085_s23 }
   0xd   :  { %p4092_p3 = por %p4091_p2, %p4090_p1 }
   0xf   :  { %p4093_p4 = pnand %p4092_p3, %p4086_p0 }
  0x11   :  { %4096 = shalt.err (!%p4093_p4)
}
  0x12   :  { %s4312_s24 = smov 128   ;;  %s4313_s25 = smov 8  }
  0x13   :  { %51 = dma.hbm_to_vmem [thread:$0]  %s5153_s2, 3072, %s46_s22, [#allocation6], %s4312_s24, %s4312_s24, %s4313_s25  }
  0x14   :  { %s4314_s28 = smov [#allocation8]  }
  0x15   :  { %s71_s29 = sshll.u32 %s4314_s28, 4  ;;  %s72_s29 = int_to_ptr.vmem [resolvable:$true] %s71_s29 }
  0x16   :  { %s4105_s30 = scalar_lea.vmem %s72_s29, 128  ;;  %p4110_p6 = scmp.lt.s32.totalorder %s72_s29, %s72_s29 }
  0x17   :  { %p4106_p5 = scmp.ne.s32.totalorder %s72_s29, %s4105_s30  ;;  %p4111_p7 = scmp.lt.s32.totalorder %s4105_s30, %s4105_s30 }
  0x19   :  { %p4112_p8 = por %p4111_p7, %p4110_p6 }
  0x1b   :  { %p4113_p9 = pnand %p4112_p8, %p4106_p5 }
  0x1d   :  { %4116 = shalt.err (!%p4113_p9)
}
  0x1e   :  { %s4315_s0 = smov 64   ;;  %s4316_s17 = smov 4  }
  0x1f   :  { %77 = dma.hbm_to_vmem [thread:$0]  %s5156_s5, 128, %s72_s29, [#allocation9], %s4315_s0, %s4315_s0, %s4316_s17  }
  0x20   :  { %s4317_s2 = smov [#allocation11]   ;;  %s4318_s21 = smov [#allocation14]  }
  0x21   :  { %s95_s20 = sshll.u32 %s4317_s2, 4  ;;  %s121_s22 = sshll.u32 %s4318_s21, 4  ;;  %s96_s20 = int_to_ptr.vmem [resolvable:$true] %s95_s20  ;;  %s122_s22 = int_to_ptr.vmem [resolvable:$true] %s121_s22 }
  0x22   :  { %s4125_s23 = scalar_lea.vmem %s96_s20, 256  ;;  %p4130_p11 = scmp.lt.s32.totalorder %s96_s20, %s96_s20 }
  0x23   :  { %p4126_p10 = scmp.ne.s32.totalorder %s96_s20, %s4125_s23  ;;  %p4131_p12 = scmp.lt.s32.totalorder %s4125_s23, %s4125_s23 }
  0x25   :  { %p4132_p13 = por %p4131_p12, %p4130_p11 }
  0x27   :  { %p4133_p0 = pnand %p4132_p13, %p4126_p10 }
  0x29   :  { %4136 = shalt.err (!%p4133_p0)
}
  0x2a   :  { %101 = dma.hbm_to_vmem [thread:$0]  %s5158_s7, 256, %s96_s20, [#allocation12], %s4315_s0, %s4315_s0, %s4316_s17  }
  0x2b   :  { %s4145_s5 = scalar_lea.vmem %s122_s22, 2048  ;;  %p4150_p2 = scmp.lt.s32.totalorder %s122_s22, %s122_s22 }
  0x2c   :  { %p4146_p1 = scmp.ne.s32.totalorder %s122_s22, %s4145_s5  ;;  %p4151_p3 = scmp.lt.s32.totalorder %s4145_s5, %s4145_s5 }
  0x2e   :  { %p4152_p4 = por %p4151_p3, %p4150_p2 }
  0x30   :  { %p4153_p5 = pnand %p4152_p4, %p4146_p1 }
  0x32   :  { %4156 = shalt.err (!%p4153_p5)
}
  0x33   :  { %127 = dma.hbm_to_vmem [thread:$0]  %s5161_s10, 2048, %s122_s22, [#allocation15], %s4315_s0, %s4315_s0, %s4316_s17  }
  0x34   :  { %s4319_s28 = smov [#allocation2]   ;;  %s4320_s30 = smov [#allocation7]  }
  0x35   :  { %s34_s29 = sshll.u32 %s4319_s28, 4  ;;  %s59_s18 = sshll.u32 %s4320_s30, 4  ;;  %s35_s29 = int_to_ptr.vmem [resolvable:$true] %s34_s29  ;;  %s60_s18 = int_to_ptr.vmem [resolvable:$true] %s59_s18 }
  0x36   :  { %s4165_s7 = scalar_lea.vmem %s35_s29, 128  ;;  %p4170_p7 = scmp.lt.s32.totalorder %s35_s29, %s35_s29 }
  0x37   :  { %p4166_p6 = scmp.ne.s32.totalorder %s35_s29, %s4165_s7  ;;  %p4171_p8 = scmp.lt.s32.totalorder %s4165_s7, %s4165_s7 }
  0x39   :  { %p4172_p9 = por %p4171_p8, %p4170_p7 }
  0x3b   :  { %p4173_p10 = pnand %p4172_p9, %p4166_p6 }
  0x3d   :  { %4176 = shalt.err (!%p4173_p10)
}
  0x3e   :  { %s5169_s20 = sld [smem:[#allocation27_spill]]  ;;  %s4185_s21 = scalar_lea.vmem %s60_s18, 768 }
  0x3f   :  { %p4186_p11 = scmp.ne.s32.totalorder %s60_s18, %s4185_s21  ;;  %p4190_p12 = scmp.lt.s32.totalorder %s60_s18, %s60_s18 }
  0x40   :  { %p4191_p13 = scmp.lt.s32.totalorder %s4185_s21, %s4185_s21 }
  0x42   :  { %p4192_p0 = por %p4191_p13, %p4190_p12 }
  0x44   :  { %37 = dma.hbm_to_vmem [thread:$0]  %s5169_s20, 128, %s35_s29, [#allocation3]  }
  0x45   :  { %p4193_p1 = pnand %p4192_p0, %p4186_p11 }
  0x47   :  { %4196 = shalt.err (!%p4193_p1)
}
  0x48   :  { %s4321_s10 = smov 192   ;;  %s4322_s22 = smov 12  }
  0x49   :  { %65 = dma.hbm_to_vmem [thread:$0]  %s5155_s4, 768, %s60_s18, [#allocation6], %s4321_s10, %s4321_s10, %s4322_s22  }
  0x4a   :  { %s4323_s25 = smov [#allocation10]   ;;  %s4324_s26 = smov [#allocation13]  }
  0x4b   :  { %s83_s5 = sshll.u32 %s4323_s25, 4  ;;  %s109_s27 = sshll.u32 %s4324_s26, 4  ;;  %s84_s5 = int_to_ptr.vmem [resolvable:$true] %s83_s5  ;;  %s110_s27 = int_to_ptr.vmem [resolvable:$true] %s109_s27 }
  0x4c   :  { %s4205_s28 = scalar_lea.vmem %s84_s5, 192  ;;  %p4210_p3 = scmp.lt.s32.totalorder %s84_s5, %s84_s5 }
  0x4d   :  { %p4206_p2 = scmp.ne.s32.totalorder %s84_s5, %s4205_s28  ;;  %p4211_p4 = scmp.lt.s32.totalorder %s4205_s28, %s4205_s28 }
  0x4f   :  { %p4212_p5 = por %p4211_p4, %p4210_p3 }
  0x51   :  { %p4213_p6 = pnand %p4212_p5, %p4206_p2 }
  0x53   :  { %4216 = shalt.err (!%p4213_p6)
}
  0x54   :  { %89 = dma.hbm_to_vmem [thread:$0]  %s5157_s6, 192, %s84_s5, [#allocation9], %s4315_s0, %s4315_s0, %s4316_s17  }
  0x55   :  { %s4225_s4 = scalar_lea.vmem %s110_s27, 2048  ;;  %p4230_p8 = scmp.lt.s32.totalorder %s110_s27, %s110_s27 }
  0x56   :  { %p4226_p7 = scmp.ne.s32.totalorder %s110_s27, %s4225_s4  ;;  %p4231_p9 = scmp.lt.s32.totalorder %s4225_s4, %s4225_s4 }
  0x58   :  { %p4232_p10 = por %p4231_p9, %p4230_p8 }
  0x5a   :  { %p4233_p11 = pnand %p4232_p10, %p4226_p7 }
  0x5c   :  { %4236 = shalt.err (!%p4233_p11)
}
  0x5d   :  { %115 = dma.hbm_to_vmem [thread:$0]  %s5160_s9, 2048, %s110_s27, [#allocation12], %s4315_s0, %s4315_s0, %s4316_s17  }
  0x5e   :  { %s4325_s19 = smov [#allocation16]  }
  0x5f   :  { %s135_s2 = sshll.u32 %s4325_s19, 4  ;;  %s136_s2 = int_to_ptr.vmem [resolvable:$true] %s135_s2 }
  0x60   :  { %s4245_s20 = scalar_lea.vmem %s136_s2, 12288  ;;  %p4250_p13 = scmp.lt.s32.totalorder %s136_s2, %s136_s2 }
  0x61   :  { %p4246_p12 = scmp.ne.s32.totalorder %s136_s2, %s4245_s20  ;;  %p4251_p0 = scmp.lt.s32.totalorder %s4245_s20, %s4245_s20 }
  0x63   :  { %p4252_p1 = por %p4251_p0, %p4250_p13 }
  0x65   :  { %p4253_p2 = pnand %p4252_p1, %p4246_p12 }
  0x67   :  { %4256 = shalt.err (!%p4253_p2)
}
  0x68   :  { %s4326_s6 = smov 256   ;;  %s4327_s21 = smov 16  }
  0x69   :  { %141 = dma.hbm_to_vmem [thread:$0]  %s5163_s12, 12288, %s136_s2, [#allocation15], %s4326_s6, %s4326_s6, %s4327_s21  }
  0x6a   :  { %s4328_s23 = smov [#allocation17]  }
  0x6b   :  { %s149_s24 = sshll.u32 %s4328_s23, 4  ;;  %s150_s24 = int_to_ptr.vmem [resolvable:$true] %s149_s24 }
  0x6c   :  { %s4265_s9 = scalar_lea.vmem %s150_s24, 4096  ;;  %p4270_p4 = scmp.lt.s32.totalorder %s150_s24, %s150_s24 }
  0x6d   :  { %p4266_p3 = scmp.ne.s32.totalorder %s150_s24, %s4265_s9  ;;  %p4271_p5 = scmp.lt.s32.totalorder %s4265_s9, %s4265_s9 }
  0x6f   :  { %p4272_p6 = por %p4271_p5, %p4270_p4 }
  0x71   :  { %p4273_p7 = pnand %p4272_p6, %p4266_p3 }
  0x73   :  { %4276 = shalt.err (!%p4273_p7)
}
  0x74   :  { %155 = dma.hbm_to_vmem [thread:$0]  %s5165_s14, 4096, %s150_s24, [#allocation18], %s4315_s0, %s4315_s0, %s4316_s17  }
  0x75   :  { %4297 = dma.done.wait [#allocation3], 128  }
  0x76   :  { %4298 = vsyncadd [#allocation3], 4294967168 }
  0x77   :  { %4299 = dma.done.wait [#allocation6], 3840  }
  0x78   :  { %4300 = vsyncadd [#allocation6], 4294963456 }
  0x79   :  { %4301 = dma.done.wait [#allocation9], 320  }
  0x7a   :  { %4302 = vsyncadd [#allocation9], 4294966976 }
  0x7b   :  { %4303 = dma.done.wait [#allocation12], 2304  }
  0x7c   :  { %4304 = vsyncadd [#allocation12], 4294964992 }
  0x7d   :  { %4305 = dma.done.wait [#allocation15], 14336  }
  0x7e   :  { %4306 = vsyncadd [#allocation15], 4294952960 }
  0x7f   :  { %4307 = dma.done.wait [#allocation18], 4096  }
  0x80   :  { %4308 = vsyncadd [#allocation18], 4294963200  ;;  %v195_v0 = vld [vmem:[%s5152_s1 + $0x20] sm:$0xff]  ;;  %v196_v1 = vld [vmem:[%s5152_s1 + $0x28] sm:$0xff]  ;;  %vm311_vm0 = vcmask 523264   ;;  %vm611_vm1 = vcmask 261120  }
  0x81   :  { %v191_v2 = vld [vmem:[%s5152_s1] sm:$0xff]  ;;  %v229_v3 = vadd.f32 %v196_v1, %v195_v0  ;;  %v192_v4 = vld [vmem:[%s5152_s1 + $0x8] sm:$0xff]  ;;  %v197_v5 = vld [vmem:[%s5152_s1 + $0x30] sm:$0xff]  ;;  %v4329_v0 = vmov 0   ;;  %vm4331_vm2 = vmmov 0   ;;  %vm440_vm3 = vcmask 130048  }
  0x82   :  { %v198_v6 = vld [vmem:[%s5152_s1 + $0x38] sm:$0xff]  ;;  %v223_v7 = vadd.f32 %v192_v4, %v191_v2  ;;  %v193_v8 = vld [vmem:[%s5152_s1 + $0x10] sm:$0xff]  ;;  %v199_v14 = vld [vmem:[%s5152_s1 + $0x40] sm:$0xff]  ;;  %647 = vmatprep.mubr.bf16.mxu0 %v4329_v0  ;;  %vm750_vm4 = vcmask 130112   ;;  %vm815_vm5 = vcmask 1041409   ;;  %vm817_vm6 = vcmask 1042434  }
  0x83   :  { %v194_v9 = vld [vmem:[%s5152_s1 + $0x18] sm:$0xff]  ;;  %230 = vadd.xlane.f32.xlu1 %v229_v3  ;;  %v232_v10 = vadd.f32 %v198_v6, %v197_v5  ;;  %v201_v12 = vld [vmem:[%s5152_s1 + $0x50] sm:$0xff]  ;;  %v200_v15 = vld [vmem:[%s5152_s1 + $0x48] sm:$0xff]  ;;  %vm819_vm7 = vcmask 1043459   ;;  %vm821_vm8 = vcmask 1044484   ;;  %vm823_vm9 = vcmask 1045509  }
  0x84   :  { %224 = vadd.xlane.f32.xlu0 %v223_v7  ;;  %v226_v11 = vadd.f32 %v194_v9, %v193_v8  ;;  %v202_v13 = vld [vmem:[%s5152_s1 + $0x58] sm:$0xff]  ;;  %v235_v17 = vadd.f32 %v200_v15, %v199_v14  ;;  %v205_v18 = vld [vmem:[%s5152_s1 + $0x70] sm:$0xff]  ;;  %v203_v20 = vld [vmem:[%s5152_s1 + $0x60] sm:$0xff]  ;;  %vm825_vm10 = vcmask 1046534   ;;  %vm827_vm11 = vcmask 1047559   ;;  %s4332_s10 = smov [#allocation19]  }
  0x85   :  { %v238_v16 = vadd.f32 %v202_v13, %v201_v12  ;;  %v206_v19 = vld [vmem:[%s5152_s1 + $0x78] sm:$0xff]  ;;  %v204_v21 = vld [vmem:[%s5152_s1 + $0x68] sm:$0xff]  ;;  %v209_v22 = vld [vmem:[%s5152_s1 + $0x90] sm:$0xff]  ;;  %v4330_v13 = vmov 0.0   ;;  %vm1199_vm12 = vcmask 195712   ;;  %vm1320_vm13 = vcmask 1043456  }
  0x86   :  { %v210_v23 = vld [vmem:[%s5152_s1 + $0x98] sm:$0xff]  ;;  %v244_v24 = vadd.f32 %v206_v19, %v205_v18  ;;  %v207_v25 = vld [vmem:[%s5152_s1 + $0x80] sm:$0xff]  ;;  %v208_v26 = vld [vmem:[%s5152_s1 + $0x88] sm:$0xff]  ;;  %v241_v27 = vadd.f32 %v204_v21, %v203_v20  ;;  %3661 = vmatprep.subr.bf16.mxu1 %v4330_v13  ;;  %3665 = vmatprep.mubr.msk.bf16.mxu1 %vm4331_vm2, %v4330_v13  ;;  %vm1316_vm14 = vcmask 195584   ;;  %vm1697_vm15 = vcmask 261312   ;;  %s3345_s22 = sshll.u32 %s4332_s10, 4  ;;  %s3346_s22 = int_to_ptr.vmem [resolvable:$true] %s3345_s22 }
  0x87   :  { %233 = vadd.xlane.f32.xlu1 %v232_v10  ;;  %v213_v28 = vld [vmem:[%s5152_s1 + $0xb0] sm:$0xff]  ;;  %v214_v29 = vld [vmem:[%s5152_s1 + $0xb8] sm:$0xff]  ;;  %v250_v30 = vadd.f32 %v210_v23, %v209_v22  ;;  %v211_v31 = vld [vmem:[%s5152_s1 + $0xa0] sm:$0xff]  ;;  %v247_v32 = vadd.f32 %v208_v26, %v207_v25  ;;  %s4277_s23 = scalar_lea.vmem %s3346_s22, 128  ;;  %p4282_p9 = scmp.lt.s32.totalorder %s3346_s22, %s3346_s22 }
  0x88   :  { %227 = vadd.xlane.f32.xlu0 %v226_v11  ;;  %v212_v33 = vld [vmem:[%s5152_s1 + $0xa8] sm:$0xff]  ;;  %v217_v34 = vld [vmem:[%s5152_s1 + $0xd0] sm:$0xff]  ;;  %v218_v35 = vld [vmem:[%s5152_s1 + $0xd8] sm:$0xff]  ;;  %v256_v36 = vadd.f32 %v214_v29, %v213_v28  ;;  %p4278_p8 = scmp.ne.s32.totalorder %s3346_s22, %s4277_s23  ;;  %p4283_p10 = scmp.lt.s32.totalorder %s4277_s23, %s4277_s23 }
  0x89   :  { %v215_v37 = vld [vmem:[%s5152_s1 + $0xc0] sm:$0xff]  ;;  %v216_v38 = vld [vmem:[%s5152_s1 + $0xc8] sm:$0xff]  ;;  %v253_v39 = vadd.f32 %v212_v33, %v211_v31  ;;  %v221_v40 = vld [vmem:[%s5152_s1 + $0xf0] sm:$0xff]  ;;  %v262_v42 = vadd.f32 %v218_v35, %v217_v34 }
  0x8a   :  { %v222_v41 = vld [vmem:[%s5152_s1 + $0xf8] sm:$0xff]  ;;  %v259_v43 = vadd.f32 %v216_v38, %v215_v37  ;;  %v219_v44 = vld [vmem:[%s5152_s1 + $0xe0] sm:$0xff]  ;;  %v220_v45 = vld [vmem:[%s5152_s1 + $0xe8] sm:$0xff]  ;;  %p4284_p11 = por %p4283_p10, %p4282_p9 }
  0x8b   :  { %239 = vadd.xlane.f32.xlu1 %v238_v16  ;;  %v268_v46 = vadd.f32 %v222_v41, %v221_v40  ;;  %v265_v47 = vadd.f32 %v220_v45, %v219_v44  ;;  %v287_v48 = vld [vmem:[#allocation5] sm:$0xff]  ;;  %v288_v49 = vld [vmem:[#allocation5 + $0x8] sm:$0xff]  ;;  %v290_v53 = vld [vmem:[#allocation5 + $0x18] sm:$0xff] }
  0x8c   :  { %236 = vadd.xlane.f32.xlu0 %v235_v17  ;;  %v3833_v50 = vld [vmem:[#allocation7 + $0x1c] ss:$12 sps:$4 sm:$0xff]   ;;  %v3835_v51 = vld [vmem:[#allocation7 + $0x18] ss:$12 sps:$4 sm:$0xff]   ;;  %v315_v52 = vsel %vm311_vm0, %v288_v49, 0.0  ;;  %v312_v54 = vsel %vm311_vm0, %v287_v48, 0.0  ;;  %p4285_p12 = pnand %p4284_p11, %p4278_p8 }
  0x8d   :  { %627 = vmatprep.subr.bf16.mxu0 %v3833_v50  ;;  %v291_v55 = vld [vmem:[#allocation5 + $0x20] sm:$0xff]  ;;  %v321_v59 = vsel %vm311_vm0, %v290_v53, 0.0  ;;  %v292_v60 = vld [vmem:[#allocation5 + $0x28] sm:$0xff]  ;;  %v189_v61 = vld [vmem:[#allocation2] sm:$0xff] }
  0x8e   :  { %628 = vmatpush1.bf16.msra.mxu0 %v3835_v51  ;;  %v3836_v56 = vld [vmem:[#allocation7 + $0x4] ss:$12 sps:$4 sm:$0xff]   ;;  %v3838_v57 = vld [vmem:[#allocation7] ss:$12 sps:$4 sm:$0xff]   ;;  %v324_v58 = vsel %vm311_vm0, %v291_v55, 0.0  ;;  %v4566_v63 = vpack.c.bf16 %v189_v61, %v189_v61  ;;  %v327_v1 = vsel %vm311_vm0, %v292_v60, 0.0 }
  0x8f   :  { %245 = vadd.xlane.f32.xlu1 %v244_v24  ;;  %629 = vmatprep.subr.bf16.mxu0 %v3836_v56  ;;  %v289_v62 = vld [vmem:[#allocation5 + $0x10] sm:$0xff]  ;;  %v294_v4 = vld [vmem:[#allocation5 + $0x38] sm:$0xff]  ;;  %v295_v6 = vld [vmem:[#allocation5 + $0x40] sm:$0xff] }
  0x90   :  { %242 = vadd.xlane.f32.xlu0 %v241_v27  ;;  %v293_v2 = vld [vmem:[#allocation5 + $0x30] sm:$0xff]  ;;  %v318_v3 = vsel %vm311_vm0, %v289_v62, 0.0  ;;  %v333_v5 = vsel %vm311_vm0, %v294_v4, 0.0  ;;  %v296_v8 = vld [vmem:[#allocation5 + $0x48] sm:$0xff]  ;;  %v298_v10 = vld [vmem:[#allocation5 + $0x58] sm:$0xff]  ;;  %v336_v11 = vsel %vm311_vm0, %v295_v6, 0.0 }
  0x91   :  { %v330_v7 = vsel %vm311_vm0, %v293_v2, 0.0  ;;  %v339_v9 = vsel %vm311_vm0, %v296_v8, 0.0  ;;  %v3839_v12 = vld [vmem:[#allocation8] sm:$0xff]   ;;  %v345_v15 = vsel %vm311_vm0, %v298_v10, 0.0  ;;  %v299_v16 = vld [vmem:[#allocation5 + $0x60] sm:$0xff]  ;;  %v300_v18 = vld [vmem:[#allocation5 + $0x68] sm:$0xff] }
  0x92   :  { %630 = vmatpush1.bf16.msra.mxu0 %v3838_v57  ;;  %v297_v14 = vld [vmem:[#allocation5 + $0x50] sm:$0xff]  ;;  %v302_v20 = vld [vmem:[#allocation5 + $0x78] sm:$0xff]  ;;  %v304_v21 = vld [vmem:[#allocation5 + $0x88] sm:$0xff]  ;;  %v348_v22 = vsel %vm311_vm0, %v299_v16, 0.0  ;;  %v351_v23 = vsel %vm311_vm0, %v300_v18, 0.0 }
  0x93   :  { %251 = vadd.xlane.f32.xlu1 %v250_v30  ;;  %3669 = vmatprep.subr.bf16.mxu0 %v4330_v13  ;;  %v342_v17 = vsel %vm311_vm0, %v297_v14, 0.0  ;;  %v301_v19 = vld [vmem:[#allocation5 + $0x70] sm:$0xff]  ;;  %v357_v25 = vsel %vm311_vm0, %v302_v20, 0.0  ;;  %v363_v26 = vsel %vm311_vm0, %v304_v21, 0.0  ;;  %v303_v27 = vld [vmem:[#allocation5 + $0x80] sm:$0xff]  ;;  %v306_v28 = vld [vmem:[#allocation5 + $0x98] sm:$0xff] }
  0x94   :  { %248 = vadd.xlane.f32.xlu0 %v247_v32  ;;  %v354_v24 = vsel %vm311_vm0, %v301_v19, 0.0  ;;  %v305_v29 = vld [vmem:[#allocation5 + $0x90] sm:$0xff]  ;;  %v360_v30 = vsel %vm311_vm0, %v303_v27, 0.0  ;;  %v308_v31 = vld [vmem:[#allocation5 + $0xa8] sm:$0xff]  ;;  %v369_v32 = vsel %vm311_vm0, %v306_v28, 0.0  ;;  %v307_v33 = vld [vmem:[#allocation5 + $0xa0] sm:$0xff] }
  0x95   :  { %3365 = vmatmul.mubr.msk.bf16.vlgmr.msra.gmra.mxu0 %vm611_vm1, %v4566_v63  ;;  %v366_v34 = vsel %vm311_vm0, %v305_v29, 0.0  ;;  %v310_v35 = vld [vmem:[#allocation5 + $0xb8] sm:$0xff]  ;;  %v309_v37 = vld [vmem:[#allocation5 + $0xb0] sm:$0xff]  ;;  %v372_v38 = vsel %vm311_vm0, %v307_v33, 0.0  ;;  %v409_v41 = vld [vmem:[%s5154_s3 + $0x8] sm:$0xff] }
  0x96   :  { %3670 = vmatpush3.bf16.msra.mxu0 %v3839_v12  ;;  %3671 = vmatprep.mubr.msk.bf16.mxu0 %vm4331_vm2, %v4330_v13  ;;  %v378_v40 = vsel %vm311_vm0, %v309_v37, 0.0  ;;  %v413_v45 = vld [vmem:[%s5154_s3 + $0x28] sm:$0xff]  ;;  %v411_v50 = vld [vmem:[%s5154_s3 + $0x18] sm:$0xff]  ;;  %v414_v56 = vld [vmem:[%s5154_s3 + $0x30] sm:$0xff] }
  0x97   :  { %257 = vadd.xlane.f32.xlu1 %v256_v36  ;;  %3695 = vmatprep.subr.bf16.mxu0 %v4330_v13  ;;  %v375_v36 = vsel %vm311_vm0, %v308_v31, 0.0  ;;  %v456_v48 = vsel %vm440_vm3, %v413_v45, 0.0  ;;  %v450_v51 = vsel %vm440_vm3, %v411_v50, 0.0  ;;  %v3842_v53 = vld [vmem:[#allocation7 + $0x8] ss:$12 sps:$4 sm:$0xff]   ;;  %v416_v61 = vld [vmem:[%s5154_s3 + $0x40] sm:$0xff] }
  0x98   :  { %254 = vadd.xlane.f32.xlu0 %v253_v39  ;;  %v381_v39 = vsel %vm311_vm0, %v310_v35, 0.0  ;;  %v415_v55 = vld [vmem:[%s5154_s3 + $0x38] sm:$0xff]  ;;  %v3848_v2 = vld [vmem:[%s5159_s8 + $0x70] sm:$0xff]   ;;  %v425_v8 = vld [vmem:[%s5154_s3 + $0x88] sm:$0xff] }
  0x99   :  { %v462_v57 = vsel %vm440_vm3, %v415_v55, 0.0  ;;  %v3846_v60 = vld [vmem:[%s5159_s8 + $0x78] sm:$0xff]   ;;  %v418_v4 = vld [vmem:[%s5154_s3 + $0x50] sm:$0xff]  ;;  %v424_v10 = vld [vmem:[%s5154_s3 + $0x80] sm:$0xff]  ;;  %v492_v19 = vsel %vm440_vm3, %v425_v8, 0.0 }
  0x9a   :  { %v423_v6 = vld [vmem:[%s5154_s3 + $0x78] sm:$0xff]  ;;  %v471_v12 = vsel %vm440_vm3, %v418_v4, 0.0  ;;  %v3852_v20 = vld [vmem:[%s5159_s8 + $0x60] sm:$0xff]   ;;  %v489_v21 = vsel %vm440_vm3, %v424_v10, 0.0  ;;  %v3856_v27 = vld [vmem:[%s5159_s8 + $0x48] sm:$0xff]  }
  0x9b   :  { %263 = vadd.xlane.f32.xlu1 %v262_v42  ;;  %v408_v42 = vld [vmem:[%s5154_s3] sm:$0xff]  ;;  %v431_v31 = vld [vmem:[%s5154_s3 + $0xb8] sm:$0xff]  ;;  %v430_v33 = vld [vmem:[%s5154_s3 + $0xb0] sm:$0xff] }
  0x9c   :  { %260 = vadd.xlane.f32.xlu0 %v259_v43  ;;  %v444_v43 = vsel %vm440_vm3, %v409_v41, 0.0  ;;  %v441_v44 = vsel %vm440_vm3, %v408_v42, 0.0  ;;  %v428_v29 = vld [vmem:[%s5154_s3 + $0xa0] sm:$0xff]  ;;  %v507_v35 = vsel %vm440_vm3, %v430_v33, 0.0 }
  0x9f   :  { %269 = vadd.xlane.f32.xlu1 %v268_v46  ;;  %v412_v46 = vld [vmem:[%s5154_s3 + $0x20] sm:$0xff] }
  0xa0   :  { %266 = vadd.xlane.f32.xlu0 %v265_v47  ;;  %v3840_v47 = vld [vmem:[#allocation7 + $0x20] ss:$12 sps:$4 sm:$0xff]   ;;  %v453_v49 = vsel %vm440_vm3, %v412_v46, 0.0 }
  0xa1   :  { %3662 = vmatpush3.bf16.msra.mxu1 %v3840_v47 }
  0xa2   :  { %3663 = vmatprep.subr.bf16.mxu1 %v4330_v13 }
  0xa3   :  { %316 = vadd.xlane.f32.xlu1 %v315_v52  ;;  %v410_v52 = vld [vmem:[%s5154_s3 + $0x10] sm:$0xff] }
  0xa4   :  { %313 = vadd.xlane.f32.xlu0 %v312_v54  ;;  %v447_v54 = vsel %vm440_vm3, %v410_v52, 0.0 }
  0xa5   :  { %3664 = vmatpush3.bf16.msra.mxu1 %v3842_v53 }
  0xa6   :  { %3675 = vmatprep.subr.bf16.mxu1 %v4330_v13 }
  0xa7   :  { %325 = vadd.xlane.f32.xlu1 %v324_v58  ;;  %v417_v58 = vld [vmem:[%s5154_s3 + $0x48] sm:$0xff] }
  0xa8   :  { %322 = vadd.xlane.f32.xlu0 %v321_v59  ;;  %v459_v59 = vsel %vm440_vm3, %v414_v56, 0.0  ;;  %3666 = vmatmul.mubr.msk.bf16.vlgmr.msra.gmra.mxu1 %vm611_vm1, %v4566_v63  ;;  %v468_v62 = vsel %vm440_vm3, %v417_v58, 0.0  ;;  %v421_v63 = vld [vmem:[%s5154_s3 + $0x68] sm:$0xff] }
  0xa9   :  { %3676 = vmatpush3.bf16.msra.mxu1 %v3846_v60  ;;  %3691 = vmatprep.mubr.msk.bf16.mxu1 %vm4331_vm2, %v4330_v13  ;;  %v480_v14 = vsel %vm440_vm3, %v421_v63, 0.0 }
  0xaa   :  { %3677 = vmatprep.subr.bf16.mxu1 %v4330_v13 }
  0xab   :  { %328 = vadd.xlane.f32.xlu1 %v327_v1  ;;  %v419_v1 = vld [vmem:[%s5154_s3 + $0x58] sm:$0xff] }
  0xac   :  { %319 = vadd.xlane.f32.xlu0 %v318_v3  ;;  %v465_v3 = vsel %vm440_vm3, %v416_v61, 0.0 }
  0xad   :  { %3678 = vmatpush3.bf16.msra.mxu1 %v3848_v2 }
  0xae   :  { %3679 = vmatprep.subr.bf16.mxu1 %v4330_v13 }
  0xaf   :  { %334 = vadd.xlane.f32.xlu1 %v333_v5  ;;  %v420_v5 = vld [vmem:[%s5154_s3 + $0x60] sm:$0xff] }
  0xb0   :  { %331 = vadd.xlane.f32.xlu0 %v330_v7  ;;  %v422_v7 = vld [vmem:[%s5154_s3 + $0x70] sm:$0xff]  ;;  %v477_v16 = vsel %vm440_vm3, %v420_v5, 0.0 }
  0xb1   :  { %v483_v18 = vsel %vm440_vm3, %v422_v7, 0.0 }
  0xb3   :  { %340 = vadd.xlane.f32.xlu1 %v339_v9  ;;  %v474_v9 = vsel %vm440_vm3, %v419_v1, 0.0 }
  0xb4   :  { %337 = vadd.xlane.f32.xlu0 %v336_v11  ;;  %v427_v11 = vld [vmem:[%s5154_s3 + $0x98] sm:$0xff] }
  0xb7   :  { %346 = vadd.xlane.f32.xlu1 %v345_v15  ;;  %v3850_v15 = vld [vmem:[%s5159_s8 + $0x68] sm:$0xff]  }
  0xb8   :  { %343 = vadd.xlane.f32.xlu0 %v342_v17  ;;  %v486_v17 = vsel %vm440_vm3, %v423_v6, 0.0  ;;  %3680 = vmatpush3.bf16.msra.mxu1 %v3850_v15 }
  0xb9   :  { %3681 = vmatprep.subr.bf16.mxu1 %v4330_v13 }
  0xbb   :  { %352 = vadd.xlane.f32.xlu1 %v351_v23  ;;  %v3854_v23 = vld [vmem:[%s5159_s8 + $0x58] sm:$0xff]  }
  0xbc   :  { %349 = vadd.xlane.f32.xlu0 %v348_v22  ;;  %v498_v22 = vsel %vm440_vm3, %v427_v11, 0.0  ;;  %3682 = vmatpush3.bf16.msra.mxu1 %v3852_v20 }
  0xbd   :  { %3683 = vmatprep.subr.bf16.mxu1 %v4330_v13 }
  0xbf   :  { %358 = vadd.xlane.f32.xlu1 %v357_v25  ;;  %v426_v25 = vld [vmem:[%s5154_s3 + $0x90] sm:$0xff] }
  0xc0   :  { %355 = vadd.xlane.f32.xlu0 %v354_v24  ;;  %v3855_v24 = vld [vmem:[%s5159_s8 + $0x50] sm:$0xff]   ;;  %3684 = vmatpush3.bf16.msra.mxu1 %v3854_v23  ;;  %v495_v28 = vsel %vm440_vm3, %v426_v25, 0.0 }
  0xc1   :  { %3685 = vmatprep.subr.bf16.mxu1 %v4330_v13 }
  0xc3   :  { %364 = vadd.xlane.f32.xlu1 %v363_v26  ;;  %v429_v26 = vld [vmem:[%s5154_s3 + $0xa8] sm:$0xff] }
  0xc4   :  { %361 = vadd.xlane.f32.xlu0 %v360_v30  ;;  %3686 = vmatpush3.bf16.msra.mxu1 %v3855_v24  ;;  %v504_v30 = vsel %vm440_vm3, %v429_v26, 0.0 }
  0xc5   :  { %3687 = vmatprep.subr.bf16.mxu1 %v4330_v13 }
  0xc7   :  { %370 = vadd.xlane.f32.xlu1 %v369_v32  ;;  %v501_v32 = vsel %vm440_vm3, %v428_v29, 0.0 }
  0xc8   :  { %367 = vadd.xlane.f32.xlu0 %v366_v34  ;;  %3688 = vmatpush3.bf16.msra.mxu1 %v3856_v27  ;;  %v510_v34 = vsel %vm440_vm3, %v431_v31, 0.0 }
  0xc9   :  { %3689 = vmatprep.subr.bf16.mxu1 %v4330_v13 }
  0xcb   :  { %376 = vadd.xlane.f32.xlu1 %v375_v36 }
  0xcc   :  { %373 = vadd.xlane.f32.xlu0 %v372_v38 }
  0xcf   :  { %382 = vadd.xlane.f32.xlu1 %v381_v39 }
  0xd0   :  { %379 = vadd.xlane.f32.xlu0 %v378_v40  ;;  %v696_v40 = vlaneseq }
  0xd2   :  { %v4730_v50 = vshrl.u32 %v696_v40, 7 }
  0xd3   :  { %445 = vadd.xlane.f32.xlu1 %v444_v43 }
  0xd4   :  { %442 = vadd.xlane.f32.xlu0 %v441_v44  ;;  %v4728_v44 = vand.u32 127, %v696_v40 }
  0xd6   :  { %v745_v52 = vadd.s32 4294967288, %v4728_v44  ;;  %v4735_v61 = vsub.s32 %v4728_v44, %v4730_v50 }
  0xd7   :  { %457 = vadd.xlane.f32.xlu1 %v456_v48 }
  0xd8   :  { %454 = vadd.xlane.f32.xlu0 %v453_v49  ;;  %v4738_v2 = vsub.s32 %v745_v52, %v4730_v50 }
  0xdb   :  { %451 = vadd.xlane.f32.xlu1 %v450_v51 }
  0xdc   :  { %448 = vadd.xlane.f32.xlu0 %v447_v54 }
  0xdf   :  { %463 = vadd.xlane.f32.xlu1 %v462_v57 }
  0xe0   :  { %460 = vadd.xlane.f32.xlu0 %v459_v59 }
  0xe3   :  { %469 = vadd.xlane.f32.xlu1 %v468_v62 }
  0xe4   :  { %466 = vadd.xlane.f32.xlu0 %v465_v3 }
  0xe7   :  { %475 = vadd.xlane.f32.xlu1 %v474_v9 }
  0xe8   :  { %472 = vadd.xlane.f32.xlu0 %v471_v12 }
  0xeb   :  { %481 = vadd.xlane.f32.xlu1 %v480_v14 }
  0xec   :  { %478 = vadd.xlane.f32.xlu0 %v477_v16 }
  0xef   :  { %487 = vadd.xlane.f32.xlu1 %v486_v17 }
  0xf0   :  { %484 = vadd.xlane.f32.xlu0 %v483_v18 }
  0xf3   :  { %493 = vadd.xlane.f32.xlu1 %v492_v19 }
  0xf4   :  { %490 = vadd.xlane.f32.xlu0 %v489_v21 }
  0xf7   :  { %499 = vadd.xlane.f32.xlu1 %v498_v22 }
  0xf8   :  { %496 = vadd.xlane.f32.xlu0 %v495_v28 }
  0xfb   :  { %505 = vadd.xlane.f32.xlu1 %v504_v30 }
  0xfc   :  { %502 = vadd.xlane.f32.xlu0 %v501_v32 }
  0xff   :  { %511 = vadd.xlane.f32.xlu1 %v510_v34 }
 0x100   :  { %508 = vadd.xlane.f32.xlu0 %v507_v35 }
 0x10c   :  { %v231_v36 = vpop.xlane.xlu1 %230 }
 0x10d   :  { %v225_v37 = vpop.xlane.xlu0 %224  ;;  %v273_v46 = vmul.f32 0.00390625, %v231_v36 }
 0x10e   :  { %v271_v48 = vmul.f32 0.00390625, %v225_v37 }
 0x110   :  { %v234_v38 = vpop.xlane.xlu1 %233 }
 0x111   :  { %v228_v39 = vpop.xlane.xlu0 %227  ;;  %v274_v43 = vmul.f32 0.00390625, %v234_v38 }
 0x112   :  { %v272_v45 = vmul.f32 0.00390625, %v228_v39 }
 0x113   :  { %v702_v51 = vpack.c.bf16 %v274_v43, %v273_v46 }
 0x114   :  { %v240_v41 = vpop.xlane.xlu1 %239  ;;  %v701_v53 = vpack.c.bf16 %v272_v45, %v271_v48 }
 0x115   :  { %v237_v42 = vpop.xlane.xlu0 %236  ;;  %v276_v54 = vmul.f32 0.00390625, %v240_v41  ;;  %v725_v62 = vunpack.c.l.b16 %v702_v51  ;;  %v726_v3 = vunpack.c.h.b16 %v702_v51 }
 0x116   :  { %v275_v55 = vmul.f32 0.00390625, %v237_v42  ;;  %v723_v4 = vunpack.c.l.b16 %v701_v53  ;;  %v724_v5 = vunpack.c.h.b16 %v701_v53 }
 0x117   :  { %v755_v11 = vrot.slane %v725_v62, %v4735_v61  ;;  %v759_v14 = vrot.slane %v726_v3, %v4738_v2 }
 0x118   :  { %v246_v47 = vpop.xlane.xlu1 %245  ;;  %v703_v63 = vpack.c.bf16 %v276_v54, %v275_v55  ;;  %v744_v15 = vrot.slane %v723_v4, %v4735_v61  ;;  %v749_v18 = vrot.slane %v724_v5, %v4738_v2 }
 0x119   :  { %v243_v49 = vpop.xlane.xlu0 %242  ;;  %v278_v56 = vmul.f32 0.00390625, %v246_v47  ;;  %v760_v30 = vsel %vm750_vm4, %v759_v14, %v755_v11  ;;  %v3844_v11 = vld [vmem:[%s5159_s8 + $0x28] sm:$0xff]   ;;  %v3847_v14 = vld [vmem:[%s5159_s8 + $0x18] sm:$0xff]  }
 0x11a   :  { %v277_v57 = vmul.f32 0.00390625, %v243_v49  ;;  %v727_v16 = vunpack.c.l.b16 %v703_v63  ;;  %v728_v17 = vunpack.c.h.b16 %v703_v63  ;;  %v751_v33 = vsel %vm750_vm4, %v749_v18, %v744_v15  ;;  %v3849_v15 = vld [vmem:[%s5159_s8 + $0x10] sm:$0xff]  }
 0x11b   :  { %v816_v54 = vsel %vm815_vm5, %v760_v30, %v751_v33  ;;  %v4807_v18 = vsub.s32 0, %v4730_v50  ;;  %v434_v33 = vld [vmem:[%s5154_s3 + $0xd0] sm:$0xff] }
 0x11c   :  { %v252_v58 = vpop.xlane.xlu1 %251  ;;  %v704_v6 = vpack.c.bf16 %v278_v56, %v277_v57  ;;  %v764_v31 = vrot.slane %v727_v16, %v4735_v61  ;;  %v768_v32 = vrot.slane %v728_v17, %v4738_v2  ;;  %v3851_v16 = vld [vmem:[%s5159_s8 + $0x8] sm:$0xff]   ;;  %v3853_v17 = vld [vmem:[%s5159_s8] sm:$0xff]  }
 0x11d   :  { %v280_v59 = vmul.f32 0.00390625, %v252_v58  ;;  %v249_v60 = vpop.xlane.xlu0 %248 }
 0x11e   :  { %v279_v1 = vmul.f32 0.00390625, %v249_v60  ;;  %v729_v19 = vunpack.c.l.b16 %v704_v6  ;;  %v730_v20 = vunpack.c.h.b16 %v704_v6  ;;  %v769_v48 = vsel %vm750_vm4, %v768_v32, %v764_v31  ;;  %v435_v32 = vld [vmem:[%s5154_s3 + $0xd8] sm:$0xff] }
 0x11f   :  { %v818_v56 = vsel %vm817_vm6, %v769_v48, %v816_v54 }
 0x120   :  { %v258_v7 = vpop.xlane.xlu1 %257  ;;  %v705_v8 = vpack.c.bf16 %v280_v59, %v279_v1  ;;  %v773_v34 = vrot.slane %v729_v19, %v4735_v61  ;;  %v777_v35 = vrot.slane %v730_v20, %v4738_v2  ;;  %v4812_v19 = vld [vmem:[%s5162_s11] sm:$0xff] }
 0x121   :  { %v282_v9 = vmul.f32 0.00390625, %v258_v7  ;;  %v255_v10 = vpop.xlane.xlu0 %254  ;;  %v699_v20 = vrot.slane %v4812_v19, %v4807_v18 }
 0x122   :  { %v281_v12 = vmul.f32 0.00390625, %v255_v10  ;;  %v731_v23 = vunpack.c.l.b16 %v705_v8  ;;  %v732_v24 = vunpack.c.h.b16 %v705_v8  ;;  %v778_v49 = vsel %vm750_vm4, %v777_v35, %v773_v34  ;;  %v3841_v8 = vld [vmem:[%s5159_s8 + $0x38] sm:$0xff]   ;;  %v3843_v10 = vld [vmem:[%s5159_s8 + $0x30] sm:$0xff]  }
 0x123   :  { %v820_v60 = vsel %vm819_vm7, %v778_v49, %v818_v56  ;;  %v522_v34 = vsel %vm440_vm3, %v435_v32, 0.0  ;;  %v519_v35 = vsel %vm440_vm3, %v434_v33, 0.0  ;;  %v3870_v56 = vld [vmem:[#allocation13 + $0x68] sm:$0xff]  }
 0x124   :  { %v706_v21 = vpack.c.bf16 %v282_v9, %v281_v12  ;;  %v264_v22 = vpop.xlane.xlu1 %263  ;;  %v782_v38 = vrot.slane %v731_v23, %v4735_v61  ;;  %v786_v39 = vrot.slane %v732_v24, %v4738_v2  ;;  %v3845_v12 = vld [vmem:[%s5159_s8 + $0x20] sm:$0xff]  }
 0x125   :  { %v284_v25 = vmul.f32 0.00390625, %v264_v22  ;;  %v261_v26 = vpop.xlane.xlu0 %260 }
 0x126   :  { %v733_v27 = vunpack.c.l.b16 %v706_v21  ;;  %v734_v28 = vunpack.c.h.b16 %v706_v21  ;;  %v283_v29 = vmul.f32 0.00390625, %v261_v26  ;;  %v787_v55 = vsel %vm750_vm4, %v786_v39, %v782_v38 }
 0x127   :  { %v822_v1 = vsel %vm821_vm8, %v787_v55, %v820_v60 }
 0x128   :  { %v707_v36 = vpack.c.bf16 %v284_v25, %v283_v29  ;;  %v270_v37 = vpop.xlane.xlu1 %269  ;;  %v791_v40 = vrot.slane %v733_v27, %v4735_v61  ;;  %v795_v43 = vrot.slane %v734_v28, %v4738_v2  ;;  %v3857_v27 = vld [vmem:[%s5159_s8 + $0x40] sm:$0xff]   ;;  %v433_v28 = vld [vmem:[%s5154_s3 + $0xc8] sm:$0xff] }
 0x129   :  { %v286_v41 = vmul.f32 0.00390625, %v270_v37  ;;  %v267_v42 = vpop.xlane.xlu0 %266  ;;  %v432_v29 = vld [vmem:[%s5154_s3 + $0xc0] sm:$0xff]  ;;  %3690 = vmatpush3.bf16.msra.mxu1 %v3857_v27  ;;  %v516_v30 = vsel %vm440_vm3, %v433_v28, 0.0 }
 0x12a   :  { %v735_v45 = vunpack.c.l.b16 %v707_v36  ;;  %v736_v46 = vunpack.c.h.b16 %v707_v36  ;;  %v285_v47 = vmul.f32 0.00390625, %v267_v42  ;;  %v796_v57 = vsel %vm750_vm4, %v795_v43, %v791_v40  ;;  %517 = vadd.xlane.f32.xlu1 %v516_v30  ;;  %3715 = vmatprep.subr.bf16.mxu1 %v4330_v13  ;;  %v437_v36 = vld [vmem:[%s5154_s3 + $0xe8] sm:$0xff]  ;;  %v436_v37 = vld [vmem:[%s5154_s3 + $0xe0] sm:$0xff]  ;;  %v439_v40 = vld [vmem:[%s5154_s3 + $0xf8] sm:$0xff] }
 0x12b   :  { %v824_v63 = vsel %vm823_vm9, %v796_v57, %v822_v1  ;;  %v513_v31 = vsel %vm440_vm3, %v432_v29, 0.0  ;;  %v528_v38 = vsel %vm440_vm3, %v437_v36, 0.0  ;;  %v525_v39 = vsel %vm440_vm3, %v436_v37, 0.0 }
 0x12c   :  { %v800_v51 = vrot.slane %v735_v45, %v4735_v61  ;;  %v804_v52 = vrot.slane %v736_v46, %v4738_v2  ;;  %v708_v53 = vpack.c.bf16 %v286_v41, %v285_v47  ;;  %514 = vadd.xlane.f32.xlu0 %v513_v31  ;;  %v438_v41 = vld [vmem:[%s5154_s3 + $0xf0] sm:$0xff]  ;;  %v534_v42 = vsel %vm440_vm3, %v439_v40, 0.0  ;;  %v317_v48 = vpop.xlane.xlu1 %316 }
 0x12d   :  { %v531_v43 = vsel %vm440_vm3, %v438_v41, 0.0  ;;  %v314_v45 = vpop.xlane.xlu0 %313  ;;  %v3868_v46 = vld [vmem:[#allocation13 + $0x78] sm:$0xff]   ;;  %v3869_v47 = vld [vmem:[#allocation13 + $0x70] sm:$0xff]  }
 0x12e   :  { %v737_v58 = vunpack.c.l.b16 %v708_v53  ;;  %v738_v59 = vunpack.c.h.b16 %v708_v53  ;;  %v805_v62 = vsel %vm750_vm4, %v804_v52, %v800_v51  ;;  %523 = vadd.xlane.f32.xlu1 %v522_v34 }
 0x12f   :  { %v826_v5 = vsel %vm825_vm10, %v805_v62, %v824_v63  ;;  %v3872_v62 = vld [vmem:[#allocation13 + $0x58] sm:$0xff]  }
 0x130   :  { %v809_v3 = vrot.slane %v737_v58, %v4735_v61  ;;  %v813_v4 = vrot.slane %v738_v59, %v4738_v2  ;;  %520 = vadd.xlane.f32.xlu0 %v519_v35  ;;  %v326_v52 = vpop.xlane.xlu1 %325  ;;  %v3871_v59 = vld [vmem:[#allocation13 + $0x60] sm:$0xff]  }
 0x131   :  { %v323_v49 = vpop.xlane.xlu0 %322 }
 0x132   :  { %v814_v6 = vsel %vm750_vm4, %v813_v4, %v809_v3  ;;  %529 = vadd.xlane.f32.xlu1 %v528_v38 }
 0x133   :  { %v828_v7 = vsel %vm827_vm11, %v814_v6, %v826_v5 }
 0x134   :  { %v829_v9 = vpack.c.b16 %v828_v7, %v828_v7  ;;  %526 = vadd.xlane.f32.xlu0 %v525_v39  ;;  %v329_v58 = vpop.xlane.xlu1 %328 }
 0x135   :  { %v320_v55 = vpop.xlane.xlu0 %319 }
 0x136   :  { %3672 = vmatmul.mubr.msk.bf16.vlgmr.msra.gmra.mxu0 %vm440_vm3, %v829_v9  ;;  %535 = vadd.xlane.f32.xlu1 %v534_v42 }
 0x137   :  { %3696 = vmatpush3.bf16.msra.mxu0 %v3841_v8  ;;  %3711 = vmatprep.mubr.msk.bf16.mxu0 %vm4331_vm2, %v4330_v13 }
 0x138   :  { %3697 = vmatprep.subr.bf16.mxu0 %v4330_v13  ;;  %532 = vadd.xlane.f32.xlu0 %v531_v43  ;;  %v335_v1 = vpop.xlane.xlu1 %334 }
 0x139   :  { %v332_v60 = vpop.xlane.xlu0 %331  ;;  %v391_v27 = vmul.f32 0.015625, %v335_v1 }
 0x13b   :  { %3698 = vmatpush3.bf16.msra.mxu0 %v3843_v10  ;;  %v387_v10 = vmul.f32 0.015625, %v323_v49 }
 0x13c   :  { %3699 = vmatprep.subr.bf16.mxu0 %v4330_v13  ;;  %v341_v4 = vpop.xlane.xlu1 %340 }
 0x13d   :  { %v338_v3 = vpop.xlane.xlu0 %337  ;;  %v393_v35 = vmul.f32 0.015625, %v341_v4 }
 0x13e   :  { %v392_v34 = vmul.f32 0.015625, %v338_v3 }
 0x13f   :  { %3700 = vmatpush3.bf16.msra.mxu0 %v3844_v11  ;;  %v388_v11 = vmul.f32 0.015625, %v326_v52 }
 0x140   :  { %3701 = vmatprep.subr.bf16.mxu0 %v4330_v13  ;;  %v347_v5 = vpop.xlane.xlu1 %346 }
 0x141   :  { %v344_v63 = vpop.xlane.xlu0 %343  ;;  %v395_v49 = vmul.f32 0.015625, %v347_v5 }
 0x142   :  { %v394_v36 = vmul.f32 0.015625, %v344_v63 }
 0x143   :  { %3702 = vmatpush3.bf16.msra.mxu0 %v3845_v12  ;;  %v384_v12 = vmul.f32 0.015625, %v314_v45 }
 0x144   :  { %3703 = vmatprep.subr.bf16.mxu0 %v4330_v13  ;;  %v353_v7 = vpop.xlane.xlu1 %352 }
 0x145   :  { %v350_v6 = vpop.xlane.xlu0 %349 }
 0x146   :  { %v396_v52 = vmul.f32 0.015625, %v350_v6  ;;  %v1129_v6 = vpack.c.bf16 %v395_v49, %v395_v49 }
 0x147   :  { %3704 = vmatpush3.bf16.msra.mxu0 %v3847_v14  ;;  %v385_v14 = vmul.f32 0.015625, %v317_v48  ;;  %v1128_v48 = vpack.c.bf16 %v394_v36, %v393_v35 }
 0x148   :  { %3705 = vmatprep.subr.bf16.mxu0 %v4330_v13  ;;  %v359_v9 = vpop.xlane.xlu1 %358 }
 0x149   :  { %v356_v8 = vpop.xlane.xlu0 %355  ;;  %v399_v1 = vmul.f32 0.015625, %v359_v9  ;;  %v1170_v5 = vunpack.c.l.b16 %v1128_v48 }
 0x14b   :  { %3706 = vmatpush3.bf16.msra.mxu0 %v3849_v15 }
 0x14c   :  { %3707 = vmatprep.subr.bf16.mxu0 %v4330_v13 }
 0x14d   :  { %v362_v15 = vpop.xlane.xlu0 %361 }
 0x14e   :  { %v400_v3 = vmul.f32 0.015625, %v362_v15 }
 0x14f   :  { %3708 = vmatpush3.bf16.msra.mxu0 %v3851_v16  ;;  %v389_v16 = vmul.f32 0.015625, %v329_v58 }
 0x150   :  { %3709 = vmatprep.subr.bf16.mxu0 %v4330_v13 }
 0x151   :  { %v368_v31 = vpop.xlane.xlu0 %367 }
 0x153   :  { %3710 = vmatpush3.bf16.msra.mxu0 %v3853_v17  ;;  %v1124_v17 = vpack.c.bf16 %v388_v11, %v387_v10 }
 0x154   :  { %3723 = vmatprep.subr.bf16.mxu0 %v4330_v13 }
 0x155   :  { %v649_v21 = vpop.f32.mrf.mxu0  ;;  %v1164_v28 = vunpack.c.l.b16 %v1124_v17  ;;  %v1165_v29 = vunpack.c.h.b16 %v1124_v17  ;;  %v402_v17 = vmul.f32 0.015625, %v368_v31 }
 0x156   :  { %v700_v22 = vadd.f32 %v699_v20, %v649_v21  ;;  %v386_v20 = vmul.f32 0.015625, %v320_v55  ;;  %v1122_v21 = vpack.c.bf16 %v385_v14, %v384_v12  ;;  %v1171_v12 = vunpack.c.h.b16 %v1128_v48 }
 0x157   :  { %v4816_v23 = vpop.f32.mrf.mxu0  ;;  %v1204_v41 = vrot.slane %v1164_v28, %v4735_v61  ;;  %v1208_v42 = vrot.slane %v1165_v29, %v4738_v2 }
 0x158   :  { %v911_v24 = vpack.c.bf16 %v700_v22, %v700_v22  ;;  %v365_v22 = vpop.xlane.xlu1 %364  ;;  %v1123_v30 = vpack.c.bf16 %v386_v20, %v386_v20  ;;  %v1161_v32 = vunpack.c.l.b16 %v1122_v21  ;;  %v1162_v33 = vunpack.c.h.b16 %v1122_v21 }
 0x159   :  { %v653_v25 = vpop.f32.mrf.mxu0  ;;  %v1209_v58 = vsel %vm750_vm4, %v1208_v42, %v1204_v41  ;;  %v1236_v29 = vrot.slane %v1171_v12, %v4738_v2 }
 0x15a   :  { %3712 = vmatmul.mubr.bf16.vlgmr.msra.gmra.mxu0 %v911_v24  ;;  %v1194_v24 = vadd.s32 4294967280, %v4728_v44  ;;  %v1125_v25 = vpack.c.bf16 %v389_v16, %v389_v16  ;;  %v1163_v43 = vunpack.c.l.b16 %v1123_v30  ;;  %v1188_v45 = vrot.slane %v1161_v32, %v4735_v61 }
 0x15b   :  { %v654_v26 = vpop.f32.mrf.mxu0  ;;  %3739 = vmatprep.mubr.msk.bf16.mxu0 %vm4331_vm2, %v4330_v13  ;;  %3724 = vmatpush3.bf16.msra.mxu0 %v3868_v46  ;;  %v1192_v46 = vrot.slane %v1162_v33, %v4738_v2  ;;  %v401_v16 = vmul.f32 0.015625, %v365_v22 }
 0x15c   :  { %3725 = vmatprep.subr.bf16.mxu0 %v4330_v13  ;;  %v390_v26 = vmul.f32 0.015625, %v332_v60  ;;  %v4865_v37 = vsub.s32 %v1194_v24, %v4730_v50  ;;  %v1166_v38 = vunpack.c.l.b16 %v1125_v25  ;;  %v371_v40 = vpop.xlane.xlu1 %370  ;;  %v1132_v24 = vpack.c.bf16 %v400_v3, %v399_v1 }
 0x15d   :  { %v1193_v63 = vsel %vm750_vm4, %v1192_v46, %v1188_v45  ;;  %v403_v20 = vmul.f32 0.015625, %v371_v40  ;;  %v1232_v25 = vrot.slane %v1170_v5, %v4735_v61 }
 0x15e   :  { %v1126_v39 = vpack.c.bf16 %v391_v27, %v390_v26  ;;  %v1213_v55 = vrot.slane %v1166_v38, %v4865_v37  ;;  %v1172_v26 = vunpack.c.l.b16 %v1129_v6  ;;  %v1177_v40 = vunpack.c.h.b16 %v1132_v24 }
 0x15f   :  { %3726 = vmatpush3.bf16.msra.mxu0 %v3869_v47  ;;  %v1127_v47 = vpack.c.bf16 %v392_v34, %v392_v34  ;;  %v1133_v34 = vpack.c.bf16 %v401_v16, %v401_v16  ;;  %v1134_v35 = vpack.c.bf16 %v403_v20, %v402_v17 }
 0x160   :  { %3727 = vmatprep.subr.bf16.mxu0 %v4330_v13  ;;  %v377_v4 = vpop.xlane.xlu1 %376  ;;  %v1214_v10 = vsel %vm1199_vm12, %v1213_v55, %v1209_v58  ;;  %v1241_v41 = vrot.slane %v1172_v26, %v4865_v37  ;;  %v4893_v58 = vsub.s32 1, %v4730_v50 }
 0x161   :  { %v1169_v60 = vunpack.c.l.b16 %v1127_v47  ;;  %v405_v32 = vmul.f32 0.015625, %v377_v4  ;;  %v1237_v47 = vsel %vm750_vm4, %v1236_v29, %v1232_v25 }
 0x162   :  { %v714_v16 = vrot.slane %v4812_v19, %v4893_v58 }
 0x163   :  { %3728 = vmatpush3.bf16.msra.mxu0 %v3870_v56  ;;  %v1167_v56 = vunpack.c.l.b16 %v1126_v39  ;;  %v1227_v9 = vrot.slane %v1169_v60, %v4865_v37  ;;  %v1242_v60 = vsel %vm1199_vm12, %v1241_v41, %v1237_v47  ;;  %v3865_v47 = vld [vmem:[#allocation13 + $0x10] sm:$0xff]  }
 0x164   :  { %3729 = vmatprep.subr.bf16.mxu0 %v4330_v13  ;;  %v383_v22 = vpop.xlane.xlu1 %382 }
 0x165   :  { %v1218_v11 = vrot.slane %v1167_v56, %v4735_v61  ;;  %v407_v45 = vmul.f32 0.015625, %v383_v22 }
 0x167   :  { %3730 = vmatpush3.bf16.msra.mxu0 %v3871_v59  ;;  %v1168_v59 = vunpack.c.h.b16 %v1126_v39  ;;  %v1176_v39 = vunpack.c.l.b16 %v1132_v24  ;;  %v1137_v1 = vpack.c.bf16 %v407_v45, %v407_v45  ;;  %v3858_v24 = vld [vmem:[#allocation10 + $0x8] ss:$0 sps:$4 sm:$0xff]   ;;  %v3863_v45 = vld [vmem:[#allocation13 + $0x20] sm:$0xff]  }
 0x168   :  { %v4857_v51 = vpop.f32.mrf.mxu1  ;;  %3731 = vmatprep.subr.bf16.mxu0 %v4330_v13  ;;  %v1322_v22 = vsel %vm1320_vm13, %v3858_v24, 0 }
 0x169   :  { %v1222_v14 = vrot.slane %v1168_v59, %v4738_v2  ;;  %v1260_v56 = vrot.slane %v1176_v39, %v4735_v61 }
 0x16a   :  { %v3667_v53 = vpop.f32.mrf.mxu1 }
 0x16b   :  { %3732 = vmatpush3.bf16.msra.mxu0 %v3872_v62  ;;  %v397_v53 = vmul.f32 0.015625, %v353_v7  ;;  %v398_v62 = vmul.f32 0.015625, %v356_v8  ;;  %v1223_v31 = vsel %vm750_vm4, %v1222_v14, %v1218_v11  ;;  %v1184_v14 = vunpack.c.l.b16 %v1137_v1  ;;  %v3875_v1 = vld [vmem:[#allocation13 + $0x40] sm:$0xff]  }
 0x16c   :  { %v693_v54 = vpop.f32.mrf.mxu1  ;;  %3733 = vmatprep.subr.bf16.mxu0 %v4330_v13  ;;  %v1228_v46 = vsel %vm1199_vm12, %v1227_v9, %v1223_v31 }
 0x16d   :  { %v374_v54 = vpop.xlane.xlu0 %373  ;;  %v1130_v7 = vpack.c.bf16 %v397_v53, %v396_v52  ;;  %v1131_v15 = vpack.c.bf16 %v398_v62, %v398_v62  ;;  %v1178_v52 = vunpack.c.l.b16 %v1133_v34  ;;  %v1179_v53 = vunpack.c.l.b16 %v1134_v35 }
 0x16e   :  { %v3668_v57 = vpop.f32.mrf.mxu1  ;;  %v404_v30 = vmul.f32 0.015625, %v374_v54  ;;  %v1180_v54 = vunpack.c.h.b16 %v1134_v35  ;;  %v1297_v26 = vrot.slane %v1184_v14, %v4865_v37 }
 0x16f   :  { %v1198_v57 = vrot.slane %v1163_v43, %v4865_v37  ;;  %v1173_v27 = vunpack.c.l.b16 %v1130_v7  ;;  %v1174_v28 = vunpack.c.h.b16 %v1130_v7  ;;  %v1175_v38 = vunpack.c.l.b16 %v1131_v15 }
 0x170   :  { %v1135_v48 = vpack.c.bf16 %v404_v30, %v404_v30  ;;  %v1269_v5 = vrot.slane %v1178_v52, %v4865_v37  ;;  %v1274_v6 = vrot.slane %v1179_v53, %v4735_v61  ;;  %v1278_v7 = vrot.slane %v1180_v54, %v4738_v2  ;;  %v3867_v53 = vld [vmem:[#allocation13] sm:$0xff]  }
 0x171   :  { %v380_v21 = vpop.xlane.xlu0 %379  ;;  %v1200_v8 = vsel %vm1199_vm12, %v1198_v57, %v1193_v63  ;;  %v1246_v42 = vrot.slane %v1173_v27, %v4735_v61  ;;  %v1250_v43 = vrot.slane %v1174_v28, %v4738_v2  ;;  %v1255_v55 = vrot.slane %v1175_v38, %v4865_v37  ;;  %v3859_v38 = vld [vmem:[#allocation10] sm:$0xff]  }
 0x172   :  { %v406_v33 = vmul.f32 0.015625, %v380_v21  ;;  %v1299_v36 = vsel %vm815_vm5, %v1214_v10, %v1200_v8  ;;  %v1264_v57 = vrot.slane %v1177_v40, %v4738_v2  ;;  %v1181_v3 = vunpack.c.l.b16 %v1135_v48  ;;  %v3860_v40 = vld [vmem:[#allocation13 + $0x38] sm:$0xff]  }
 0x173   :  { %v1300_v59 = vsel %vm817_vm6, %v1228_v46, %v1299_v36  ;;  %v1251_v62 = vsel %vm750_vm4, %v1250_v43, %v1246_v42  ;;  %v1279_v15 = vsel %vm750_vm4, %v1278_v7, %v1274_v6  ;;  %v3861_v42 = vld [vmem:[#allocation13 + $0x30] sm:$0xff]   ;;  %v3862_v43 = vld [vmem:[#allocation13 + $0x28] sm:$0xff]   ;;  %v3864_v46 = vld [vmem:[#allocation13 + $0x18] sm:$0xff]   ;;  %v1119_v48 = vsub.s32 5, %v4730_v50 }
 0x174   :  { %v1136_v49 = vpack.c.bf16 %v406_v33, %v405_v32  ;;  %v1301_v10 = vsel %vm819_vm7, %v1242_v60, %v1300_v59  ;;  %v1256_v11 = vsel %vm1199_vm12, %v1255_v55, %v1251_v62  ;;  %v1265_v12 = vsel %vm750_vm4, %v1264_v57, %v1260_v56  ;;  %v3873_v62 = vld [vmem:[#allocation13 + $0x50] sm:$0xff]  }
 0x175   :  { %v1283_v17 = vrot.slane %v1181_v3, %v4865_v37  ;;  %v1302_v8 = vsel %vm821_vm8, %v1256_v11, %v1301_v10  ;;  %v1270_v9 = vsel %vm1199_vm12, %v1269_v5, %v1265_v12  ;;  %v1120_v52 = vrot.slane %v4812_v19, %v1119_v48  ;;  %3734 = vmatpush3.bf16.msra.mxu0 %v3873_v62  ;;  %v446_v3 = vpop.xlane.xlu1 %445 }
 0x176   :  { %v1182_v4 = vunpack.c.l.b16 %v1136_v49  ;;  %v1183_v63 = vunpack.c.h.b16 %v1136_v49  ;;  %v1303_v28 = vsel %vm823_vm9, %v1270_v9, %v1302_v8  ;;  %v3866_v49 = vld [vmem:[#allocation13 + $0x8] sm:$0xff]   ;;  %3735 = vmatprep.subr.bf16.mxu0 %v4330_v13 }
 0x177   :  { %v1284_v29 = vsel %vm1199_vm12, %v1283_v17, %v1279_v15  ;;  %v1121_v54 = vadd.f32 %v1120_v52, %v4816_v23  ;;  %v3874_v23 = vld [vmem:[#allocation13 + $0x48] sm:$0xff]  }
 0x178   :  { %v1288_v20 = vrot.slane %v1182_v4, %v4735_v61  ;;  %v1292_v21 = vrot.slane %v1183_v63, %v4738_v2  ;;  %v1304_v34 = vsel %vm825_vm10, %v1284_v29, %v1303_v28  ;;  %v443_v4 = vpop.xlane.xlu0 %442  ;;  %v538_v29 = vmul.f32 0.0625, %v446_v3 }
 0x179   :  { %v1396_v55 = vpack.c.bf16 %v1121_v54, %v1121_v54  ;;  %3736 = vmatpush3.bf16.msra.mxu0 %v3874_v23  ;;  %v458_v63 = vpop.xlane.xlu1 %457 }
 0x17a   :  { %v1293_v30 = vsel %vm750_vm4, %v1292_v21, %v1288_v20  ;;  %3737 = vmatprep.subr.bf16.mxu0 %v4330_v13 }
 0x17b   :  { %v1298_v35 = vsel %vm1199_vm12, %v1297_v26, %v1293_v30  ;;  %v537_v30 = vmul.f32 0.0625, %v443_v4 }
 0x17c   :  { %v1305_v39 = vsel %vm827_vm11, %v1298_v35, %v1304_v34  ;;  %v455_v5 = vpop.xlane.xlu0 %454 }
 0x17d   :  { %v1306_v41 = vpack.c.b16 %v1305_v39, %v1305_v39  ;;  %3738 = vmatpush3.bf16.msra.mxu0 %v3875_v1  ;;  %v452_v6 = vpop.xlane.xlu1 %451  ;;  %v1606_v34 = vpack.c.bf16 %v538_v29, %v537_v30 }
 0x17e   :  { %3763 = vmatprep.subr.bf16.mxu0 %v4330_v13 }
 0x180   :  { %v449_v7 = vpop.xlane.xlu0 %448 }
 0x181   :  { %v464_v10 = vpop.xlane.xlu1 %463 }
 0x182   :  { %v544_v39 = vmul.f32 0.0625, %v464_v10 }
 0x184   :  { %v461_v11 = vpop.xlane.xlu0 %460 }
 0x185   :  { %v470_v12 = vpop.xlane.xlu1 %469 }
 0x188   :  { %v467_v14 = vpop.xlane.xlu0 %466 }
 0x18c   :  { %v473_v17 = vpop.xlane.xlu0 %472 }
 0x18d   :  { %v547_v54 = vmul.f32 0.0625, %v473_v17 }
 0x190   :  { %v479_v21 = vpop.xlane.xlu0 %478 }
 0x191   :  { %v549_v4 = vmul.f32 0.0625, %v479_v21 }
 0x194   :  { %v485_v9 = vpop.xlane.xlu0 %484 }
 0x195   :  { %v551_v29 = vmul.f32 0.0625, %v485_v9 }
 0x198   :  { %v491_v24 = vpop.xlane.xlu0 %490 }
 0x19c   :  { %v4947_v26 = vpop.xlane.xlu0 %496 }
 0x1a0   :  { %v4951_v28 = vpop.xlane.xlu0 %502 }
 0x1f6   :  { %v873_v25 = vpop.f32.mrf.mxu0 }
 0x1f7   :  { %v874_v27 = vadd.f32 %v873_v25, %v714_v16  ;;  %v476_v16 = vpop.xlane.xlu1 %475 }
 0x1f8   :  { %v3673_v32 = vpop.f32.mrf.mxu0 }
 0x1f9   :  { %v912_v33 = vpack.c.bf16 %v874_v27, %v874_v27  ;;  %v542_v32 = vmul.f32 0.0625, %v458_v63 }
 0x1fa   :  { %v876_v31 = vpop.f32.mrf.mxu0 }
 0x1fb   :  { %3692 = vmatmul.mubr.bf16.vlgmr.msra.gmra.mxu1 %v912_v33  ;;  %v482_v20 = vpop.xlane.xlu1 %481  ;;  %v541_v33 = vmul.f32 0.0625, %v455_v5  ;;  %v539_v31 = vmul.f32 0.0625, %v449_v7 }
 0x1fc   :  { %3716 = vmatpush3.bf16.msra.mxu1 %v1322_v22  ;;  %v3674_v36 = vpop.f32.mrf.mxu0  ;;  %3719 = vmatprep.mubr.msk.bf16.mxu1 %vm4331_vm2, %v4330_v13  ;;  %v540_v22 = vmul.f32 0.0625, %v452_v6  ;;  %v550_v3 = vmul.f32 0.0625, %v482_v20 }
 0x1fd   :  { %3717 = vmatprep.subr.bf16.mxu1 %v4330_v13  ;;  %v4955_v36 = vpop.xlane.xlu0 %508 }
 0x1fe   :  { %v1612_v21 = vpack.c.bf16 %v550_v3, %v549_v4 }
 0x1ff   :  { %v488_v8 = vpop.xlane.xlu1 %487 }
 0x200   :  { %3718 = vmatpush3.bf16.msra.mxu1 %v3859_v38  ;;  %v1608_v38 = vpack.c.bf16 %v542_v32, %v541_v33  ;;  %v552_v17 = vmul.f32 0.0625, %v488_v8 }
 0x201   :  { %3743 = vmatprep.subr.bf16.mxu1 %v4330_v13  ;;  %v515_v62 = vpop.xlane.xlu0 %514 }
 0x202   :  { %v1613_v8 = vpack.c.bf16 %v552_v17, %v551_v29 }
 0x203   :  { %3720 = vmatmul.mubr.msk.bf16.vlgmr.msra.gmra.mxu1 %vm1316_vm14, %v1306_v41  ;;  %v494_v15 = vpop.xlane.xlu1 %493  ;;  %v1607_v41 = vpack.c.bf16 %v540_v22, %v539_v31 }
 0x204   :  { %3744 = vmatpush3.bf16.msra.mxu1 %v3860_v40  ;;  %3759 = vmatprep.mubr.msk.bf16.mxu1 %vm4331_vm2, %v4330_v13  ;;  %v543_v40 = vmul.f32 0.0625, %v461_v11  ;;  %v554_v9 = vmul.f32 0.0625, %v494_v15 }
 0x205   :  { %3745 = vmatprep.subr.bf16.mxu1 %v4330_v13  ;;  %v1649_v10 = vunpack.c.h.b16 %v1607_v41  ;;  %v521_v32 = vpop.xlane.xlu0 %520 }
 0x206   :  { %v1609_v52 = vpack.c.bf16 %v544_v39, %v543_v40 }
 0x207   :  { %v4945_v25 = vpop.xlane.xlu1 %499 }
 0x208   :  { %3746 = vmatpush3.bf16.msra.mxu1 %v3861_v42  ;;  %v546_v42 = vmul.f32 0.0625, %v470_v12  ;;  %v1653_v20 = vunpack.c.h.b16 %v1609_v52 }
 0x209   :  { %3747 = vmatprep.subr.bf16.mxu1 %v4330_v13  ;;  %v527_v15 = vpop.xlane.xlu0 %526 }
 0x20b   :  { %v4949_v27 = vpop.xlane.xlu1 %505 }
 0x20c   :  { %3748 = vmatpush3.bf16.msra.mxu1 %v3862_v43  ;;  %v545_v43 = vmul.f32 0.0625, %v467_v14 }
 0x20d   :  { %3749 = vmatprep.subr.bf16.mxu1 %v4330_v13 }
 0x20f   :  { %v4953_v35 = vpop.xlane.xlu1 %511 }
 0x210   :  { %3750 = vmatpush3.bf16.msra.mxu1 %v3863_v45  ;;  %v1646_v45 = vunpack.c.l.b16 %v1606_v34 }
 0x211   :  { %3751 = vmatprep.subr.bf16.mxu1 %v4330_v13 }
 0x212   :  { %v1681_v23 = vrot.slane %v1646_v45, %v4735_v61  ;;  %v1658_v45 = vunpack.c.l.b16 %v1612_v21 }
 0x214   :  { %3752 = vmatpush3.bf16.msra.mxu1 %v3864_v46  ;;  %v1647_v46 = vunpack.c.h.b16 %v1606_v34 }
 0x215   :  { %3753 = vmatprep.subr.bf16.mxu1 %v4330_v13 }
 0x216   :  { %v1685_v1 = vrot.slane %v1647_v46, %v4738_v2  ;;  %v1659_v46 = vunpack.c.h.b16 %v1612_v21 }
 0x218   :  { %3754 = vmatpush3.bf16.msra.mxu1 %v3865_v47  ;;  %v1692_v47 = vadd.s32 4294967272, %v4728_v44  ;;  %v1652_v44 = vunpack.c.l.b16 %v1609_v52  ;;  %v1686_v14 = vsel %vm750_vm4, %v1685_v1, %v1681_v23  ;;  %v556_v52 = vmul.f32 0.0625, %v4945_v25 }
 0x219   :  { %3755 = vmatprep.subr.bf16.mxu1 %v4330_v13  ;;  %v1660_v23 = vunpack.c.l.b16 %v1613_v8  ;;  %v1740_v25 = vrot.slane %v1658_v45, %v4735_v61  ;;  %v4998_v45 = vsub.s32 2, %v4730_v50 }
 0x21a   :  { %v4940_v56 = vpop.f32.mrf.mxu0  ;;  %v4962_v5 = vsub.s32 %v1692_v47, %v4730_v50  ;;  %v1711_v33 = vrot.slane %v1652_v44, %v4865_v37  ;;  %v561_v44 = vmul.f32 0.0625, %v515_v62 }
 0x21c   :  { %3756 = vmatpush3.bf16.msra.mxu1 %v3866_v49  ;;  %v3713_v57 = vpop.f32.mrf.mxu0  ;;  %v1650_v49 = vunpack.c.l.b16 %v1608_v38 }
 0x21d   :  { %3757 = vmatprep.subr.bf16.mxu1 %v4330_v13  ;;  %v1648_v57 = vunpack.c.l.b16 %v1607_v41  ;;  %v553_v41 = vmul.f32 0.0625, %v491_v24 }
 0x21e   :  { %v1086_v59 = vpop.f32.mrf.mxu0  ;;  %v1702_v63 = vrot.slane %v1650_v49, %v4735_v61 }
 0x21f   :  { %v1610_v59 = vpack.c.bf16 %v546_v42, %v545_v43  ;;  %v1690_v11 = vrot.slane %v1648_v57, %v4865_v37  ;;  %v1716_v42 = vrot.slane %v1653_v20, %v4962_v5  ;;  %v1614_v1 = vpack.c.bf16 %v554_v9, %v553_v41 }
 0x220   :  { %3758 = vmatpush3.bf16.msra.mxu1 %v3867_v53  ;;  %v3714_v60 = vpop.f32.mrf.mxu0  ;;  %v548_v53 = vmul.f32 0.0625, %v476_v16  ;;  %v563_v20 = vmul.f32 0.0625, %v521_v32 }
 0x221   :  { %3771 = vmatprep.subr.bf16.mxu1 %v4330_v13  ;;  %v518_v60 = vpop.xlane.xlu1 %517  ;;  %v1654_v12 = vunpack.c.l.b16 %v1610_v59  ;;  %v1655_v16 = vunpack.c.h.b16 %v1610_v59  ;;  %v1691_v34 = vsel %vm1199_vm12, %v1690_v11, %v1686_v14  ;;  %v1749_v14 = vrot.slane %v1660_v23, %v4865_v37 }
 0x222   :  { %v1611_v6 = vpack.c.bf16 %v548_v53, %v547_v54  ;;  %v555_v53 = vmul.f32 0.0625, %v4947_v26  ;;  %v558_v54 = vmul.f32 0.0625, %v4949_v27  ;;  %v1744_v26 = vrot.slane %v1659_v46, %v4738_v2 }
 0x223   :  { %3760 = vmatmul.mubr.bf16.vlgmr.msra.gmra.mxu1 %v1396_v55  ;;  %v1651_v55 = vunpack.c.h.b16 %v1608_v38  ;;  %v1696_v38 = vrot.slane %v1649_v10, %v4962_v5  ;;  %v1721_v39 = vrot.slane %v1654_v12, %v4735_v61  ;;  %v1725_v40 = vrot.slane %v1655_v16, %v4738_v2 }
 0x224   :  { %3787 = vmatprep.mubr.msk.bf16.mxu1 %vm4331_vm2, %v4330_v13  ;;  %v1656_v22 = vunpack.c.l.b16 %v1611_v6  ;;  %v1657_v43 = vunpack.c.h.b16 %v1611_v6  ;;  %v560_v27 = vmul.f32 0.0625, %v4953_v35  ;;  %v1615_v10 = vpack.c.bf16 %v556_v52, %v555_v53 }
 0x225   :  { %v1706_v7 = vrot.slane %v1651_v55, %v4738_v2  ;;  %v524_v30 = vpop.xlane.xlu1 %523  ;;  %v557_v55 = vmul.f32 0.0625, %v4951_v28  ;;  %v1698_v24 = vsel %vm1697_vm15, %v1696_v38, %v1691_v34  ;;  %v1726_v59 = vsel %vm750_vm4, %v1725_v40, %v1721_v39 }
 0x226   :  { %v1730_v49 = vrot.slane %v1656_v22, %v4865_v37  ;;  %v1735_v4 = vrot.slane %v1657_v43, %v4962_v5  ;;  %v559_v28 = vmul.f32 0.0625, %v4955_v36  ;;  %v1662_v16 = vunpack.c.l.b16 %v1614_v1  ;;  %v533_v22 = vpop.xlane.xlu0 %532 }
 0x227   :  { %v1707_v31 = vsel %vm750_vm4, %v1706_v7, %v1702_v63  ;;  %v562_v63 = vmul.f32 0.0625, %v518_v60  ;;  %v1661_v7 = vunpack.c.h.b16 %v1613_v8  ;;  %v1616_v11 = vpack.c.bf16 %v558_v54, %v557_v55 }
 0x228   :  { %v1712_v47 = vsel %vm1199_vm12, %v1711_v33, %v1707_v31  ;;  %v1731_v6 = vsel %vm1199_vm12, %v1730_v49, %v1726_v59  ;;  %v1663_v17 = vunpack.c.h.b16 %v1614_v1  ;;  %v564_v29 = vmul.f32 0.0625, %v524_v30 }
 0x229   :  { %v530_v57 = vpop.xlane.xlu1 %529  ;;  %v1717_v3 = vsel %vm1697_vm15, %v1716_v42, %v1712_v47  ;;  %v565_v33 = vmul.f32 0.0625, %v527_v15  ;;  %v1736_v36 = vsel %vm1697_vm15, %v1735_v4, %v1731_v6  ;;  %v1745_v60 = vsel %vm750_vm4, %v1744_v26, %v1740_v25 }
 0x22a   :  { %v1832_v12 = vsel %vm815_vm5, %v1717_v3, %v1698_v24  ;;  %v566_v21 = vmul.f32 0.0625, %v530_v57  ;;  %v1617_v62 = vpack.c.bf16 %v560_v27, %v559_v28  ;;  %v1618_v31 = vpack.c.bf16 %v562_v63, %v561_v44 }
 0x22b   :  { %v1754_v34 = vrot.slane %v1661_v7, %v4962_v5  ;;  %v1664_v38 = vunpack.c.l.b16 %v1615_v10  ;;  %v1666_v39 = vunpack.c.l.b16 %v1616_v11  ;;  %v1667_v40 = vunpack.c.h.b16 %v1616_v11 }
 0x22c   :  { %v1759_v8 = vrot.slane %v1662_v16, %v4735_v61  ;;  %v1763_v30 = vrot.slane %v1663_v17, %v4738_v2  ;;  %v567_v9 = vmul.f32 0.0625, %v533_v22  ;;  %v1750_v41 = vsel %vm1199_vm12, %v1749_v14, %v1745_v60 }
 0x22d   :  { %v536_v35 = vpop.xlane.xlu1 %535  ;;  %v1619_v42 = vpack.c.bf16 %v564_v29, %v563_v20  ;;  %v1620_v43 = vpack.c.bf16 %v566_v21, %v565_v33  ;;  %v1665_v46 = vunpack.c.h.b16 %v1615_v10  ;;  %v1668_v47 = vunpack.c.l.b16 %v1617_v62 }
 0x22e   :  { %v568_v32 = vmul.f32 0.0625, %v536_v35  ;;  %v1670_v49 = vunpack.c.l.b16 %v1618_v31  ;;  %v1671_v52 = vunpack.c.h.b16 %v1618_v31  ;;  %v1833_v53 = vsel %vm817_vm6, %v1736_v36, %v1832_v12 }
 0x22f   :  { %v1768_v54 = vrot.slane %v1664_v38, %v4865_v37  ;;  %v1778_v55 = vrot.slane %v1666_v39, %v4735_v61  ;;  %v1782_v57 = vrot.slane %v1667_v40, %v4738_v2  ;;  %v1755_v15 = vsel %vm1697_vm15, %v1754_v34, %v1750_v41 }
 0x230   :  { %v1764_v24 = vsel %vm750_vm4, %v1763_v30, %v1759_v8  ;;  %v1669_v59 = vunpack.c.h.b16 %v1617_v62  ;;  %v1621_v23 = vpack.c.bf16 %v568_v32, %v567_v9  ;;  %v1672_v1 = vunpack.c.l.b16 %v1619_v42 }
 0x231   :  { %v1674_v3 = vunpack.c.l.b16 %v1620_v43  ;;  %v1675_v4 = vunpack.c.h.b16 %v1620_v43  ;;  %v1092_v25 = vrot.slane %v4812_v19, %v4998_v45  ;;  %v1773_v26 = vrot.slane %v1665_v46, %v4962_v5  ;;  %v3876_v46 = vld [vmem:[#allocation11 + $0x8] sm:$0xff]  }
 0x232   :  { %v1787_v27 = vrot.slane %v1668_v47, %v4865_v37  ;;  %v1797_v28 = vrot.slane %v1670_v49, %v4735_v61  ;;  %v1801_v63 = vrot.slane %v1671_v52, %v4738_v2  ;;  %v1769_v6 = vsel %vm1199_vm12, %v1768_v54, %v1764_v24  ;;  %v3886_v24 = vld [vmem:[#allocation14 + $0x78] sm:$0xff]  }
 0x233   :  { %v1783_v7 = vsel %vm750_vm4, %v1782_v57, %v1778_v55  ;;  %v1143_v11 = vsub.s32 6, %v4730_v50  ;;  %v1792_v12 = vrot.slane %v1669_v59, %v4962_v5  ;;  %v1673_v14 = vunpack.c.h.b16 %v1619_v42  ;;  %v3877_v55 = vld [vmem:[#allocation11] sm:$0xff]   ;;  %v3878_v57 = vld [vmem:[#allocation14 + $0x38] sm:$0xff]   ;;  %3772 = vmatpush3.bf16.msra.mxu1 %v3886_v24 }
 0x234   :  { %v1676_v16 = vunpack.c.l.b16 %v1621_v23  ;;  %v1806_v29 = vrot.slane %v1672_v1, %v4865_v37  ;;  %v1816_v20 = vrot.slane %v1674_v3, %v4735_v61  ;;  %v1820_v21 = vrot.slane %v1675_v4, %v4738_v2  ;;  %v3887_v59 = vld [vmem:[#allocation14 + $0x70] sm:$0xff]   ;;  %3773 = vmatprep.subr.bf16.mxu1 %v4330_v13  ;;  %v3888_v1 = vld [vmem:[#allocation14 + $0x68] sm:$0xff]   ;;  %v3889_v4 = vld [vmem:[#allocation14 + $0x60] sm:$0xff]  }
 0x235   :  { %v1834_v35 = vsel %vm819_vm7, %v1755_v15, %v1833_v53  ;;  %v1774_v22 = vsel %vm1697_vm15, %v1773_v26, %v1769_v6  ;;  %v1802_v36 = vsel %vm750_vm4, %v1801_v63, %v1797_v28  ;;  %v1677_v62 = vunpack.c.h.b16 %v1621_v23  ;;  %v3879_v23 = vld [vmem:[#allocation14 + $0x30] sm:$0xff]   ;;  %v3880_v3 = vld [vmem:[#allocation14 + $0x28] sm:$0xff]   ;;  %v3890_v26 = vld [vmem:[#allocation14 + $0x58] sm:$0xff]  }
 0x236   :  { %v1144_v61 = vrot.slane %v4812_v19, %v1143_v11  ;;  %v1811_v2 = vrot.slane %v1673_v14, %v4962_v5  ;;  %v1825_v34 = vrot.slane %v1676_v16, %v4865_v37  ;;  %v1835_v39 = vsel %vm821_vm8, %v1774_v22, %v1834_v35  ;;  %v3883_v28 = vld [vmem:[#allocation14 + $0x10] sm:$0xff]   ;;  %v3885_v16 = vld [vmem:[#allocation14] sm:$0xff]  }
 0x237   :  { %v1807_v8 = vsel %vm1199_vm12, %v1806_v29, %v1802_v36  ;;  %v1821_v30 = vsel %vm750_vm4, %v1820_v21, %v1816_v20  ;;  %v1830_v9 = vrot.slane %v1677_v62, %v4962_v5  ;;  %3774 = vmatpush3.bf16.msra.mxu1 %v3887_v59  ;;  %v5065_v63 = vld [vmem:[%s5162_s11 + $0x8] sm:$0xff]  ;;  %v3893_v35 = vld [vmem:[#allocation14 + $0x40] sm:$0xff]   ;;  %v1576_v22 = vsub.s32 7, %v4730_v50 }
 0x238   :  { %v1812_v37 = vsel %vm1697_vm15, %v1811_v2, %v1807_v8  ;;  %v1826_v42 = vsel %vm1199_vm12, %v1825_v34, %v1821_v30  ;;  %3775 = vmatprep.subr.bf16.mxu1 %v4330_v13  ;;  %v3891_v20 = vld [vmem:[#allocation14 + $0x50] sm:$0xff]   ;;  %v3892_v21 = vld [vmem:[#allocation14 + $0x48] sm:$0xff]   ;;  %v5083_v62 = vsub.s32 3, %v4730_v50 }
 0x239   :  { %v1831_v53 = vsel %vm1697_vm15, %v1830_v9, %v1826_v42 }
 0x23b   :  { %3776 = vmatpush3.bf16.msra.mxu1 %v3888_v1  ;;  %v3911_v1 = vld [vmem:[#allocation16 + $0x1ac] ss:$16 sps:$4 sm:$0xff]  }
 0x23c   :  { %3777 = vmatprep.subr.bf16.mxu1 %v4330_v13 }
 0x23f   :  { %3778 = vmatpush3.bf16.msra.mxu1 %v3889_v4  ;;  %v3909_v4 = vld [vmem:[#allocation16 + $0x1a8] ss:$16 sps:$4 sm:$0xff]  }
 0x240   :  { %3779 = vmatprep.subr.bf16.mxu1 %v4330_v13 }
 0x243   :  { %3780 = vmatpush3.bf16.msra.mxu1 %v3890_v26  ;;  %v3914_v26 = vld [vmem:[#allocation16 + $0x184] ss:$16 sps:$4 sm:$0xff]  }
 0x244   :  { %3781 = vmatprep.subr.bf16.mxu1 %v4330_v13 }
 0x247   :  { %3782 = vmatpush3.bf16.msra.mxu1 %v3891_v20  ;;  %v3935_v20 = vld [vmem:[#allocation16 + $0x12c] ss:$16 sps:$4 sm:$0xff]  }
 0x248   :  { %3783 = vmatprep.subr.bf16.mxu1 %v4330_v13 }
 0x24b   :  { %3784 = vmatpush3.bf16.msra.mxu1 %v3892_v21  ;;  %v3930_v21 = vld [vmem:[#allocation16 + $0x120] ss:$16 sps:$4 sm:$0xff]  }
 0x24c   :  { %3785 = vmatprep.subr.bf16.mxu1 %v4330_v13 }
 0x24f   :  { %3786 = vmatpush3.bf16.msra.mxu1 %v3893_v35  ;;  %v3933_v35 = vld [vmem:[#allocation16 + $0x128] ss:$16 sps:$4 sm:$0xff]  }
 0x2bb   :  { %v995_v44 = vpop.f32.mrf.mxu1 }
 0x2bc   :  { %v1084_v10 = vadd.f32 %v4940_v56, %v995_v44  ;;  %v1788_v56 = vsel %vm1199_vm12, %v1787_v27, %v1783_v7  ;;  %v3882_v27 = vld [vmem:[#allocation14 + $0x18] sm:$0xff]   ;;  %v3884_v7 = vld [vmem:[#allocation14 + $0x8] sm:$0xff]  }
 0x2bd   :  { %v3693_v17 = vpop.f32.mrf.mxu1  ;;  %v1793_v40 = vsel %vm1697_vm15, %v1792_v12, %v1788_v56 }
 0x2be   :  { %v5020_v33 = vadd.f32 %v1092_v25, %v1084_v10  ;;  %v1836_v41 = vsel %vm823_vm9, %v1793_v40, %v1835_v39  ;;  %v3881_v25 = vld [vmem:[#allocation14 + $0x20] sm:$0xff]   ;;  %v1604_v10 = vrot.slane %v5065_v63, %v4998_v45 }
 0x2bf   :  { %v998_v60 = vpop.f32.mrf.mxu1  ;;  %v1837_v52 = vsel %vm825_vm10, %v1812_v37, %v1836_v41 }
 0x2c0   :  { %v1094_v31 = vmax.f32 %v5020_v33, 0.0  ;;  %v1838_v5 = vsel %vm827_vm11, %v1831_v53, %v1837_v52  ;;  %v1605_v17 = vadd.f32 %v1604_v10, %v4857_v51  ;;  %v5079_v51 = vld [vmem:[%s5162_s11] sm:$0xff]  ;;  %v3899_v52 = vld [vmem:[#allocation16 + $0x1ec] ss:$16 sps:$4 sm:$0xff]  }
 0x2c1   :  { %v3694_v38 = vpop.f32.mrf.mxu1  ;;  %v1839_v15 = vpack.c.b16 %v1838_v5, %v1838_v5  ;;  %v1577_v56 = vrot.slane %v5079_v51, %v1576_v22  ;;  %v3902_v53 = vld [vmem:[#allocation16 + $0x1c4] ss:$16 sps:$4 sm:$0xff]   ;;  %v3903_v5 = vld [vmem:[#allocation16 + $0x1c8] ss:$16 sps:$4 sm:$0xff]  }
 0x2c2   :  { %1095 = vadd.xlane.f32.xlu1 %v1094_v31  ;;  %v1927_v29 = vpack.c.bf16 %v1605_v17, %v1605_v17  ;;  %v1629_v38 = vrot.slane %v5065_v63, %v5083_v62  ;;  %v3921_v10 = vld [vmem:[#allocation16 + $0x168] ss:$16 sps:$4 sm:$0xff]   ;;  %v3938_v22 = vld [vmem:[#allocation16 + $0x104] ss:$16 sps:$4 sm:$0xff]  }
 0x2c3   :  { %v1358_v32 = vpop.f32.mrf.mxu1  ;;  %v3927_v17 = vld [vmem:[#allocation16 + $0x148] ss:$16 sps:$4 sm:$0xff]  }
 0x2c4   :  { %v1359_v19 = vadd.f32 %v1358_v32, %v1144_v61 }
 0x2c5   :  { %v3721_v43 = vpop.f32.mrf.mxu1 }
 0x2c6   :  { %v1397_v47 = vpack.c.bf16 %v1359_v19, %v1359_v19 }
 0x2c7   :  { %v1361_v49 = vpop.f32.mrf.mxu1 }
 0x2c8   :  { %3740 = vmatmul.mubr.bf16.vlgmr.msra.gmra.mxu0 %v1397_v47  ;;  %v3896_v47 = vld [vmem:[#allocation16 + $0x1e4] ss:$16 sps:$4 sm:$0xff]   ;;  %v3897_v49 = vld [vmem:[#allocation16 + $0x1e8] ss:$16 sps:$4 sm:$0xff]  }
 0x2c9   :  { %3764 = vmatpush3.bf16.msra.mxu0 %v3876_v46  ;;  %v3722_v54 = vpop.f32.mrf.mxu1  ;;  %3767 = vmatprep.mubr.msk.bf16.mxu0 %vm4331_vm2, %v4330_v13  ;;  %v3894_v46 = vld [vmem:[#allocation16 + $0x1e0] ss:$16 sps:$4 sm:$0xff]  }
 0x2ca   :  { %3765 = vmatprep.subr.bf16.mxu0 %v4330_v13  ;;  %2390 = vmatprep.subr.bf16.mxu1 %v3896_v47  ;;  %v3905_v54 = vld [vmem:[#allocation16 + $0x1cc] ss:$16 sps:$4 sm:$0xff]  }
 0x2cd   :  { %3766 = vmatpush3.bf16.msra.mxu0 %v3877_v55  ;;  %v3900_v55 = vld [vmem:[#allocation16 + $0x1c0] ss:$16 sps:$4 sm:$0xff]  }
 0x2ce   :  { %3791 = vmatprep.subr.bf16.mxu0 %v4330_v13 }
 0x2d0   :  { %3768 = vmatmul.mubr.msk.bf16.vlgmr.msra.gmra.mxu0 %vm611_vm1, %v1839_v15 }
 0x2d1   :  { %3792 = vmatpush3.bf16.msra.mxu0 %v3878_v57  ;;  %3807 = vmatprep.mubr.msk.bf16.mxu0 %vm4331_vm2, %v4330_v13 }
 0x2d2   :  { %3793 = vmatprep.subr.bf16.mxu0 %v4330_v13 }
 0x2d5   :  { %3794 = vmatpush3.bf16.msra.mxu0 %v3879_v23  ;;  %v3908_v23 = vld [vmem:[#allocation16 + $0x1a4] ss:$16 sps:$4 sm:$0xff]  }
 0x2d6   :  { %3795 = vmatprep.subr.bf16.mxu0 %v4330_v13 }
 0x2d9   :  { %3796 = vmatpush3.bf16.msra.mxu0 %v3880_v3  ;;  %v3906_v3 = vld [vmem:[#allocation16 + $0x1a0] ss:$16 sps:$4 sm:$0xff]  }
 0x2da   :  { %3797 = vmatprep.subr.bf16.mxu0 %v4330_v13 }
 0x2dd   :  { %3798 = vmatpush3.bf16.msra.mxu0 %v3881_v25  ;;  %v3912_v25 = vld [vmem:[#allocation16 + $0x180] ss:$16 sps:$4 sm:$0xff]  }
 0x2de   :  { %3799 = vmatprep.subr.bf16.mxu0 %v4330_v13 }
 0x2e1   :  { %3800 = vmatpush3.bf16.msra.mxu0 %v3882_v27  ;;  %v3915_v27 = vld [vmem:[#allocation16 + $0x188] ss:$16 sps:$4 sm:$0xff]  }
 0x2e2   :  { %3801 = vmatprep.subr.bf16.mxu0 %v4330_v13 }
 0x2e3   :  { %v1568_v44 = vpop.f32.mrf.mxu1 }
 0x2e5   :  { %v3761_v6 = vpop.f32.mrf.mxu1  ;;  %3802 = vmatpush3.bf16.msra.mxu0 %v3883_v28  ;;  %v3917_v28 = vld [vmem:[#allocation16 + $0x18c] ss:$16 sps:$4 sm:$0xff]  }
 0x2e6   :  { %3803 = vmatprep.subr.bf16.mxu0 %v4330_v13  ;;  %v3923_v6 = vld [vmem:[#allocation16 + $0x16c] ss:$16 sps:$4 sm:$0xff]  }
 0x2e7   :  { %v1571_v12 = vpop.f32.mrf.mxu1 }
 0x2e8   :  { %v3926_v12 = vld [vmem:[#allocation16 + $0x144] ss:$16 sps:$4 sm:$0xff]  }
 0x2e9   :  { %v3762_v14 = vpop.f32.mrf.mxu1  ;;  %3804 = vmatpush3.bf16.msra.mxu0 %v3884_v7  ;;  %v3918_v7 = vld [vmem:[#allocation16 + $0x160] ss:$16 sps:$4 sm:$0xff]  }
 0x2ea   :  { %3805 = vmatprep.subr.bf16.mxu0 %v4330_v13  ;;  %v3929_v14 = vld [vmem:[#allocation16 + $0x14c] ss:$16 sps:$4 sm:$0xff]  }
 0x2ed   :  { %3806 = vmatpush3.bf16.msra.mxu0 %v3885_v16  ;;  %v3924_v16 = vld [vmem:[#allocation16 + $0x140] ss:$16 sps:$4 sm:$0xff]  }
 0x2ee   :  { %2431 = vmatprep.subr.bf16.mxu0 %v3899_v52  ;;  %v1599_v52 = vrot.slane %v5065_v63, %v4893_v58 }
 0x2f0   :  { %3808 = vmatmul.mubr.bf16.vlgmr.msra.gmra.mxu0 %v1927_v29  ;;  %v3932_v29 = vld [vmem:[#allocation16 + $0x124] ss:$16 sps:$4 sm:$0xff]  }
 0x2f1   :  { %2463 = vmatprep.mubr.bf16.mxu0 %v4329_v0  ;;  %2432 = vmatpush1.bf16.msra.mxu0 %v3897_v49  ;;  %v1594_v49 = vrot.slane %v5065_v63, %v4807_v18 }
 0x2f2   :  { %2433 = vmatprep.subr.bf16.mxu0 %v3905_v54 }
 0x2f5   :  { %2434 = vmatpush1.bf16.msra.mxu0 %v3903_v5  ;;  %v3945_v5 = vld [vmem:[#allocation16 + $0xe8] ss:$16 sps:$4 sm:$0xff]  }
 0x2f6   :  { %2435 = vmatprep.subr.bf16.mxu0 %v3911_v1  ;;  %v3951_v1 = vld [vmem:[#allocation16 + $0xc8] ss:$16 sps:$4 sm:$0xff]  }
 0x2f9   :  { %2436 = vmatpush1.bf16.msra.mxu0 %v3909_v4  ;;  %v3954_v4 = vld [vmem:[#allocation16 + $0xa0] ss:$16 sps:$4 sm:$0xff]  }
 0x2fa   :  { %2437 = vmatprep.subr.bf16.mxu0 %v3917_v28  ;;  %v3960_v28 = vld [vmem:[#allocation16 + $0x80] ss:$16 sps:$4 sm:$0xff]  }
 0x2fd   :  { %2438 = vmatpush1.bf16.msra.mxu0 %v3915_v27  ;;  %v3965_v27 = vld [vmem:[#allocation16 + $0x8c] ss:$16 sps:$4 sm:$0xff]  }
 0x2fe   :  { %2439 = vmatprep.subr.bf16.mxu0 %v3923_v6  ;;  %v3968_v6 = vld [vmem:[#allocation16 + $0x64] ss:$16 sps:$4 sm:$0xff]  }
 0x301   :  { %2440 = vmatpush1.bf16.msra.mxu0 %v3921_v10  ;;  %v3966_v10 = vld [vmem:[#allocation16 + $0x60] ss:$16 sps:$4 sm:$0xff]  }
 0x302   :  { %2441 = vmatprep.subr.bf16.mxu0 %v3929_v14  ;;  %v3974_v14 = vld [vmem:[#allocation16 + $0x44] ss:$16 sps:$4 sm:$0xff]  }
 0x305   :  { %2442 = vmatpush1.bf16.msra.mxu0 %v3927_v17  ;;  %v3972_v17 = vld [vmem:[#allocation16 + $0x40] ss:$16 sps:$4 sm:$0xff]  }
 0x306   :  { %2443 = vmatprep.subr.bf16.mxu0 %v3935_v20  ;;  %v3980_v20 = vld [vmem:[#allocation16 + $0x24] ss:$16 sps:$4 sm:$0xff]  }
 0x309   :  { %2444 = vmatpush1.bf16.msra.mxu0 %v3933_v35  ;;  %v3978_v35 = vld [vmem:[#allocation16 + $0x20] ss:$16 sps:$4 sm:$0xff]  }
 0x388   :  { %v1480_v36 = vpop.f32.mrf.mxu0 }
 0x389   :  { %v1569_v60 = vadd.f32 %v1568_v44, %v1480_v36  ;;  %v3920_v44 = vld [vmem:[#allocation16 + $0x164] ss:$16 sps:$4 sm:$0xff]   ;;  %v3936_v36 = vld [vmem:[#allocation16 + $0x100] ss:$16 sps:$4 sm:$0xff]  }
 0x38a   :  { %v3741_v61 = vpop.f32.mrf.mxu0 }
 0x38b   :  { %v1578_v2 = vadd.f32 %v1577_v56, %v1569_v60  ;;  %v3941_v56 = vld [vmem:[#allocation16 + $0x10c] ss:$16 sps:$4 sm:$0xff]   ;;  %v3939_v60 = vld [vmem:[#allocation16 + $0x108] ss:$16 sps:$4 sm:$0xff]   ;;  %v3944_v61 = vld [vmem:[#allocation16 + $0xe4] ss:$16 sps:$4 sm:$0xff]  }
 0x38c   :  { %v1483_v34 = vpop.f32.mrf.mxu0  ;;  %2445 = vmatprep.subr.bf16.mxu0 %v3941_v56  ;;  %v3986_v56 = vld [vmem:[#allocation16 + $0x4] ss:$16 sps:$4 sm:$0xff]  }
 0x38d   :  { %v1579_v13 = vmax.f32 %v1578_v2, 0.0  ;;  %2446 = vmatpush1.bf16.msra.mxu0 %v3939_v60  ;;  %v3947_v2 = vld [vmem:[#allocation16 + $0xec] ss:$16 sps:$4 sm:$0xff]   ;;  %v1114_v34 = vsub.s32 4, %v4730_v50  ;;  %v3984_v60 = vld [vmem:[#allocation16] ss:$16 sps:$4 sm:$0xff]  }
 0x38e   :  { %v3742_v39 = vpop.f32.mrf.mxu0  ;;  %2673 = vmatprep.subr.bf16.mxu0 %v3947_v2  ;;  %v3992_v2 = vld [vmem:[#allocation16 + $0x2e4] ss:$16 sps:$4 sm:$0xff]   ;;  %v4046_v50 = vld [vmem:[#allocation17 + $0x68] sm:$0xff]  }
 0x38f   :  { %1580 = vadd.xlane.f32.xlu0 %v1579_v13 }
 0x390   :  { %v1889_v40 = vpop.f32.mrf.mxu0 }
 0x391   :  { %v1890_v8 = vadd.f32 %v1889_v40, %v1629_v38  ;;  %v2108_v38 = vrot.slane %v5065_v63, %v1114_v34 }
 0x392   :  { %v3769_v30 = vpop.f32.mrf.mxu0 }
 0x393   :  { %v1928_v32 = vpack.c.bf16 %v1890_v8, %v1890_v8 }
 0x394   :  { %v1892_v9 = vpop.f32.mrf.mxu0 }
 0x395   :  { %3788 = vmatmul.mubr.bf16.vlgmr.msra.gmra.mxu1 %v1928_v32 }
 0x396   :  { %v3770_v19 = vpop.f32.mrf.mxu0  ;;  %2422 = vmatprep.mubr.bf16.mxu1 %v4329_v0  ;;  %2391 = vmatpush1.bf16.msra.mxu1 %v3894_v46 }
 0x397   :  { %2392 = vmatprep.subr.bf16.mxu1 %v3902_v53 }
 0x39a   :  { %2393 = vmatpush1.bf16.msra.mxu1 %v3900_v55  ;;  %v3942_v55 = vld [vmem:[#allocation16 + $0xe0] ss:$16 sps:$4 sm:$0xff]  }
 0x39b   :  { %2394 = vmatprep.subr.bf16.mxu1 %v3908_v23  ;;  %v3948_v23 = vld [vmem:[#allocation16 + $0xc0] ss:$16 sps:$4 sm:$0xff]  }
 0x39e   :  { %2395 = vmatpush1.bf16.msra.mxu1 %v3906_v3  ;;  %v3956_v3 = vld [vmem:[#allocation16 + $0xa4] ss:$16 sps:$4 sm:$0xff]  }
 0x39f   :  { %2396 = vmatprep.subr.bf16.mxu1 %v3914_v26  ;;  %v3962_v26 = vld [vmem:[#allocation16 + $0x84] ss:$16 sps:$4 sm:$0xff]  }
 0x3a2   :  { %2397 = vmatpush1.bf16.msra.mxu1 %v3912_v25  ;;  %v3957_v25 = vld [vmem:[#allocation16 + $0xa8] ss:$16 sps:$4 sm:$0xff]  }
 0x3a3   :  { %2398 = vmatprep.subr.bf16.mxu1 %v3920_v44  ;;  %v3963_v44 = vld [vmem:[#allocation16 + $0x88] ss:$16 sps:$4 sm:$0xff]  }
 0x3a6   :  { %2399 = vmatpush1.bf16.msra.mxu1 %v3918_v7  ;;  %v3971_v7 = vld [vmem:[#allocation16 + $0x6c] ss:$16 sps:$4 sm:$0xff]  }
 0x3a7   :  { %2400 = vmatprep.subr.bf16.mxu1 %v3926_v12  ;;  %v3969_v12 = vld [vmem:[#allocation16 + $0x68] ss:$16 sps:$4 sm:$0xff]  }
 0x3aa   :  { %2401 = vmatpush1.bf16.msra.mxu1 %v3924_v16  ;;  %v3977_v16 = vld [vmem:[#allocation16 + $0x4c] ss:$16 sps:$4 sm:$0xff]  }
 0x3ab   :  { %2402 = vmatprep.subr.bf16.mxu1 %v3932_v29  ;;  %v3975_v29 = vld [vmem:[#allocation16 + $0x48] ss:$16 sps:$4 sm:$0xff]  }
 0x3ae   :  { %2403 = vmatpush1.bf16.msra.mxu1 %v3930_v21  ;;  %v3983_v21 = vld [vmem:[#allocation16 + $0x2c] ss:$16 sps:$4 sm:$0xff]  }
 0x3af   :  { %2404 = vmatprep.subr.bf16.mxu1 %v3938_v22  ;;  %v3981_v22 = vld [vmem:[#allocation16 + $0x28] ss:$16 sps:$4 sm:$0xff]  }
 0x3b0   :  { %v5088_v41 = vpop.f32.mrf.mxu0 }
 0x3b2   :  { %v3809_v37 = vpop.f32.mrf.mxu0  ;;  %2405 = vmatpush1.bf16.msra.mxu1 %v3936_v36  ;;  %v3989_v36 = vld [vmem:[#allocation16 + $0xc] ss:$16 sps:$4 sm:$0xff]  }
 0x3b3   :  { %2632 = vmatprep.subr.bf16.mxu1 %v3944_v61  ;;  %v3987_v61 = vld [vmem:[#allocation16 + $0x8] ss:$16 sps:$4 sm:$0xff]  }
 0x3b4   :  { %v2102_v42 = vpop.f32.mrf.mxu0 }
 0x3b6   :  { %v3810_v43 = vpop.f32.mrf.mxu0 }
 0x418   :  { %v1581_v57 = vpop.xlane.xlu0 %1580 }
 0x419   :  { %v1582_v15 = vmul.f32 0.0078125, %v1581_v57 }
 0x41b   :  { %v5090_v24 = vsub.f32 %v1579_v13, %v1582_v15  ;;  %v1096_v13 = vpop.xlane.xlu1 %1095  ;;  %v3950_v15 = vld [vmem:[#allocation16 + $0xc4] ss:$16 sps:$4 sm:$0xff]  }
 0x41c   :  { %v1098_v40 = vmul.f32 0.0078125, %v1096_v13  ;;  %v3995_v13 = vld [vmem:[#allocation16 + $0x2ec] ss:$16 sps:$4 sm:$0xff]  }
 0x41d   :  { %v1584_v59 = vmul.f32 %v5090_v24, %v5090_v24 }
 0x41e   :  { %v5103_v19 = vsub.f32 %v1094_v31, %v1098_v40 }
 0x41f   :  { %1585 = vadd.xlane.f32.xlu1 %v1584_v59  ;;  %v3953_v59 = vld [vmem:[#allocation16 + $0xcc] ss:$16 sps:$4 sm:$0xff]  }
 0x420   :  { %v1100_v43 = vmul.f32 %v5103_v19, %v5103_v19 }
 0x455   :  { %v2011_v39 = vpop.f32.mrf.mxu1 }
 0x456   :  { %v2100_v8 = vadd.f32 %v5088_v41, %v2011_v39 }
 0x457   :  { %v3789_v30 = vpop.f32.mrf.mxu1 }
 0x458   :  { %v5099_v32 = vadd.f32 %v2108_v38, %v2100_v8 }
 0x459   :  { %v2014_v9 = vpop.f32.mrf.mxu1 }
 0x45a   :  { %v2110_v37 = vmax.f32 %v5099_v32, 0.0 }
 0x45b   :  { %v3790_v42 = vpop.f32.mrf.mxu1 }
 0x45c   :  { %2111 = vadd.xlane.f32.xlu0 %v2110_v37 }
 0x460   :  { %1101 = vadd.xlane.f32.xlu0 %v1100_v43  ;;  %v1110_v43 = vrot.slane %v5079_v51, %v5083_v62 }
 0x4a8   :  { %v1586_v46 = vpop.xlane.xlu1 %1585 }
 0x4a9   :  { %v1587_v41 = vmul.f32 0.0078125, %v1586_v46 }
 0x4ab   :  { %v1588_v47 = vadd.f32 1e-05, %v1587_v41  ;;  %v1115_v41 = vrot.slane %v5079_v51, %v1114_v34  ;;  %v4002_v51 = vld [vmem:[#allocation16 + $0x2a0] ss:$16 sps:$4 sm:$0xff]   ;;  %v4005_v34 = vld [vmem:[#allocation16 + $0x2a8] ss:$16 sps:$4 sm:$0xff]  }
 0x4ad   :  { %4070 = vrsqrt.f32 %v1588_v47 }
 0x4ba   :  { %v4071_v33 = vpop.eup %4070 }
 0x4bb   :  { %v1590_v31 = vmul.f32 %v4071_v33, %v5090_v24  ;;  %v3959_v24 = vld [vmem:[#allocation16 + $0xac] ss:$16 sps:$4 sm:$0xff]   ;;  %v3993_v33 = vld [vmem:[#allocation16 + $0x2e8] ss:$16 sps:$4 sm:$0xff]  }
 0x4bd   :  { %v1595_v53 = vmul.f32 %v1594_v49, %v1590_v31  ;;  %v3990_v49 = vld [vmem:[#allocation16 + $0x2e0] ss:$16 sps:$4 sm:$0xff]  }
 0x4bf   :  { %v1600_v54 = vadd.f32 %v1599_v52, %v1595_v53  ;;  %v3998_v52 = vld [vmem:[#allocation16 + $0x2c4] ss:$16 sps:$4 sm:$0xff]   ;;  %v4001_v53 = vld [vmem:[#allocation16 + $0x2cc] ss:$16 sps:$4 sm:$0xff]  }
 0x4c1   :  { %v2229_v57 = vpack.c.bf16 %v1600_v54, %v1600_v54  ;;  %v3996_v54 = vld [vmem:[#allocation16 + $0x2c0] ss:$16 sps:$4 sm:$0xff]  }
 0x4c3   :  { %2423 = vmatmul.mubr.bf16.vlgmr.msra.gmra.mxu1 %v2229_v57  ;;  %2464 = vmatmul.mubr.bf16.vlgmr.msra.gmra.mxu0 %v2229_v57  ;;  %v4007_v57 = vld [vmem:[#allocation16 + $0x2ac] ss:$16 sps:$4 sm:$0xff]  }
 0x4c4   :  { %2633 = vmatpush1.bf16.msra.mxu1 %v3942_v55  ;;  %2674 = vmatpush1.bf16.msra.mxu0 %v3945_v5  ;;  %v3999_v55 = vld [vmem:[#allocation16 + $0x2c8] ss:$16 sps:$4 sm:$0xff]   ;;  %v4004_v5 = vld [vmem:[#allocation16 + $0x2a4] ss:$16 sps:$4 sm:$0xff]  }
 0x4c5   :  { %2634 = vmatprep.subr.bf16.mxu1 %v3950_v15  ;;  %2675 = vmatprep.subr.bf16.mxu0 %v3953_v59  ;;  %v4013_v15 = vld [vmem:[#allocation16 + $0x28c] ss:$16 sps:$4 sm:$0xff]   ;;  %v4008_v59 = vld [vmem:[#allocation16 + $0x280] ss:$16 sps:$4 sm:$0xff]  }
 0x4c6   :  { %2664 = vmatprep.mubr.bf16.mxu1 %v4329_v0  ;;  %2705 = vmatprep.mubr.bf16.mxu0 %v4329_v0 }
 0x4c8   :  { %2635 = vmatpush1.bf16.msra.mxu1 %v3948_v23  ;;  %2676 = vmatpush1.bf16.msra.mxu0 %v3951_v1  ;;  %v4011_v23 = vld [vmem:[#allocation16 + $0x288] ss:$16 sps:$4 sm:$0xff]   ;;  %v4016_v1 = vld [vmem:[#allocation16 + $0x264] ss:$16 sps:$4 sm:$0xff]  }
 0x4c9   :  { %2636 = vmatprep.subr.bf16.mxu1 %v3956_v3  ;;  %2677 = vmatprep.subr.bf16.mxu0 %v3959_v24  ;;  %v4019_v3 = vld [vmem:[#allocation16 + $0x26c] ss:$16 sps:$4 sm:$0xff]   ;;  %v4014_v24 = vld [vmem:[#allocation16 + $0x260] ss:$16 sps:$4 sm:$0xff]  }
 0x4cc   :  { %2637 = vmatpush1.bf16.msra.mxu1 %v3954_v4  ;;  %2678 = vmatpush1.bf16.msra.mxu0 %v3957_v25  ;;  %v4022_v4 = vld [vmem:[#allocation16 + $0x244] ss:$16 sps:$4 sm:$0xff]   ;;  %v4025_v25 = vld [vmem:[#allocation16 + $0x24c] ss:$16 sps:$4 sm:$0xff]  }
 0x4cd   :  { %2638 = vmatprep.subr.bf16.mxu1 %v3962_v26  ;;  %2679 = vmatprep.subr.bf16.mxu0 %v3965_v27  ;;  %v4020_v26 = vld [vmem:[#allocation16 + $0x240] ss:$16 sps:$4 sm:$0xff]   ;;  %v4023_v27 = vld [vmem:[#allocation16 + $0x248] ss:$16 sps:$4 sm:$0xff]  }
 0x4d0   :  { %2639 = vmatpush1.bf16.msra.mxu1 %v3960_v28  ;;  %2680 = vmatpush1.bf16.msra.mxu0 %v3963_v44  ;;  %v4028_v28 = vld [vmem:[#allocation16 + $0x224] ss:$16 sps:$4 sm:$0xff]   ;;  %v4031_v44 = vld [vmem:[#allocation16 + $0x22c] ss:$16 sps:$4 sm:$0xff]  }
 0x4d1   :  { %2640 = vmatprep.subr.bf16.mxu1 %v3968_v6  ;;  %2681 = vmatprep.subr.bf16.mxu0 %v3971_v7  ;;  %v4026_v6 = vld [vmem:[#allocation16 + $0x220] ss:$16 sps:$4 sm:$0xff]   ;;  %v4029_v7 = vld [vmem:[#allocation16 + $0x228] ss:$16 sps:$4 sm:$0xff]  }
 0x4d4   :  { %2641 = vmatpush1.bf16.msra.mxu1 %v3966_v10  ;;  %2682 = vmatpush1.bf16.msra.mxu0 %v3969_v12  ;;  %v4034_v10 = vld [vmem:[#allocation16 + $0x204] ss:$16 sps:$4 sm:$0xff]   ;;  %v4037_v12 = vld [vmem:[#allocation16 + $0x20c] ss:$16 sps:$4 sm:$0xff]  }
 0x4d5   :  { %2642 = vmatprep.subr.bf16.mxu1 %v3974_v14  ;;  %2683 = vmatprep.subr.bf16.mxu0 %v3977_v16  ;;  %v4032_v14 = vld [vmem:[#allocation16 + $0x200] ss:$16 sps:$4 sm:$0xff]   ;;  %v4035_v16 = vld [vmem:[#allocation16 + $0x208] ss:$16 sps:$4 sm:$0xff]  }
 0x4d8   :  { %2643 = vmatpush1.bf16.msra.mxu1 %v3972_v17  ;;  %2684 = vmatpush1.bf16.msra.mxu0 %v3975_v29  ;;  %v4038_v17 = vld [vmem:[#allocation17 + $0x78] sm:$0xff]  }
 0x4d9   :  { %2644 = vmatprep.subr.bf16.mxu1 %v3980_v20  ;;  %2685 = vmatprep.subr.bf16.mxu0 %v3983_v21  ;;  %v4039_v29 = vld [vmem:[#allocation17 + $0xf8] sm:$0xff]  }
 0x4dc   :  { %2645 = vmatpush1.bf16.msra.mxu1 %v3978_v35  ;;  %2686 = vmatpush1.bf16.msra.mxu0 %v3981_v22 }
 0x4dd   :  { %2646 = vmatprep.subr.bf16.mxu1 %v3986_v56  ;;  %2687 = vmatprep.subr.bf16.mxu0 %v3989_v36 }
 0x4e0   :  { %2647 = vmatpush1.bf16.msra.mxu1 %v3984_v60  ;;  %2688 = vmatpush1.bf16.msra.mxu0 %v3987_v61  ;;  %v2125_v61 = vrot.slane %v5065_v63, %v1119_v48  ;;  %v4044_v48 = vld [vmem:[#allocation17 + $0x30] sm:$0xff]  }
 0x4e1   :  { %2875 = vmatprep.subr.bf16.mxu1 %v3992_v2  ;;  %2916 = vmatprep.subr.bf16.mxu0 %v3995_v13 }
 0x4e5   :  { %v2112_v38 = vpop.xlane.xlu0 %2111 }
 0x4e6   :  { %v2113_v39 = vmul.f32 0.0078125, %v2112_v38 }
 0x4e8   :  { %v5119_v40 = vsub.f32 %v2110_v37, %v2113_v39  ;;  %v2130_v39 = vrot.slane %v5065_v63, %v1143_v11  ;;  %v4047_v11 = vld [vmem:[#allocation17 + $0xe8] sm:$0xff]  }
 0x4e9   :  { %v1102_v8 = vpop.xlane.xlu0 %1101  ;;  %v4048_v63 = vld [vmem:[#allocation17 + $0x28] sm:$0xff]  }
 0x4ea   :  { %v1103_v30 = vmul.f32 0.0078125, %v1102_v8  ;;  %v2115_v9 = vmul.f32 %v5119_v40, %v5119_v40 }
 0x4ec   :  { %v1104_v42 = vadd.f32 1e-05, %v1103_v30  ;;  %2116 = vadd.xlane.f32.xlu1 %v2115_v9 }
 0x4ee   :  { %4072 = vrsqrt.f32 %v1104_v42 }
 0x4fb   :  { %v4073_v46 = vpop.eup %4072 }
 0x4fc   :  { %v1106_v32 = vmul.f32 %v4073_v46, %v5103_v19  ;;  %v4010_v19 = vld [vmem:[#allocation16 + $0x284] ss:$16 sps:$4 sm:$0xff]   ;;  %v4040_v46 = vld [vmem:[#allocation17 + $0x38] sm:$0xff]  }
 0x4fe   :  { %v1111_v37 = vmul.f32 %v1110_v43, %v1106_v32 }
 0x500   :  { %v1116_v47 = vadd.f32 %v1115_v41, %v1111_v37  ;;  %v4041_v41 = vld [vmem:[#allocation17 + $0xb8] sm:$0xff]   ;;  %v4042_v37 = vld [vmem:[#allocation17 + $0x70] sm:$0xff]  }
 0x502   :  { %v2228_v31 = vpack.c.bf16 %v1116_v47, %v1116_v47  ;;  %v4043_v47 = vld [vmem:[#allocation17 + $0xf0] sm:$0xff]  }
 0x504   :  { %2665 = vmatmul.mubr.bf16.vlgmr.msra.gmra.mxu1 %v2228_v31  ;;  %2706 = vmatmul.mubr.bf16.vlgmr.msra.gmra.mxu0 %v2228_v31  ;;  %v4051_v31 = vld [vmem:[#allocation17 + $0xe0] sm:$0xff]  }
 0x505   :  { %2876 = vmatpush1.bf16.msra.mxu1 %v3990_v49  ;;  %2917 = vmatpush1.bf16.msra.mxu0 %v3993_v33  ;;  %v4045_v49 = vld [vmem:[#allocation17 + $0xb0] sm:$0xff]   ;;  %v4050_v33 = vld [vmem:[#allocation17 + $0x60] sm:$0xff]  }
 0x506   :  { %2877 = vmatprep.subr.bf16.mxu1 %v3998_v52  ;;  %2918 = vmatprep.subr.bf16.mxu0 %v4001_v53  ;;  %v4052_v52 = vld [vmem:[#allocation17 + $0x20] sm:$0xff]  }
 0x507   :  { %2907 = vmatprep.mubr.bf16.mxu1 %v4329_v0  ;;  %2948 = vmatprep.mubr.bf16.mxu0 %v4329_v0  ;;  %v4017_v0 = vld [vmem:[#allocation16 + $0x268] ss:$16 sps:$4 sm:$0xff]   ;;  %v4053_v53 = vld [vmem:[#allocation17 + $0xa0] sm:$0xff]  }
 0x509   :  { %2878 = vmatpush1.bf16.msra.mxu1 %v3996_v54  ;;  %2919 = vmatpush1.bf16.msra.mxu0 %v3999_v55  ;;  %v4054_v54 = vld [vmem:[#allocation17 + $0x58] sm:$0xff]  }
 0x50a   :  { %2879 = vmatprep.subr.bf16.mxu1 %v4004_v5  ;;  %2920 = vmatprep.subr.bf16.mxu0 %v4007_v57  ;;  %v4055_v55 = vld [vmem:[#allocation17 + $0xd8] sm:$0xff]  }
 0x50b   :  { %v4056_v5 = vld [vmem:[#allocation17 + $0x18] sm:$0xff]  }
 0x50c   :  { %v4057_v57 = vld [vmem:[#allocation17 + $0x98] sm:$0xff]  }
 0x50d   :  { %2880 = vmatpush1.bf16.msra.mxu1 %v4002_v51  ;;  %2921 = vmatpush1.bf16.msra.mxu0 %v4005_v34 }
 0x50e   :  { %2881 = vmatprep.subr.bf16.mxu1 %v4010_v19  ;;  %2922 = vmatprep.subr.bf16.mxu0 %v4013_v15 }
 0x511   :  { %2882 = vmatpush1.bf16.msra.mxu1 %v4008_v59  ;;  %2923 = vmatpush1.bf16.msra.mxu0 %v4011_v23 }
 0x512   :  { %2883 = vmatprep.subr.bf16.mxu1 %v4016_v1  ;;  %2924 = vmatprep.subr.bf16.mxu0 %v4019_v3 }
 0x515   :  { %2884 = vmatpush1.bf16.msra.mxu1 %v4014_v24  ;;  %2925 = vmatpush1.bf16.msra.mxu0 %v4017_v0 }
 0x516   :  { %2885 = vmatprep.subr.bf16.mxu1 %v4022_v4  ;;  %2926 = vmatprep.subr.bf16.mxu0 %v4025_v25 }
 0x519   :  { %2886 = vmatpush1.bf16.msra.mxu1 %v4020_v26  ;;  %2927 = vmatpush1.bf16.msra.mxu0 %v4023_v27  ;;  %v4058_v26 = vld [vmem:[#allocation17 + $0x50] sm:$0xff]  }
 0x51a   :  { %2887 = vmatprep.subr.bf16.mxu1 %v4028_v28  ;;  %2928 = vmatprep.subr.bf16.mxu0 %v4031_v44  ;;  %v4059_v27 = vld [vmem:[#allocation17 + $0xd0] sm:$0xff]  }
 0x51b   :  { %v4060_v28 = vld [vmem:[#allocation17 + $0x10] sm:$0xff]  }
 0x51c   :  { %v4061_v44 = vld [vmem:[#allocation17 + $0x90] sm:$0xff]  }
 0x51d   :  { %2888 = vmatpush1.bf16.msra.mxu1 %v4026_v6  ;;  %2929 = vmatpush1.bf16.msra.mxu0 %v4029_v7  ;;  %v4062_v6 = vld [vmem:[#allocation17 + $0x48] sm:$0xff]  }
 0x51e   :  { %2889 = vmatprep.subr.bf16.mxu1 %v4034_v10  ;;  %2930 = vmatprep.subr.bf16.mxu0 %v4037_v12  ;;  %v4063_v7 = vld [vmem:[#allocation17 + $0xc8] sm:$0xff]  }
 0x51f   :  { %v4064_v10 = vld [vmem:[#allocation17 + $0x8] sm:$0xff]  }
 0x520   :  { %v4065_v12 = vld [vmem:[#allocation17 + $0x88] sm:$0xff]  }
 0x521   :  { %2890 = vmatpush1.bf16.msra.mxu1 %v4032_v14  ;;  %2931 = vmatpush1.bf16.msra.mxu0 %v4035_v16  ;;  %v4066_v14 = vld [vmem:[#allocation17 + $0x40] sm:$0xff]  }
 0x522   :  { %3617 = vmatprep.subr.bf16.mxu1 %v4038_v17  ;;  %3639 = vmatprep.subr.bf16.mxu0 %v4039_v29  ;;  %v4067_v16 = vld [vmem:[#allocation17 + $0xc0] sm:$0xff]  }
 0x523   :  { %v4068_v17 = vld [vmem:[#allocation17] sm:$0xff]  }
 0x524   :  { %v4069_v29 = vld [vmem:[#allocation17 + $0x80] sm:$0xff]  }
 0x575   :  { %v2117_v20 = vpop.xlane.xlu1 %2116 }
 0x576   :  { %v2118_v21 = vmul.f32 0.0078125, %v2117_v20  ;;  %v2961_v20 = vld [vmem:[%s5164_s13] sm:$0xf] }
 0x578   :  { %v2119_v35 = vadd.f32 1e-05, %v2118_v21  ;;  %v2966_v21 = vrot.slane %v2961_v20, %v4807_v18 }
 0x57a   :  { %4074 = vrsqrt.f32 %v2119_v35  ;;  %v2974_v35 = vrot.slane %v2961_v20, %v4998_v45 }
 0x583   :  { %v2424_v22 = vpop.f32.mrf.mxu1  ;;  %v2465_v56 = vpop.f32.mrf.mxu0 }
 0x585   :  { %v2426_v36 = vpop.f32.mrf.mxu1  ;;  %v2467_v60 = vpop.f32.mrf.mxu0 }
 0x587   :  { %v4075_v2 = vpop.eup %4074  ;;  %v2428_v13 = vpop.f32.mrf.mxu1 }
 0x588   :  { %v2469_v38 = vpop.f32.mrf.mxu0  ;;  %v2121_v8 = vmul.f32 %v4075_v2, %v5119_v40  ;;  %v4049_v40 = vld [vmem:[#allocation17 + $0xa8] sm:$0xff]   ;;  %v2978_v2 = vrot.slane %v2961_v20, %v5083_v62 }
 0x589   :  { %v2429_v30 = vpop.f32.mrf.mxu1 }
 0x58a   :  { %v2470_v9 = vpop.f32.mrf.mxu0  ;;  %v2126_v42 = vmul.f32 %v2125_v61, %v2121_v8  ;;  %v2970_v61 = vrot.slane %v2961_v20, %v4893_v58 }
 0x58c   :  { %v2131_v43 = vadd.f32 %v2130_v39, %v2126_v42 }
 0x58e   :  { %v2714_v32 = vpack.c.bf16 %v2131_v43, %v2131_v43 }
 0x590   :  { %2908 = vmatmul.mubr.bf16.vlgmr.msra.gmra.mxu1 %v2714_v32  ;;  %2949 = vmatmul.mubr.bf16.vlgmr.msra.gmra.mxu0 %v2714_v32 }
 0x591   :  { %3618 = vmatpush3.bf16.msra.mxu1 %v4040_v46  ;;  %3640 = vmatpush3.bf16.msra.mxu0 %v4041_v41 }
 0x592   :  { %3619 = vmatprep.subr.bf16.mxu1 %v4042_v37  ;;  %3641 = vmatprep.subr.bf16.mxu0 %v4043_v47 }
 0x595   :  { %3620 = vmatpush3.bf16.msra.mxu1 %v4044_v48  ;;  %3642 = vmatpush3.bf16.msra.mxu0 %v4045_v49 }
 0x596   :  { %3621 = vmatprep.subr.bf16.mxu1 %v4046_v50  ;;  %3643 = vmatprep.subr.bf16.mxu0 %v4047_v11 }
 0x599   :  { %3622 = vmatpush3.bf16.msra.mxu1 %v4048_v63  ;;  %3644 = vmatpush3.bf16.msra.mxu0 %v4049_v40  ;;  %v3519_v40 = vld [vmem:[%s5166_s15] ss:$0 sm:$0xff] }
 0x59a   :  { %3623 = vmatprep.subr.bf16.mxu1 %v4050_v33  ;;  %3645 = vmatprep.subr.bf16.mxu0 %v4051_v31 }
 0x59d   :  { %3624 = vmatpush3.bf16.msra.mxu1 %v4052_v52  ;;  %3646 = vmatpush3.bf16.msra.mxu0 %v4053_v53 }
 0x59e   :  { %3625 = vmatprep.subr.bf16.mxu1 %v4054_v54  ;;  %3647 = vmatprep.subr.bf16.mxu0 %v4055_v55 }
 0x5a1   :  { %3626 = vmatpush3.bf16.msra.mxu1 %v4056_v5  ;;  %3648 = vmatpush3.bf16.msra.mxu0 %v4057_v57 }
 0x5a2   :  { %3627 = vmatprep.subr.bf16.mxu1 %v4058_v26  ;;  %3649 = vmatprep.subr.bf16.mxu0 %v4059_v27 }
 0x5a5   :  { %3628 = vmatpush3.bf16.msra.mxu1 %v4060_v28  ;;  %3650 = vmatpush3.bf16.msra.mxu0 %v4061_v44 }
 0x5a6   :  { %3629 = vmatprep.subr.bf16.mxu1 %v4062_v6  ;;  %3651 = vmatprep.subr.bf16.mxu0 %v4063_v7 }
 0x5a9   :  { %3630 = vmatpush3.bf16.msra.mxu1 %v4064_v10  ;;  %3652 = vmatpush3.bf16.msra.mxu0 %v4065_v12 }
 0x5aa   :  { %3631 = vmatprep.subr.bf16.mxu1 %v4066_v14  ;;  %3653 = vmatprep.subr.bf16.mxu0 %v4067_v16 }
 0x5ad   :  { %3632 = vmatpush3.bf16.msra.mxu1 %v4068_v17  ;;  %3654 = vmatpush3.bf16.msra.mxu0 %v4069_v29 }
 0x5c4   :  { %v2666_v51 = vpop.f32.mrf.mxu1  ;;  %v2707_v34 = vpop.f32.mrf.mxu0 }
 0x5c5   :  { %v2667_v19 = vadd.f32 %v2666_v51, %v2424_v22  ;;  %v2708_v15 = vadd.f32 %v2707_v34, %v2465_v56 }
 0x5c6   :  { %v2668_v59 = vpop.f32.mrf.mxu1  ;;  %v2709_v23 = vpop.f32.mrf.mxu0 }
 0x5c7   :  { %v2669_v1 = vadd.f32 %v2668_v59, %v2426_v36  ;;  %v2710_v3 = vadd.f32 %v2709_v23, %v2467_v60 }
 0x5c8   :  { %v2670_v24 = vpop.f32.mrf.mxu1  ;;  %v2711_v0 = vpop.f32.mrf.mxu0 }
 0x5ca   :  { %v2671_v4 = vpop.f32.mrf.mxu1  ;;  %v2712_v25 = vpop.f32.mrf.mxu0 }
 0x650   :  { %v2909_v22 = vpop.f32.mrf.mxu1  ;;  %v2950_v56 = vpop.f32.mrf.mxu0 }
 0x651   :  { %v2957_v36 = vadd.f32 %v2909_v22, %v2667_v19  ;;  %v2959_v60 = vadd.f32 %v2950_v56, %v2708_v15 }
 0x652   :  { %v2911_v13 = vpop.f32.mrf.mxu1  ;;  %v2952_v38 = vpop.f32.mrf.mxu0 }
 0x653   :  { %v2983_v39 = vadd.f32 %v2966_v21, %v2957_v36  ;;  %v2985_v8 = vadd.f32 %v2974_v35, %v2959_v60  ;;  %v2958_v30 = vadd.f32 %v2911_v13, %v2669_v1  ;;  %v2960_v9 = vadd.f32 %v2952_v38, %v2710_v3 }
 0x654   :  { %v2913_v42 = vpop.f32.mrf.mxu1  ;;  %v2954_v43 = vpop.f32.mrf.mxu0 }
 0x655   :  { %v2984_v46 = vadd.f32 %v2970_v61, %v2958_v30  ;;  %v2986_v18 = vadd.f32 %v2978_v2, %v2960_v9  ;;  %v2987_v41 = vmax.f32 %v2983_v39, 0.0  ;;  %v2989_v45 = vmax.f32 %v2985_v8, 0.0 }
 0x656   :  { %v2914_v32 = vpop.f32.mrf.mxu1  ;;  %v2955_v37 = vpop.f32.mrf.mxu0 }
 0x657   :  { %v2988_v47 = vmax.f32 %v2984_v46, 0.0  ;;  %v2990_v48 = vmax.f32 %v2986_v18, 0.0  ;;  %v2991_v50 = vpack.c.bf16 %v2987_v41, %v2987_v41  ;;  %v2993_v62 = vpack.c.bf16 %v2989_v45, %v2989_v45 }
 0x659   :  { %v2992_v49 = vpack.c.bf16 %v2988_v47, %v2988_v47  ;;  %v2994_v58 = vpack.c.bf16 %v2990_v48, %v2990_v48 }
 0x65b   :  { %3290 = vmatprep.mubr.bf16.mxu1 %v2992_v49  ;;  %3330 = vmatprep.mubr.bf16.mxu0 %v2994_v58 }
 0x65c   :  { %3291 = vmatmul.mubr.bf16.vlgmr.msra.gmra.mxu1 %v2991_v50  ;;  %3331 = vmatmul.mubr.bf16.vlgmr.msra.gmra.mxu0 %v2993_v62 }
 0x71c   :  { %v3633_v11 = vpop.f32.mrf.mxu1  ;;  %v3655_v63 = vpop.f32.mrf.mxu0 }
 0x71e   :  { %v3634_v33 = vpop.f32.mrf.mxu1  ;;  %v3656_v31 = vpop.f32.mrf.mxu0 }
 0x71f   :  { %v3635_v52 = vadd.f32 %v3634_v33, %v3633_v11  ;;  %v3657_v5 = vadd.f32 %v3656_v31, %v3655_v63 }
 0x720   :  { %v3636_v53 = vpop.f32.mrf.mxu1  ;;  %v3658_v54 = vpop.f32.mrf.mxu0 }
 0x721   :  { %v3293_v55 = vadd.f32 %v3635_v52, %v3519_v40 }
 0x722   :  { %v3637_v57 = vpop.f32.mrf.mxu1  ;;  %v3659_v51 = vpop.f32.mrf.mxu0 }
 0x723   :  { %v3333_v34 = vadd.f32 %v3657_v5, %v3293_v55 }
 0x725   :  { %3338 = vst [vmem:[#allocation19] sm:$0xff] %v3333_v34 }
 0x726   :  { %4288 = shalt.err (!%p4285_p12)
}
 0x727   :  { %3348 = dma.vmem_to_hbm [thread:$0]  %s3346_s22, 128, %s5167_s16, [#allocation4]  }
 0x728   :  { %4309 = dma.done.wait [#allocation4], 128  }
 0x729   :  { %4310 = vsyncadd [#allocation4], 4294967168 }
 0x72a   :  { %3352 = vsyncpa [#allocation3], 1 }
 0x72b   :  { %3353 = vsyncpa [#allocation6], 1 }
 0x72c   :  { %3354 = vsyncpa [#allocation9], 1 }
 0x72d   :  { %3355 = vsyncpa [#allocation12], 1 }
 0x72e   :  { %3356 = vsyncpa [#allocation15], 1 }
 0x72f   :  { %3357 = vsyncpa [#allocation18], 1 }
 0x730   :  { %3358 = vsyncpa [#allocation4], 1 }

// kernel: tpu_custom_call.1
= control target key start
LH: loop header
LB: loop body
LE: loop exit
PB: predicated region body
PF: predicated region fallthrough
CT: control target
= control target key end

     0   :  { %s5151_s0 = inlined_call_operand.hbm [shape: f32[8,32], index: 0, kind: input, shape index: {}]   ;;  %s5152_s1 = inlined_call_operand.vmem [shape: f32[8,16,256], index: 1, kind: input, shape index: {}]   ;;  %s5153_s2 = inlined_call_operand.hbm [shape: f32[8,24,64], index: 2, kind: input, shape index: {}]   ;;  %s5154_s3 = inlined_call_operand.vmem [shape: f32[8,32,16], index: 3, kind: input, shape index: {}]   ;;  %s5155_s4 = inlined_call_operand.hbm [shape: bf16[32,384], index: 4, kind: input, shape index: {}]   ;;  %s5156_s5 = inlined_call_operand.hbm [shape: bf16[16,128], index: 5, kind: input, shape index: {}]   ;;  %s5157_s6 = inlined_call_operand.hbm [shape: bf16[24,128], index: 6, kind: input, shape index: {}]   ;;  %s5158_s7 = inlined_call_operand.hbm [shape: bf16[32,128], index: 7, kind: input, shape index: {}]   ;;  %s5159_s8 = inlined_call_operand.vmem [shape: bf16[256,128], index: 8, kind: input, shape index: {}]   ;;  %s5160_s9 = inlined_call_operand.hbm [shape: bf16[256,128], index: 9, kind: input, shape index: {}]   ;;  %s5161_s10 = inlined_call_operand.hbm [shape: bf16[256,128], index: 10, kind: input, shape index: {}]   ;;  %s5162_s11 = inlined_call_operand.vmem [shape: f32[16,128], index: 11, kind: input, shape index: {}]   ;;  %s5163_s12 = inlined_call_operand.hbm [shape: bf16[384,512], index: 12, kind: input, shape index: {}]   ;;  %s5164_s13 = inlined_call_operand.vmem [shape: f32[1,512], index: 13, kind: input, shape index: {}]   ;;  %s5165_s14 = inlined_call_operand.hbm [shape: bf16[512,128], index: 14, kind: input, shape index: {}]   ;;  %s5166_s15 = inlined_call_operand.vmem [shape: f32[1,128], index: 15, kind: input, shape index: {}]   ;;  %s5167_s16 = inlined_call_operand.hbm [shape: f32[8,128], index: 16, kind: output, shape index: {}]  }
   0x1   :  { %5168 = sst [smem:[#allocation27_spill]] %s5151_s0 }
   0x2   :  { %21 = vsyncpa [#allocation3], 0 }
   0x3   :  { %22 = vsyncpa [#allocation6], 0 }
   0x4   :  { %23 = vsyncpa [#allocation9], 0 }
   0x5   :  { %24 = vsyncpa [#allocation12], 0 }
   0x6   :  { %25 = vsyncpa [#allocation15], 0 }
   0x7   :  { %26 = vsyncpa [#allocation18], 0 }
   0x8   :  { %27 = vsyncpa [#allocation4], 0  ;;  %s4311_s21 = smov [#allocation5]  }
   0x9   :  { %s45_s22 = sshll.u32 %s4311_s21, 4  ;;  %s46_s22 = int_to_ptr.vmem [resolvable:$true] %s45_s22 }
   0xa   :  { %s4085_s23 = scalar_lea.vmem %s46_s22, 3072  ;;  %p4090_p1 = scmp.lt.s32.totalorder %s46_s22, %s46_s22 }
   0xb   :  { %p4086_p0 = scmp.ne.s32.totalorder %s46_s22, %s4085_s23  ;;  %p4091_p2 = scmp.lt.s32.totalorder %s4085_s23, %s4085_s23 }
   0xd   :  { %p4092_p3 = por %p4091_p2, %p4090_p1 }
   0xf   :  { %p4093_p4 = pnand %p4092_p3, %p4086_p0 }
  0x11   :  { %4096 = shalt.err (!%p4093_p4)
}
  0x12   :  { %s4312_s24 = smov 128   ;;  %s4313_s25 = smov 8  }
  0x13   :  { %51 = dma.hbm_to_vmem [thread:$0]  %s5153_s2, 3072, %s46_s22, [#allocation6], %s4312_s24, %s4312_s24, %s4313_s25  }
  0x14   :  { %s4314_s28 = smov [#allocation8]  }
  0x15   :  { %s71_s29 = sshll.u32 %s4314_s28, 4  ;;  %s72_s29 = int_to_ptr.vmem [resolvable:$true] %s71_s29 }
  0x16   :  { %s4105_s30 = scalar_lea.vmem %s72_s29, 128  ;;  %p4110_p6 = scmp.lt.s32.totalorder %s72_s29, %s72_s29 }
  0x17   :  { %p4106_p5 = scmp.ne.s32.totalorder %s72_s29, %s4105_s30  ;;  %p4111_p7 = scmp.lt.s32.totalorder %s4105_s30, %s4105_s30 }
  0x19   :  { %p4112_p8 = por %p4111_p7, %p4110_p6 }
  0x1b   :  { %p4113_p9 = pnand %p4112_p8, %p4106_p5 }
  0x1d   :  { %4116 = shalt.err (!%p4113_p9)
}
  0x1e   :  { %s4315_s0 = smov 64   ;;  %s4316_s17 = smov 4  }
  0x1f   :  { %77 = dma.hbm_to_vmem [thread:$0]  %s5156_s5, 128, %s72_s29, [#allocation9], %s4315_s0, %s4315_s0, %s4316_s17  }
  0x20   :  { %s4317_s2 = smov [#allocation11]   ;;  %s4318_s21 = smov [#allocation14]  }
  0x21   :  { %s95_s20 = sshll.u32 %s4317_s2, 4  ;;  %s121_s22 = sshll.u32 %s4318_s21, 4  ;;  %s96_s20 = int_to_ptr.vmem [resolvable:$true] %s95_s20  ;;  %s122_s22 = int_to_ptr.vmem [resolvable:$true] %s121_s22 }
  0x22   :  { %s4125_s23 = scalar_lea.vmem %s96_s20, 256  ;;  %p4130_p11 = scmp.lt.s32.totalorder %s96_s20, %s96_s20 }
  0x23   :  { %p4126_p10 = scmp.ne.s32.totalorder %s96_s20, %s4125_s23  ;;  %p4131_p12 = scmp.lt.s32.totalorder %s4125_s23, %s4125_s23 }
  0x25   :  { %p4132_p13 = por %p4131_p12, %p4130_p11 }
  0x27   :  { %p4133_p0 = pnand %p4132_p13, %p4126_p10 }
  0x29   :  { %4136 = shalt.err (!%p4133_p0)
}
  0x2a   :  { %101 = dma.hbm_to_vmem [thread:$0]  %s5158_s7, 256, %s96_s20, [#allocation12], %s4315_s0, %s4315_s0, %s4316_s17  }
  0x2b   :  { %s4145_s5 = scalar_lea.vmem %s122_s22, 2048  ;;  %p4150_p2 = scmp.lt.s32.totalorder %s122_s22, %s122_s22 }
  0x2c   :  { %p4146_p1 = scmp.ne.s32.totalorder %s122_s22, %s4145_s5  ;;  %p4151_p3 = scmp.lt.s32.totalorder %s4145_s5, %s4145_s5 }
  0x2e   :  { %p4152_p4 = por %p4151_p3, %p4150_p2 }
  0x30   :  { %p4153_p5 = pnand %p4152_p4, %p4146_p1 }
  0x32   :  { %4156 = shalt.err (!%p4153_p5)
}
  0x33   :  { %127 = dma.hbm_to_vmem [thread:$0]  %s5161_s10, 2048, %s122_s22, [#allocation15], %s4315_s0, %s4315_s0, %s4316_s17  }
  0x34   :  { %s4319_s28 = smov [#allocation2]   ;;  %s4320_s30 = smov [#allocation7]  }
  0x35   :  { %s34_s29 = sshll.u32 %s4319_s28, 4  ;;  %s59_s18 = sshll.u32 %s4320_s30, 4  ;;  %s35_s29 = int_to_ptr.vmem [resolvable:$true] %s34_s29  ;;  %s60_s18 = int_to_ptr.vmem [resolvable:$true] %s59_s18 }
  0x36   :  { %s4165_s7 = scalar_lea.vmem %s35_s29, 128  ;;  %p4170_p7 = scmp.lt.s32.totalorder %s35_s29, %s35_s29 }
  0x37   :  { %p4166_p6 = scmp.ne.s32.totalorder %s35_s29, %s4165_s7  ;;  %p4171_p8 = scmp.lt.s32.totalorder %s4165_s7, %s4165_s7 }
  0x39   :  { %p4172_p9 = por %p4171_p8, %p4170_p7 }
  0x3b   :  { %p4173_p10 = pnand %p4172_p9, %p4166_p6 }
  0x3d   :  { %4176 = shalt.err (!%p4173_p10)
}
  0x3e   :  { %s5169_s20 = sld [smem:[#allocation27_spill]]  ;;  %s4185_s21 = scalar_lea.vmem %s60_s18, 768 }
  0x3f   :  { %p4186_p11 = scmp.ne.s32.totalorder %s60_s18, %s4185_s21  ;;  %p4190_p12 = scmp.lt.s32.totalorder %s60_s18, %s60_s18 }
  0x40   :  { %p4191_p13 = scmp.lt.s32.totalorder %s4185_s21, %s4185_s21 }
  0x42   :  { %p4192_p0 = por %p4191_p13, %p4190_p12 }
  0x44   :  { %37 = dma.hbm_to_vmem [thread:$0]  %s5169_s20, 128, %s35_s29, [#allocation3]  }
  0x45   :  { %p4193_p1 = pnand %p4192_p0, %p4186_p11 }
  0x47   :  { %4196 = shalt.err (!%p4193_p1)
}
  0x48   :  { %s4321_s10 = smov 192   ;;  %s4322_s22 = smov 12  }
  0x49   :  { %65 = dma.hbm_to_vmem [thread:$0]  %s5155_s4, 768, %s60_s18, [#allocation6], %s4321_s10, %s4321_s10, %s4322_s22  }
  0x4a   :  { %s4323_s25 = smov [#allocation10]   ;;  %s4324_s26 = smov [#allocation13]  }
  0x4b   :  { %s83_s5 = sshll.u32 %s4323_s25, 4  ;;  %s109_s27 = sshll.u32 %s4324_s26, 4  ;;  %s84_s5 = int_to_ptr.vmem [resolvable:$true] %s83_s5  ;;  %s110_s27 = int_to_ptr.vmem [resolvable:$true] %s109_s27 }
  0x4c   :  { %s4205_s28 = scalar_lea.vmem %s84_s5, 192  ;;  %p4210_p3 = scmp.lt.s32.totalorder %s84_s5, %s84_s5 }
  0x4d   :  { %p4206_p2 = scmp.ne.s32.totalorder %s84_s5, %s4205_s28  ;;  %p4211_p4 = scmp.lt.s32.totalorder %s4205_s28, %s4205_s28 }
  0x4f   :  { %p4212_p5 = por %p4211_p4, %p4210_p3 }
  0x51   :  { %p4213_p6 = pnand %p4212_p5, %p4206_p2 }
  0x53   :  { %4216 = shalt.err (!%p4213_p6)
}
  0x54   :  { %89 = dma.hbm_to_vmem [thread:$0]  %s5157_s6, 192, %s84_s5, [#allocation9], %s4315_s0, %s4315_s0, %s4316_s17  }
  0x55   :  { %s4225_s4 = scalar_lea.vmem %s110_s27, 2048  ;;  %p4230_p8 = scmp.lt.s32.totalorder %s110_s27, %s110_s27 }
  0x56   :  { %p4226_p7 = scmp.ne.s32.totalorder %s110_s27, %s4225_s4  ;;  %p4231_p9 = scmp.lt.s32.totalorder %s4225_s4, %s4225_s4 }
  0x58   :  { %p4232_p10 = por %p4231_p9, %p4230_p8 }
  0x5a   :  { %p4233_p11 = pnand %p4232_p10, %p4226_p7 }
  0x5c   :  { %4236 = shalt.err (!%p4233_p11)
}
  0x5d   :  { %115 = dma.hbm_to_vmem [thread:$0]  %s5160_s9, 2048, %s110_s27, [#allocation12], %s4315_s0, %s4315_s0, %s4316_s17  }
  0x5e   :  { %s4325_s19 = smov [#allocation16]  }
  0x5f   :  { %s135_s2 = sshll.u32 %s4325_s19, 4  ;;  %s136_s2 = int_to_ptr.vmem [resolvable:$true] %s135_s2 }
  0x60   :  { %s4245_s20 = scalar_lea.vmem %s136_s2, 12288  ;;  %p4250_p13 = scmp.lt.s32.totalorder %s136_s2, %s136_s2 }
  0x61   :  { %p4246_p12 = scmp.ne.s32.totalorder %s136_s2, %s4245_s20  ;;  %p4251_p0 = scmp.lt.s32.totalorder %s4245_s20, %s4245_s20 }
  0x63   :  { %p4252_p1 = por %p4251_p0, %p4250_p13 }
  0x65   :  { %p4253_p2 = pnand %p4252_p1, %p4246_p12 }
  0x67   :  { %4256 = shalt.err (!%p4253_p2)
}
  0x68   :  { %s4326_s6 = smov 256   ;;  %s4327_s21 = smov 16  }
  0x69   :  { %141 = dma.hbm_to_vmem [thread:$0]  %s5163_s12, 12288, %s136_s2, [#allocation15], %s4326_s6, %s4326_s6, %s4327_s21  }
  0x6a   :  { %s4328_s23 = smov [#allocation17]  }
  0x6b   :  { %s149_s24 = sshll.u32 %s4328_s23, 4  ;;  %s150_s24 = int_to_ptr.vmem [resolvable:$true] %s149_s24 }
  0x6c   :  { %s4265_s9 = scalar_lea.vmem %s150_s24, 4096  ;;  %p4270_p4 = scmp.lt.s32.totalorder %s150_s24, %s150_s24 }
  0x6d   :  { %p4266_p3 = scmp.ne.s32.totalorder %s150_s24, %s4265_s9  ;;  %p4271_p5 = scmp.lt.s32.totalorder %s4265_s9, %s4265_s9 }
  0x6f   :  { %p4272_p6 = por %p4271_p5, %p4270_p4 }
  0x71   :  { %p4273_p7 = pnand %p4272_p6, %p4266_p3 }
  0x73   :  { %4276 = shalt.err (!%p4273_p7)
}
  0x74   :  { %155 = dma.hbm_to_vmem [thread:$0]  %s5165_s14, 4096, %s150_s24, [#allocation18], %s4315_s0, %s4315_s0, %s4316_s17  }
  0x75   :  { %4297 = dma.done.wait [#allocation3], 128  }
  0x76   :  { %4298 = vsyncadd [#allocation3], 4294967168 }
  0x77   :  { %4299 = dma.done.wait [#allocation6], 3840  }
  0x78   :  { %4300 = vsyncadd [#allocation6], 4294963456 }
  0x79   :  { %4301 = dma.done.wait [#allocation9], 320  }
  0x7a   :  { %4302 = vsyncadd [#allocation9], 4294966976 }
  0x7b   :  { %4303 = dma.done.wait [#allocation12], 2304  }
  0x7c   :  { %4304 = vsyncadd [#allocation12], 4294964992 }
  0x7d   :  { %4305 = dma.done.wait [#allocation15], 14336  }
  0x7e   :  { %4306 = vsyncadd [#allocation15], 4294952960 }
  0x7f   :  { %4307 = dma.done.wait [#allocation18], 4096  }
  0x80   :  { %4308 = vsyncadd [#allocation18], 4294963200  ;;  %v195_v0 = vld [vmem:[%s5152_s1 + $0x20] sm:$0xff]  ;;  %v196_v1 = vld [vmem:[%s5152_s1 + $0x28] sm:$0xff]  ;;  %vm311_vm0 = vcmask 523264   ;;  %vm611_vm1 = vcmask 261120  }
  0x81   :  { %v191_v2 = vld [vmem:[%s5152_s1] sm:$0xff]  ;;  %v229_v3 = vadd.f32 %v196_v1, %v195_v0  ;;  %v192_v4 = vld [vmem:[%s5152_s1 + $0x8] sm:$0xff]  ;;  %v197_v5 = vld [vmem:[%s5152_s1 + $0x30] sm:$0xff]  ;;  %v4329_v0 = vmov 0   ;;  %vm4331_vm2 = vmmov 0   ;;  %vm440_vm3 = vcmask 130048  }
  0x82   :  { %v198_v6 = vld [vmem:[%s5152_s1 + $0x38] sm:$0xff]  ;;  %v223_v7 = vadd.f32 %v192_v4, %v191_v2  ;;  %v193_v8 = vld [vmem:[%s5152_s1 + $0x10] sm:$0xff]  ;;  %v199_v14 = vld [vmem:[%s5152_s1 + $0x40] sm:$0xff]  ;;  %647 = vmatprep.mubr.bf16.mxu0 %v4329_v0  ;;  %vm750_vm4 = vcmask 130112   ;;  %vm815_vm5 = vcmask 1041409   ;;  %vm817_vm6 = vcmask 1042434  }
  0x83   :  { %v194_v9 = vld [vmem:[%s5152_s1 + $0x18] sm:$0xff]  ;;  %230 = vadd.xlane.f32.xlu1 %v229_v3  ;;  %v232_v10 = vadd.f32 %v198_v6, %v197_v5  ;;  %v201_v12 = vld [vmem:[%s5152_s1 + $0x50] sm:$0xff]  ;;  %v200_v15 = vld [vmem:[%s5152_s1 + $0x48] sm:$0xff]  ;;  %vm819_vm7 = vcmask 1043459   ;;  %vm821_vm8 = vcmask 1044484   ;;  %vm823_vm9 = vcmask 1045509  }
  0x84   :  { %224 = vadd.xlane.f32.xlu0 %v223_v7  ;;  %v226_v11 = vadd.f32 %v194_v9, %v193_v8  ;;  %v202_v13 = vld [vmem:[%s5152_s1 + $0x58] sm:$0xff]  ;;  %v235_v17 = vadd.f32 %v200_v15, %v199_v14  ;;  %v205_v18 = vld [vmem:[%s5152_s1 + $0x70] sm:$0xff]  ;;  %v203_v20 = vld [vmem:[%s5152_s1 + $0x60] sm:$0xff]  ;;  %vm825_vm10 = vcmask 1046534   ;;  %vm827_vm11 = vcmask 1047559   ;;  %s4332_s10 = smov [#allocation19]  }
  0x85   :  { %v238_v16 = vadd.f32 %v202_v13, %v201_v12  ;;  %v206_v19 = vld [vmem:[%s5152_s1 + $0x78] sm:$0xff]  ;;  %v204_v21 = vld [vmem:[%s5152_s1 + $0x68] sm:$0xff]  ;;  %v209_v22 = vld [vmem:[%s5152_s1 + $0x90] sm:$0xff]  ;;  %v4330_v13 = vmov 0.0   ;;  %vm1199_vm12 = vcmask 195712   ;;  %vm1320_vm13 = vcmask 1043456  }
  0x86   :  { %v210_v23 = vld [vmem:[%s5152_s1 + $0x98] sm:$0xff]  ;;  %v244_v24 = vadd.f32 %v206_v19, %v205_v18  ;;  %v207_v25 = vld [vmem:[%s5152_s1 + $0x80] sm:$0xff]  ;;  %v208_v26 = vld [vmem:[%s5152_s1 + $0x88] sm:$0xff]  ;;  %v241_v27 = vadd.f32 %v204_v21, %v203_v20  ;;  %3661 = vmatprep.subr.bf16.mxu1 %v4330_v13  ;;  %3665 = vmatprep.mubr.msk.bf16.mxu1 %vm4331_vm2, %v4330_v13  ;;  %vm1316_vm14 = vcmask 195584   ;;  %vm1697_vm15 = vcmask 261312   ;;  %s3345_s22 = sshll.u32 %s4332_s10, 4  ;;  %s3346_s22 = int_to_ptr.vmem [resolvable:$true] %s3345_s22 }
  0x87   :  { %233 = vadd.xlane.f32.xlu1 %v232_v10  ;;  %v213_v28 = vld [vmem:[%s5152_s1 + $0xb0] sm:$0xff]  ;;  %v214_v29 = vld [vmem:[%s5152_s1 + $0xb8] sm:$0xff]  ;;  %v250_v30 = vadd.f32 %v210_v23, %v209_v22  ;;  %v211_v31 = vld [vmem:[%s5152_s1 + $0xa0] sm:$0xff]  ;;  %v247_v32 = vadd.f32 %v208_v26, %v207_v25  ;;  %s4277_s23 = scalar_lea.vmem %s3346_s22, 128  ;;  %p4282_p9 = scmp.lt.s32.totalorder %s3346_s22, %s3346_s22 }
  0x88   :  { %227 = vadd.xlane.f32.xlu0 %v226_v11  ;;  %v212_v33 = vld [vmem:[%s5152_s1 + $0xa8] sm:$0xff]  ;;  %v217_v34 = vld [vmem:[%s5152_s1 + $0xd0] sm:$0xff]  ;;  %v218_v35 = vld [vmem:[%s5152_s1 + $0xd8] sm:$0xff]  ;;  %v256_v36 = vadd.f32 %v214_v29, %v213_v28  ;;  %p4278_p8 = scmp.ne.s32.totalorder %s3346_s22, %s4277_s23  ;;  %p4283_p10 = scmp.lt.s32.totalorder %s4277_s23, %s4277_s23 }
  0x89   :  { %v215_v37 = vld [vmem:[%s5152_s1 + $0xc0] sm:$0xff]  ;;  %v216_v38 = vld [vmem:[%s5152_s1 + $0xc8] sm:$0xff]  ;;  %v253_v39 = vadd.f32 %v212_v33, %v211_v31  ;;  %v221_v40 = vld [vmem:[%s5152_s1 + $0xf0] sm:$0xff]  ;;  %v262_v42 = vadd.f32 %v218_v35, %v217_v34 }
  0x8a   :  { %v222_v41 = vld [vmem:[%s5152_s1 + $0xf8] sm:$0xff]  ;;  %v259_v43 = vadd.f32 %v216_v38, %v215_v37  ;;  %v219_v44 = vld [vmem:[%s5152_s1 + $0xe0] sm:$0xff]  ;;  %v220_v45 = vld [vmem:[%s5152_s1 + $0xe8] sm:$0xff]  ;;  %p4284_p11 = por %p4283_p10, %p4282_p9 }
  0x8b   :  { %239 = vadd.xlane.f32.xlu1 %v238_v16  ;;  %v268_v46 = vadd.f32 %v222_v41, %v221_v40  ;;  %v265_v47 = vadd.f32 %v220_v45, %v219_v44  ;;  %v287_v48 = vld [vmem:[#allocation5] sm:$0xff]  ;;  %v288_v49 = vld [vmem:[#allocation5 + $0x8] sm:$0xff]  ;;  %v290_v53 = vld [vmem:[#allocation5 + $0x18] sm:$0xff] }
  0x8c   :  { %236 = vadd.xlane.f32.xlu0 %v235_v17  ;;  %v3833_v50 = vld [vmem:[#allocation7 + $0x1c] ss:$12 sps:$4 sm:$0xff]   ;;  %v3835_v51 = vld [vmem:[#allocation7 + $0x18] ss:$12 sps:$4 sm:$0xff]   ;;  %v315_v52 = vsel %vm311_vm0, %v288_v49, 0.0  ;;  %v312_v54 = vsel %vm311_vm0, %v287_v48, 0.0  ;;  %p4285_p12 = pnand %p4284_p11, %p4278_p8 }
  0x8d   :  { %627 = vmatprep.subr.bf16.mxu0 %v3833_v50  ;;  %v291_v55 = vld [vmem:[#allocation5 + $0x20] sm:$0xff]  ;;  %v321_v59 = vsel %vm311_vm0, %v290_v53, 0.0  ;;  %v292_v60 = vld [vmem:[#allocation5 + $0x28] sm:$0xff]  ;;  %v189_v61 = vld [vmem:[#allocation2] sm:$0xff] }
  0x8e   :  { %628 = vmatpush1.bf16.msra.mxu0 %v3835_v51  ;;  %v3836_v56 = vld [vmem:[#allocation7 + $0x4] ss:$12 sps:$4 sm:$0xff]   ;;  %v3838_v57 = vld [vmem:[#allocation7] ss:$12 sps:$4 sm:$0xff]   ;;  %v324_v58 = vsel %vm311_vm0, %v291_v55, 0.0  ;;  %v4566_v63 = vpack.c.bf16 %v189_v61, %v189_v61  ;;  %v327_v1 = vsel %vm311_vm0, %v292_v60, 0.0 }
  0x8f   :  { %245 = vadd.xlane.f32.xlu1 %v244_v24  ;;  %629 = vmatprep.subr.bf16.mxu0 %v3836_v56  ;;  %v289_v62 = vld [vmem:[#allocation5 + $0x10] sm:$0xff]  ;;  %v294_v4 = vld [vmem:[#allocation5 + $0x38] sm:$0xff]  ;;  %v295_v6 = vld [vmem:[#allocation5 + $0x40] sm:$0xff] }
  0x90   :  { %242 = vadd.xlane.f32.xlu0 %v241_v27  ;;  %v293_v2 = vld [vmem:[#allocation5 + $0x30] sm:$0xff]  ;;  %v318_v3 = vsel %vm311_vm0, %v289_v62, 0.0  ;;  %v333_v5 = vsel %vm311_vm0, %v294_v4, 0.0  ;;  %v296_v8 = vld [vmem:[#allocation5 + $0x48] sm:$0xff]  ;;  %v298_v10 = vld [vmem:[#allocation5 + $0x58] sm:$0xff]  ;;  %v336_v11 = vsel %vm311_vm0, %v295_v6, 0.0 }
  0x91   :  { %v330_v7 = vsel %vm311_vm0, %v293_v2, 0.0  ;;  %v339_v9 = vsel %vm311_vm0, %v296_v8, 0.0  ;;  %v3839_v12 = vld [vmem:[#allocation8] sm:$0xff]   ;;  %v345_v15 = vsel %vm311_vm0, %v298_v10, 0.0  ;;  %v299_v16 = vld [vmem:[#allocation5 + $0x60] sm:$0xff]  ;;  %v300_v18 = vld [vmem:[#allocation5 + $0x68] sm:$0xff] }
  0x92   :  { %630 = vmatpush1.bf16.msra.mxu0 %v3838_v57  ;;  %v297_v14 = vld [vmem:[#allocation5 + $0x50] sm:$0xff]  ;;  %v302_v20 = vld [vmem:[#allocation5 + $0x78] sm:$0xff]  ;;  %v304_v21 = vld [vmem:[#allocation5 + $0x88] sm:$0xff]  ;;  %v348_v22 = vsel %vm311_vm0, %v299_v16, 0.0  ;;  %v351_v23 = vsel %vm311_vm0, %v300_v18, 0.0 }
  0x93   :  { %251 = vadd.xlane.f32.xlu1 %v250_v30  ;;  %3669 = vmatprep.subr.bf16.mxu0 %v4330_v13  ;;  %v342_v17 = vsel %vm311_vm0, %v297_v14, 0.0  ;;  %v301_v19 = vld [vmem:[#allocation5 + $0x70] sm:$0xff]  ;;  %v357_v25 = vsel %vm311_vm0, %v302_v20, 0.0  ;;  %v363_v26 = vsel %vm311_vm0, %v304_v21, 0.0  ;;  %v303_v27 = vld [vmem:[#allocation5 + $0x80] sm:$0xff]  ;;  %v306_v28 = vld [vmem:[#allocation5 + $0x98] sm:$0xff] }
  0x94   :  { %248 = vadd.xlane.f32.xlu0 %v247_v32  ;;  %v354_v24 = vsel %vm311_vm0, %v301_v19, 0.0  ;;  %v305_v29 = vld [vmem:[#allocation5 + $0x90] sm:$0xff]  ;;  %v360_v30 = vsel %vm311_vm0, %v303_v27, 0.0  ;;  %v308_v31 = vld [vmem:[#allocation5 + $0xa8] sm:$0xff]  ;;  %v369_v32 = vsel %vm311_vm0, %v306_v28, 0.0  ;;  %v307_v33 = vld [vmem:[#allocation5 + $0xa0] sm:$0xff] }
  0x95   :  { %3365 = vmatmul.mubr.msk.bf16.vlgmr.msra.gmra.mxu0 %vm611_vm1, %v4566_v63  ;;  %v366_v34 = vsel %vm311_vm0, %v305_v29, 0.0  ;;  %v310_v35 = vld [vmem:[#allocation5 + $0xb8] sm:$0xff]  ;;  %v309_v37 = vld [vmem:[#allocation5 + $0xb0] sm:$0xff]  ;;  %v372_v38 = vsel %vm311_vm0, %v307_v33, 0.0  ;;  %v409_v41 = vld [vmem:[%s5154_s3 + $0x8] sm:$0xff] }
  0x96   :  { %3670 = vmatpush3.bf16.msra.mxu0 %v3839_v12  ;;  %3671 = vmatprep.mubr.msk.bf16.mxu0 %vm4331_vm2, %v4330_v13  ;;  %v378_v40 = vsel %vm311_vm0, %v309_v37, 0.0  ;;  %v413_v45 = vld [vmem:[%s5154_s3 + $0x28] sm:$0xff]  ;;  %v411_v50 = vld [vmem:[%s5154_s3 + $0x18] sm:$0xff]  ;;  %v414_v56 = vld [vmem:[%s5154_s3 + $0x30] sm:$0xff] }
  0x97   :  { %257 = vadd.xlane.f32.xlu1 %v256_v36  ;;  %3695 = vmatprep.subr.bf16.mxu0 %v4330_v13  ;;  %v375_v36 = vsel %vm311_vm0, %v308_v31, 0.0  ;;  %v456_v48 = vsel %vm440_vm3, %v413_v45, 0.0  ;;  %v450_v51 = vsel %vm440_vm3, %v411_v50, 0.0  ;;  %v3842_v53 = vld [vmem:[#allocation7 + $0x8] ss:$12 sps:$4 sm:$0xff]   ;;  %v416_v61 = vld [vmem:[%s5154_s3 + $0x40] sm:$0xff] }
  0x98   :  { %254 = vadd.xlane.f32.xlu0 %v253_v39  ;;  %v381_v39 = vsel %vm311_vm0, %v310_v35, 0.0  ;;  %v415_v55 = vld [vmem:[%s5154_s3 + $0x38] sm:$0xff]  ;;  %v3848_v2 = vld [vmem:[%s5159_s8 + $0x70] sm:$0xff]   ;;  %v425_v8 = vld [vmem:[%s5154_s3 + $0x88] sm:$0xff] }
  0x99   :  { %v462_v57 = vsel %vm440_vm3, %v415_v55, 0.0  ;;  %v3846_v60 = vld [vmem:[%s5159_s8 + $0x78] sm:$0xff]   ;;  %v418_v4 = vld [vmem:[%s5154_s3 + $0x50] sm:$0xff]  ;;  %v424_v10 = vld [vmem:[%s5154_s3 + $0x80] sm:$0xff]  ;;  %v492_v19 = vsel %vm440_vm3, %v425_v8, 0.0 }
  0x9a   :  { %v423_v6 = vld [vmem:[%s5154_s3 + $0x78] sm:$0xff]  ;;  %v471_v12 = vsel %vm440_vm3, %v418_v4, 0.0  ;;  %v3852_v20 = vld [vmem:[%s5159_s8 + $0x60] sm:$0xff]   ;;  %v489_v21 = vsel %vm440_vm3, %v424_v10, 0.0  ;;  %v3856_v27 = vld [vmem:[%s5159_s8 + $0x48] sm:$0xff]  }
  0x9b   :  { %263 = vadd.xlane.f32.xlu1 %v262_v42  ;;  %v408_v42 = vld [vmem:[%s5154_s3] sm:$0xff]  ;;  %v431_v31 = vld [vmem:[%s5154_s3 + $0xb8] sm:$0xff]  ;;  %v430_v33 = vld [vmem:[%s5154_s3 + $0xb0] sm:$0xff] }
  0x9c   :  { %260 = vadd.xlane.f32.xlu0 %v259_v43  ;;  %v444_v43 = vsel %vm440_vm3, %v409_v41, 0.0  ;;  %v441_v44 = vsel %vm440_vm3, %v408_v42, 0.0  ;;  %v428_v29 = vld [vmem:[%s5154_s3 + $0xa0] sm:$0xff]  ;;  %v507_v35 = vsel %vm440_vm3, %v430_v33, 0.0 }
  0x9f   :  { %269 = vadd.xlane.f32.xlu1 %v268_v46  ;;  %v412_v46 = vld [vmem:[%s5154_s3 + $0x20] sm:$0xff] }
  0xa0   :  { %266 = vadd.xlane.f32.xlu0 %v265_v47  ;;  %v3840_v47 = vld [vmem:[#allocation7 + $0x20] ss:$12 sps:$4 sm:$0xff]   ;;  %v453_v49 = vsel %vm440_vm3, %v412_v46, 0.0 }
  0xa1   :  { %3662 = vmatpush3.bf16.msra.mxu1 %v3840_v47 }
  0xa2   :  { %3663 = vmatprep.subr.bf16.mxu1 %v4330_v13 }
  0xa3   :  { %316 = vadd.xlane.f32.xlu1 %v315_v52  ;;  %v410_v52 = vld [vmem:[%s5154_s3 + $0x10] sm:$0xff] }
  0xa4   :  { %313 = vadd.xlane.f32.xlu0 %v312_v54  ;;  %v447_v54 = vsel %vm440_vm3, %v410_v52, 0.0 }
  0xa5   :  { %3664 = vmatpush3.bf16.msra.mxu1 %v3842_v53 }
  0xa6   :  { %3675 = vmatprep.subr.bf16.mxu1 %v4330_v13 }
  0xa7   :  { %325 = vadd.xlane.f32.xlu1 %v324_v58  ;;  %v417_v58 = vld [vmem:[%s5154_s3 + $0x48] sm:$0xff] }
  0xa8   :  { %322 = vadd.xlane.f32.xlu0 %v321_v59  ;;  %v459_v59 = vsel %vm440_vm3, %v414_v56, 0.0  ;;  %3666 = vmatmul.mubr.msk.bf16.vlgmr.msra.gmra.mxu1 %vm611_vm1, %v4566_v63  ;;  %v468_v62 = vsel %vm440_vm3, %v417_v58, 0.0  ;;  %v421_v63 = vld [vmem:[%s5154_s3 + $0x68] sm:$0xff] }
  0xa9   :  { %3676 = vmatpush3.bf16.msra.mxu1 %v3846_v60  ;;  %3691 = vmatprep.mubr.msk.bf16.mxu1 %vm4331_vm2, %v4330_v13  ;;  %v480_v14 = vsel %vm440_vm3, %v421_v63, 0.0 }
  0xaa   :  { %3677 = vmatprep.subr.bf16.mxu1 %v4330_v13 }
  0xab   :  { %328 = vadd.xlane.f32.xlu1 %v327_v1  ;;  %v419_v1 = vld [vmem:[%s5154_s3 + $0x58] sm:$0xff] }
  0xac   :  { %319 = vadd.xlane.f32.xlu0 %v318_v3  ;;  %v465_v3 = vsel %vm440_vm3, %v416_v61, 0.0 }
  0xad   :  { %3678 = vmatpush3.bf16.msra.mxu1 %v3848_v2 }
  0xae   :  { %3679 = vmatprep.subr.bf16.mxu1 %v4330_v13 }
  0xaf   :  { %334 = vadd.xlane.f32.xlu1 %v333_v5  ;;  %v420_v5 = vld [vmem:[%s5154_s3 + $0x60] sm:$0xff] }
  0xb0   :  { %331 = vadd.xlane.f32.xlu0 %v330_v7  ;;  %v422_v7 = vld [vmem:[%s5154_s3 + $0x70] sm:$0xff]  ;;  %v477_v16 = vsel %vm440_vm3, %v420_v5, 0.0 }
  0xb1   :  { %v483_v18 = vsel %vm440_vm3, %v422_v7, 0.0 }
  0xb3   :  { %340 = vadd.xlane.f32.xlu1 %v339_v9  ;;  %v474_v9 = vsel %vm440_vm3, %v419_v1, 0.0 }
  0xb4   :  { %337 = vadd.xlane.f32.xlu0 %v336_v11  ;;  %v427_v11 = vld [vmem:[%s5154_s3 + $0x98] sm:$0xff] }
  0xb7   :  { %346 = vadd.xlane.f32.xlu1 %v345_v15  ;;  %v3850_v15 = vld [vmem:[%s5159_s8 + $0x68] sm:$0xff]  }
  0xb8   :  { %343 = vadd.xlane.f32.xlu0 %v342_v17  ;;  %v486_v17 = vsel %vm440_vm3, %v423_v6, 0.0  ;;  %3680 = vmatpush3.bf16.msra.mxu1 %v3850_v15 }
  0xb9   :  { %3681 = vmatprep.subr.bf16.mxu1 %v4330_v13 }
  0xbb   :  { %352 = vadd.xlane.f32.xlu1 %v351_v23  ;;  %v3854_v23 = vld [vmem:[%s5159_s8 + $0x58] sm:$0xff]  }
  0xbc   :  { %349 = vadd.xlane.f32.xlu0 %v348_v22  ;;  %v498_v22 = vsel %vm440_vm3, %v427_v11, 0.0  ;;  %3682 = vmatpush3.bf16.msra.mxu1 %v3852_v20 }
  0xbd   :  { %3683 = vmatprep.subr.bf16.mxu1 %v4330_v13 }
  0xbf   :  { %358 = vadd.xlane.f32.xlu1 %v357_v25  ;;  %v426_v25 = vld [vmem:[%s5154_s3 + $0x90] sm:$0xff] }
  0xc0   :  { %355 = vadd.xlane.f32.xlu0 %v354_v24  ;;  %v3855_v24 = vld [vmem:[%s5159_s8 + $0x50] sm:$0xff]   ;;  %3684 = vmatpush3.bf16.msra.mxu1 %v3854_v23  ;;  %v495_v28 = vsel %vm440_vm3, %v426_v25, 0.0 }
  0xc1   :  { %3685 = vmatprep.subr.bf16.mxu1 %v4330_v13 }
  0xc3   :  { %364 = vadd.xlane.f32.xlu1 %v363_v26  ;;  %v429_v26 = vld [vmem:[%s5154_s3 + $0xa8] sm:$0xff] }
  0xc4   :  { %361 = vadd.xlane.f32.xlu0 %v360_v30  ;;  %3686 = vmatpush3.bf16.msra.mxu1 %v3855_v24  ;;  %v504_v30 = vsel %vm440_vm3, %v429_v26, 0.0 }
  0xc5   :  { %3687 = vmatprep.subr.bf16.mxu1 %v4330_v13 }
  0xc7   :  { %370 = vadd.xlane.f32.xlu1 %v369_v32  ;;  %v501_v32 = vsel %vm440_vm3, %v428_v29, 0.0 }
  0xc8   :  { %367 = vadd.xlane.f32.xlu0 %v366_v34  ;;  %3688 = vmatpush3.bf16.msra.mxu1 %v3856_v27  ;;  %v510_v34 = vsel %vm440_vm3, %v431_v31, 0.0 }
  0xc9   :  { %3689 = vmatprep.subr.bf16.mxu1 %v4330_v13 }
  0xcb   :  { %376 = vadd.xlane.f32.xlu1 %v375_v36 }
  0xcc   :  { %373 = vadd.xlane.f32.xlu0 %v372_v38 }
  0xcf   :  { %382 = vadd.xlane.f32.xlu1 %v381_v39 }
  0xd0   :  { %379 = vadd.xlane.f32.xlu0 %v378_v40  ;;  %v696_v40 = vlaneseq }
  0xd2   :  { %v4730_v50 = vshrl.u32 %v696_v40, 7 }
  0xd3   :  { %445 = vadd.xlane.f32.xlu1 %v444_v43 }
  0xd4   :  { %442 = vadd.xlane.f32.xlu0 %v441_v44  ;;  %v4728_v44 = vand.u32 127, %v696_v40 }
  0xd6   :  { %v745_v52 = vadd.s32 4294967288, %v4728_v44  ;;  %v4735_v61 = vsub.s32 %v4728_v44, %v4730_v50 }
  0xd7   :  { %457 = vadd.xlane.f32.xlu1 %v456_v48 }
  0xd8   :  { %454 = vadd.xlane.f32.xlu0 %v453_v49  ;;  %v4738_v2 = vsub.s32 %v745_v52, %v4730_v50 }
  0xdb   :  { %451 = vadd.xlane.f32.xlu1 %v450_v51 }
  0xdc   :  { %448 = vadd.xlane.f32.xlu0 %v447_v54 }
  0xdf   :  { %463 = vadd.xlane.f32.xlu1 %v462_v57 }
  0xe0   :  { %460 = vadd.xlane.f32.xlu0 %v459_v59 }
  0xe3   :  { %469 = vadd.xlane.f32.xlu1 %v468_v62 }
  0xe4   :  { %466 = vadd.xlane.f32.xlu0 %v465_v3 }
  0xe7   :  { %475 = vadd.xlane.f32.xlu1 %v474_v9 }
  0xe8   :  { %472 = vadd.xlane.f32.xlu0 %v471_v12 }
  0xeb   :  { %481 = vadd.xlane.f32.xlu1 %v480_v14 }
  0xec   :  { %478 = vadd.xlane.f32.xlu0 %v477_v16 }
  0xef   :  { %487 = vadd.xlane.f32.xlu1 %v486_v17 }
  0xf0   :  { %484 = vadd.xlane.f32.xlu0 %v483_v18 }
  0xf3   :  { %493 = vadd.xlane.f32.xlu1 %v492_v19 }
  0xf4   :  { %490 = vadd.xlane.f32.xlu0 %v489_v21 }
  0xf7   :  { %499 = vadd.xlane.f32.xlu1 %v498_v22 }
  0xf8   :  { %496 = vadd.xlane.f32.xlu0 %v495_v28 }
  0xfb   :  { %505 = vadd.xlane.f32.xlu1 %v504_v30 }
  0xfc   :  { %502 = vadd.xlane.f32.xlu0 %v501_v32 }
  0xff   :  { %511 = vadd.xlane.f32.xlu1 %v510_v34 }
 0x100   :  { %508 = vadd.xlane.f32.xlu0 %v507_v35 }
 0x10c   :  { %v231_v36 = vpop.xlane.xlu1 %230 }
 0x10d   :  { %v225_v37 = vpop.xlane.xlu0 %224  ;;  %v273_v46 = vmul.f32 0.00390625, %v231_v36 }
 0x10e   :  { %v271_v48 = vmul.f32 0.00390625, %v225_v37 }
 0x110   :  { %v234_v38 = vpop.xlane.xlu1 %233 }
 0x111   :  { %v228_v39 = vpop.xlane.xlu0 %227  ;;  %v274_v43 = vmul.f32 0.00390625, %v234_v38 }
 0x112   :  { %v272_v45 = vmul.f32 0.00390625, %v228_v39 }
 0x113   :  { %v702_v51 = vpack.c.bf16 %v274_v43, %v273_v46 }
 0x114   :  { %v240_v41 = vpop.xlane.xlu1 %239  ;;  %v701_v53 = vpack.c.bf16 %v272_v45, %v271_v48 }
 0x115   :  { %v237_v42 = vpop.xlane.xlu0 %236  ;;  %v276_v54 = vmul.f32 0.00390625, %v240_v41  ;;  %v725_v62 = vunpack.c.l.b16 %v702_v51  ;;  %v726_v3 = vunpack.c.h.b16 %v702_v51 }
 0x116   :  { %v275_v55 = vmul.f32 0.00390625, %v237_v42  ;;  %v723_v4 = vunpack.c.l.b16 %v701_v53  ;;  %v724_v5 = vunpack.c.h.b16 %v701_v53 }
 0x117   :  { %v755_v11 = vrot.slane %v725_v62, %v4735_v61  ;;  %v759_v14 = vrot.slane %v726_v3, %v4738_v2 }
 0x118   :  { %v246_v47 = vpop.xlane.xlu1 %245  ;;  %v703_v63 = vpack.c.bf16 %v276_v54, %v275_v55  ;;  %v744_v15 = vrot.slane %v723_v4, %v4735_v61  ;;  %v749_v18 = vrot.slane %v724_v5, %v4738_v2 }
 0x119   :  { %v243_v49 = vpop.xlane.xlu0 %242  ;;  %v278_v56 = vmul.f32 0.00390625, %v246_v47  ;;  %v760_v30 = vsel %vm750_vm4, %v759_v14, %v755_v11  ;;  %v3844_v11 = vld [vmem:[%s5159_s8 + $0x28] sm:$0xff]   ;;  %v3847_v14 = vld [vmem:[%s5159_s8 + $0x18] sm:$0xff]  }
 0x11a   :  { %v277_v57 = vmul.f32 0.00390625, %v243_v49  ;;  %v727_v16 = vunpack.c.l.b16 %v703_v63  ;;  %v728_v17 = vunpack.c.h.b16 %v703_v63  ;;  %v751_v33 = vsel %vm750_vm4, %v749_v18, %v744_v15  ;;  %v3849_v15 = vld [vmem:[%s5159_s8 + $0x10] sm:$0xff]  }
 0x11b   :  { %v816_v54 = vsel %vm815_vm5, %v760_v30, %v751_v33  ;;  %v4807_v18 = vsub.s32 0, %v4730_v50  ;;  %v434_v33 = vld [vmem:[%s5154_s3 + $0xd0] sm:$0xff] }
 0x11c   :  { %v252_v58 = vpop.xlane.xlu1 %251  ;;  %v704_v6 = vpack.c.bf16 %v278_v56, %v277_v57  ;;  %v764_v31 = vrot.slane %v727_v16, %v4735_v61  ;;  %v768_v32 = vrot.slane %v728_v17, %v4738_v2  ;;  %v3851_v16 = vld [vmem:[%s5159_s8 + $0x8] sm:$0xff]   ;;  %v3853_v17 = vld [vmem:[%s5159_s8] sm:$0xff]  }
 0x11d   :  { %v280_v59 = vmul.f32 0.00390625, %v252_v58  ;;  %v249_v60 = vpop.xlane.xlu0 %248 }
 0x11e   :  { %v279_v1 = vmul.f32 0.00390625, %v249_v60  ;;  %v729_v19 = vunpack.c.l.b16 %v704_v6  ;;  %v730_v20 = vunpack.c.h.b16 %v704_v6  ;;  %v769_v48 = vsel %vm750_vm4, %v768_v32, %v764_v31  ;;  %v435_v32 = vld [vmem:[%s5154_s3 + $0xd8] sm:$0xff] }
 0x11f   :  { %v818_v56 = vsel %vm817_vm6, %v769_v48, %v816_v54 }
 0x120   :  { %v258_v7 = vpop.xlane.xlu1 %257  ;;  %v705_v8 = vpack.c.bf16 %v280_v59, %v279_v1  ;;  %v773_v34 = vrot.slane %v729_v19, %v4735_v61  ;;  %v777_v35 = vrot.slane %v730_v20, %v4738_v2  ;;  %v4812_v19 = vld [vmem:[%s5162_s11] sm:$0xff] }
 0x121   :  { %v282_v9 = vmul.f32 0.00390625, %v258_v7  ;;  %v255_v10 = vpop.xlane.xlu0 %254  ;;  %v699_v20 = vrot.slane %v4812_v19, %v4807_v18 }
 0x122   :  { %v281_v12 = vmul.f32 0.00390625, %v255_v10  ;;  %v731_v23 = vunpack.c.l.b16 %v705_v8  ;;  %v732_v24 = vunpack.c.h.b16 %v705_v8  ;;  %v778_v49 = vsel %vm750_vm4, %v777_v35, %v773_v34  ;;  %v3841_v8 = vld [vmem:[%s5159_s8 + $0x38] sm:$0xff]   ;;  %v3843_v10 = vld [vmem:[%s5159_s8 + $0x30] sm:$0xff]  }
 0x123   :  { %v820_v60 = vsel %vm819_vm7, %v778_v49, %v818_v56  ;;  %v522_v34 = vsel %vm440_vm3, %v435_v32, 0.0  ;;  %v519_v35 = vsel %vm440_vm3, %v434_v33, 0.0  ;;  %v3870_v56 = vld [vmem:[#allocation13 + $0x68] sm:$0xff]  }
 0x124   :  { %v706_v21 = vpack.c.bf16 %v282_v9, %v281_v12  ;;  %v264_v22 = vpop.xlane.xlu1 %263  ;;  %v782_v38 = vrot.slane %v731_v23, %v4735_v61  ;;  %v786_v39 = vrot.slane %v732_v24, %v4738_v2  ;;  %v3845_v12 = vld [vmem:[%s5159_s8 + $0x20] sm:$0xff]  }
 0x125   :  { %v284_v25 = vmul.f32 0.00390625, %v264_v22  ;;  %v261_v26 = vpop.xlane.xlu0 %260 }
 0x126   :  { %v733_v27 = vunpack.c.l.b16 %v706_v21  ;;  %v734_v28 = vunpack.c.h.b16 %v706_v21  ;;  %v283_v29 = vmul.f32 0.00390625, %v261_v26  ;;  %v787_v55 = vsel %vm750_vm4, %v786_v39, %v782_v38 }
 0x127   :  { %v822_v1 = vsel %vm821_vm8, %v787_v55, %v820_v60 }
 0x128   :  { %v707_v36 = vpack.c.bf16 %v284_v25, %v283_v29  ;;  %v270_v37 = vpop.xlane.xlu1 %269  ;;  %v791_v40 = vrot.slane %v733_v27, %v4735_v61  ;;  %v795_v43 = vrot.slane %v734_v28, %v4738_v2  ;;  %v3857_v27 = vld [vmem:[%s5159_s8 + $0x40] sm:$0xff]   ;;  %v433_v28 = vld [vmem:[%s5154_s3 + $0xc8] sm:$0xff] }
 0x129   :  { %v286_v41 = vmul.f32 0.00390625, %v270_v37  ;;  %v267_v42 = vpop.xlane.xlu0 %266  ;;  %v432_v29 = vld [vmem:[%s5154_s3 + $0xc0] sm:$0xff]  ;;  %3690 = vmatpush3.bf16.msra.mxu1 %v3857_v27  ;;  %v516_v30 = vsel %vm440_vm3, %v433_v28, 0.0 }
 0x12a   :  { %v735_v45 = vunpack.c.l.b16 %v707_v36  ;;  %v736_v46 = vunpack.c.h.b16 %v707_v36  ;;  %v285_v47 = vmul.f32 0.00390625, %v267_v42  ;;  %v796_v57 = vsel %vm750_vm4, %v795_v43, %v791_v40  ;;  %517 = vadd.xlane.f32.xlu1 %v516_v30  ;;  %3715 = vmatprep.subr.bf16.mxu1 %v4330_v13  ;;  %v437_v36 = vld [vmem:[%s5154_s3 + $0xe8] sm:$0xff]  ;;  %v436_v37 = vld [vmem:[%s5154_s3 + $0xe0] sm:$0xff]  ;;  %v439_v40 = vld [vmem:[%s5154_s3 + $0xf8] sm:$0xff] }
 0x12b   :  { %v824_v63 = vsel %vm823_vm9, %v796_v57, %v822_v1  ;;  %v513_v31 = vsel %vm440_vm3, %v432_v29, 0.0  ;;  %v528_v38 = vsel %vm440_vm3, %v437_v36, 0.0  ;;  %v525_v39 = vsel %vm440_vm3, %v436_v37, 0.0 }
 0x12c   :  { %v800_v51 = vrot.slane %v735_v45, %v4735_v61  ;;  %v804_v52 = vrot.slane %v736_v46, %v4738_v2  ;;  %v708_v53 = vpack.c.bf16 %v286_v41, %v285_v47  ;;  %514 = vadd.xlane.f32.xlu0 %v513_v31  ;;  %v438_v41 = vld [vmem:[%s5154_s3 + $0xf0] sm:$0xff]  ;;  %v534_v42 = vsel %vm440_vm3, %v439_v40, 0.0  ;;  %v317_v48 = vpop.xlane.xlu1 %316 }
 0x12d   :  { %v531_v43 = vsel %vm440_vm3, %v438_v41, 0.0  ;;  %v314_v45 = vpop.xlane.xlu0 %313  ;;  %v3868_v46 = vld [vmem:[#allocation13 + $0x78] sm:$0xff]   ;;  %v3869_v47 = vld [vmem:[#allocation13 + $0x70] sm:$0xff]  }
 0x12e   :  { %v737_v58 = vunpack.c.l.b16 %v708_v53  ;;  %v738_v59 = vunpack.c.h.b16 %v708_v53  ;;  %v805_v62 = vsel %vm750_vm4, %v804_v52, %v800_v51  ;;  %523 = vadd.xlane.f32.xlu1 %v522_v34 }
 0x12f   :  { %v826_v5 = vsel %vm825_vm10, %v805_v62, %v824_v63  ;;  %v3872_v62 = vld [vmem:[#allocation13 + $0x58] sm:$0xff]  }
 0x130   :  { %v809_v3 = vrot.slane %v737_v58, %v4735_v61  ;;  %v813_v4 = vrot.slane %v738_v59, %v4738_v2  ;;  %520 = vadd.xlane.f32.xlu0 %v519_v35  ;;  %v326_v52 = vpop.xlane.xlu1 %325  ;;  %v3871_v59 = vld [vmem:[#allocation13 + $0x60] sm:$0xff]  }
 0x131   :  { %v323_v49 = vpop.xlane.xlu0 %322 }
 0x132   :  { %v814_v6 = vsel %vm750_vm4, %v813_v4, %v809_v3  ;;  %529 = vadd.xlane.f32.xlu1 %v528_v38 }
 0x133   :  { %v828_v7 = vsel %vm827_vm11, %v814_v6, %v826_v5 }
 0x134   :  { %v829_v9 = vpack.c.b16 %v828_v7, %v828_v7  ;;  %526 = vadd.xlane.f32.xlu0 %v525_v39  ;;  %v329_v58 = vpop.xlane.xlu1 %328 }
 0x135   :  { %v320_v55 = vpop.xlane.xlu0 %319 }
 0x136   :  { %3672 = vmatmul.mubr.msk.bf16.vlgmr.msra.gmra.mxu0 %vm440_vm3, %v829_v9  ;;  %535 = vadd.xlane.f32.xlu1 %v534_v42 }
 0x137   :  { %3696 = vmatpush3.bf16.msra.mxu0 %v3841_v8  ;;  %3711 = vmatprep.mubr.msk.bf16.mxu0 %vm4331_vm2, %v4330_v13 }
 0x138   :  { %3697 = vmatprep.subr.bf16.mxu0 %v4330_v13  ;;  %532 = vadd.xlane.f32.xlu0 %v531_v43  ;;  %v335_v1 = vpop.xlane.xlu1 %334 }
 0x139   :  { %v332_v60 = vpop.xlane.xlu0 %331  ;;  %v391_v27 = vmul.f32 0.015625, %v335_v1 }
 0x13b   :  { %3698 = vmatpush3.bf16.msra.mxu0 %v3843_v10  ;;  %v387_v10 = vmul.f32 0.015625, %v323_v49 }
 0x13c   :  { %3699 = vmatprep.subr.bf16.mxu0 %v4330_v13  ;;  %v341_v4 = vpop.xlane.xlu1 %340 }
 0x13d   :  { %v338_v3 = vpop.xlane.xlu0 %337  ;;  %v393_v35 = vmul.f32 0.015625, %v341_v4 }
 0x13e   :  { %v392_v34 = vmul.f32 0.015625, %v338_v3 }
 0x13f   :  { %3700 = vmatpush3.bf16.msra.mxu0 %v3844_v11  ;;  %v388_v11 = vmul.f32 0.015625, %v326_v52 }
 0x140   :  { %3701 = vmatprep.subr.bf16.mxu0 %v4330_v13  ;;  %v347_v5 = vpop.xlane.xlu1 %346 }
 0x141   :  { %v344_v63 = vpop.xlane.xlu0 %343  ;;  %v395_v49 = vmul.f32 0.015625, %v347_v5 }
 0x142   :  { %v394_v36 = vmul.f32 0.015625, %v344_v63 }
 0x143   :  { %3702 = vmatpush3.bf16.msra.mxu0 %v3845_v12  ;;  %v384_v12 = vmul.f32 0.015625, %v314_v45 }
 0x144   :  { %3703 = vmatprep.subr.bf16.mxu0 %v4330_v13  ;;  %v353_v7 = vpop.xlane.xlu1 %352 }
 0x145   :  { %v350_v6 = vpop.xlane.xlu0 %349 }
 0x146   :  { %v396_v52 = vmul.f32 0.015625, %v350_v6  ;;  %v1129_v6 = vpack.c.bf16 %v395_v49, %v395_v49 }
 0x147   :  { %3704 = vmatpush3.bf16.msra.mxu0 %v3847_v14  ;;  %v385_v14 = vmul.f32 0.015625, %v317_v48  ;;  %v1128_v48 = vpack.c.bf16 %v394_v36, %v393_v35 }
 0x148   :  { %3705 = vmatprep.subr.bf16.mxu0 %v4330_v13  ;;  %v359_v9 = vpop.xlane.xlu1 %358 }
 0x149   :  { %v356_v8 = vpop.xlane.xlu0 %355  ;;  %v399_v1 = vmul.f32 0.015625, %v359_v9  ;;  %v1170_v5 = vunpack.c.l.b16 %v1128_v48 }
 0x14b   :  { %3706 = vmatpush3.bf16.msra.mxu0 %v3849_v15 }
 0x14c   :  { %3707 = vmatprep.subr.bf16.mxu0 %v4330_v13 }
 0x14d   :  { %v362_v15 = vpop.xlane.xlu0 %361 }
 0x14e   :  { %v400_v3 = vmul.f32 0.015625, %v362_v15 }
 0x14f   :  { %3708 = vmatpush3.bf16.msra.mxu0 %v3851_v16  ;;  %v389_v16 = vmul.f32 0.015625, %v329_v58 }
 0x150   :  { %3709 = vmatprep.subr.bf16.mxu0 %v4330_v13 }
 0x151   :  { %v368_v31 = vpop.xlane.xlu0 %367 }
 0x153   :  { %3710 = vmatpush3.bf16.msra.mxu0 %v3853_v17  ;;  %v1124_v17 = vpack.c.bf16 %v388_v11, %v387_v10 }
 0x154   :  { %3723 = vmatprep.subr.bf16.mxu0 %v4330_v13 }
 0x155   :  { %v649_v21 = vpop.f32.mrf.mxu0  ;;  %v1164_v28 = vunpack.c.l.b16 %v1124_v17  ;;  %v1165_v29 = vunpack.c.h.b16 %v1124_v17  ;;  %v402_v17 = vmul.f32 0.015625, %v368_v31 }
 0x156   :  { %v700_v22 = vadd.f32 %v699_v20, %v649_v21  ;;  %v386_v20 = vmul.f32 0.015625, %v320_v55  ;;  %v1122_v21 = vpack.c.bf16 %v385_v14, %v384_v12  ;;  %v1171_v12 = vunpack.c.h.b16 %v1128_v48 }
 0x157   :  { %v4816_v23 = vpop.f32.mrf.mxu0  ;;  %v1204_v41 = vrot.slane %v1164_v28, %v4735_v61  ;;  %v1208_v42 = vrot.slane %v1165_v29, %v4738_v2 }
 0x158   :  { %v911_v24 = vpack.c.bf16 %v700_v22, %v700_v22  ;;  %v365_v22 = vpop.xlane.xlu1 %364  ;;  %v1123_v30 = vpack.c.bf16 %v386_v20, %v386_v20  ;;  %v1161_v32 = vunpack.c.l.b16 %v1122_v21  ;;  %v1162_v33 = vunpack.c.h.b16 %v1122_v21 }
 0x159   :  { %v653_v25 = vpop.f32.mrf.mxu0  ;;  %v1209_v58 = vsel %vm750_vm4, %v1208_v42, %v1204_v41  ;;  %v1236_v29 = vrot.slane %v1171_v12, %v4738_v2 }
 0x15a   :  { %3712 = vmatmul.mubr.bf16.vlgmr.msra.gmra.mxu0 %v911_v24  ;;  %v1194_v24 = vadd.s32 4294967280, %v4728_v44  ;;  %v1125_v25 = vpack.c.bf16 %v389_v16, %v389_v16  ;;  %v1163_v43 = vunpack.c.l.b16 %v1123_v30  ;;  %v1188_v45 = vrot.slane %v1161_v32, %v4735_v61 }
 0x15b   :  { %v654_v26 = vpop.f32.mrf.mxu0  ;;  %3739 = vmatprep.mubr.msk.bf16.mxu0 %vm4331_vm2, %v4330_v13  ;;  %3724 = vmatpush3.bf16.msra.mxu0 %v3868_v46  ;;  %v1192_v46 = vrot.slane %v1162_v33, %v4738_v2  ;;  %v401_v16 = vmul.f32 0.015625, %v365_v22 }
 0x15c   :  { %3725 = vmatprep.subr.bf16.mxu0 %v4330_v13  ;;  %v390_v26 = vmul.f32 0.015625, %v332_v60  ;;  %v4865_v37 = vsub.s32 %v1194_v24, %v4730_v50  ;;  %v1166_v38 = vunpack.c.l.b16 %v1125_v25  ;;  %v371_v40 = vpop.xlane.xlu1 %370  ;;  %v1132_v24 = vpack.c.bf16 %v400_v3, %v399_v1 }
 0x15d   :  { %v1193_v63 = vsel %vm750_vm4, %v1192_v46, %v1188_v45  ;;  %v403_v20 = vmul.f32 0.015625, %v371_v40  ;;  %v1232_v25 = vrot.slane %v1170_v5, %v4735_v61 }
 0x15e   :  { %v1126_v39 = vpack.c.bf16 %v391_v27, %v390_v26  ;;  %v1213_v55 = vrot.slane %v1166_v38, %v4865_v37  ;;  %v1172_v26 = vunpack.c.l.b16 %v1129_v6  ;;  %v1177_v40 = vunpack.c.h.b16 %v1132_v24 }
 0x15f   :  { %3726 = vmatpush3.bf16.msra.mxu0 %v3869_v47  ;;  %v1127_v47 = vpack.c.bf16 %v392_v34, %v392_v34  ;;  %v1133_v34 = vpack.c.bf16 %v401_v16, %v401_v16  ;;  %v1134_v35 = vpack.c.bf16 %v403_v20, %v402_v17 }
 0x160   :  { %3727 = vmatprep.subr.bf16.mxu0 %v4330_v13  ;;  %v377_v4 = vpop.xlane.xlu1 %376  ;;  %v1214_v10 = vsel %vm1199_vm12, %v1213_v55, %v1209_v58  ;;  %v1241_v41 = vrot.slane %v1172_v26, %v4865_v37  ;;  %v4893_v58 = vsub.s32 1, %v4730_v50 }
 0x161   :  { %v1169_v60 = vunpack.c.l.b16 %v1127_v47  ;;  %v405_v32 = vmul.f32 0.015625, %v377_v4  ;;  %v1237_v47 = vsel %vm750_vm4, %v1236_v29, %v1232_v25 }
 0x162   :  { %v714_v16 = vrot.slane %v4812_v19, %v4893_v58 }
 0x163   :  { %3728 = vmatpush3.bf16.msra.mxu0 %v3870_v56  ;;  %v1167_v56 = vunpack.c.l.b16 %v1126_v39  ;;  %v1227_v9 = vrot.slane %v1169_v60, %v4865_v37  ;;  %v1242_v60 = vsel %vm1199_vm12, %v1241_v41, %v1237_v47  ;;  %v3865_v47 = vld [vmem:[#allocation13 + $0x10] sm:$0xff]  }
 0x164   :  { %3729 = vmatprep.subr.bf16.mxu0 %v4330_v13  ;;  %v383_v22 = vpop.xlane.xlu1 %382 }
 0x165   :  { %v1218_v11 = vrot.slane %v1167_v56, %v4735_v61  ;;  %v407_v45 = vmul.f32 0.015625, %v383_v22 }
 0x167   :  { %3730 = vmatpush3.bf16.msra.mxu0 %v3871_v59  ;;  %v1168_v59 = vunpack.c.h.b16 %v1126_v39  ;;  %v1176_v39 = vunpack.c.l.b16 %v1132_v24  ;;  %v1137_v1 = vpack.c.bf16 %v407_v45, %v407_v45  ;;  %v3858_v24 = vld [vmem:[#allocation10 + $0x8] ss:$0 sps:$4 sm:$0xff]   ;;  %v3863_v45 = vld [vmem:[#allocation13 + $0x20] sm:$0xff]  }
 0x168   :  { %v4857_v51 = vpop.f32.mrf.mxu1  ;;  %3731 = vmatprep.subr.bf16.mxu0 %v4330_v13  ;;  %v1322_v22 = vsel %vm1320_vm13, %v3858_v24, 0 }
 0x169   :  { %v1222_v14 = vrot.slane %v1168_v59, %v4738_v2  ;;  %v1260_v56 = vrot.slane %v1176_v39, %v4735_v61 }
 0x16a   :  { %v3667_v53 = vpop.f32.mrf.mxu1 }
 0x16b   :  { %3732 = vmatpush3.bf16.msra.mxu0 %v3872_v62  ;;  %v397_v53 = vmul.f32 0.015625, %v353_v7  ;;  %v398_v62 = vmul.f32 0.015625, %v356_v8  ;;  %v1223_v31 = vsel %vm750_vm4, %v1222_v14, %v1218_v11  ;;  %v1184_v14 = vunpack.c.l.b16 %v1137_v1  ;;  %v3875_v1 = vld [vmem:[#allocation13 + $0x40] sm:$0xff]  }
 0x16c   :  { %v693_v54 = vpop.f32.mrf.mxu1  ;;  %3733 = vmatprep.subr.bf16.mxu0 %v4330_v13  ;;  %v1228_v46 = vsel %vm1199_vm12, %v1227_v9, %v1223_v31 }
 0x16d   :  { %v374_v54 = vpop.xlane.xlu0 %373  ;;  %v1130_v7 = vpack.c.bf16 %v397_v53, %v396_v52  ;;  %v1131_v15 = vpack.c.bf16 %v398_v62, %v398_v62  ;;  %v1178_v52 = vunpack.c.l.b16 %v1133_v34  ;;  %v1179_v53 = vunpack.c.l.b16 %v1134_v35 }
 0x16e   :  { %v3668_v57 = vpop.f32.mrf.mxu1  ;;  %v404_v30 = vmul.f32 0.015625, %v374_v54  ;;  %v1180_v54 = vunpack.c.h.b16 %v1134_v35  ;;  %v1297_v26 = vrot.slane %v1184_v14, %v4865_v37 }
 0x16f   :  { %v1198_v57 = vrot.slane %v1163_v43, %v4865_v37  ;;  %v1173_v27 = vunpack.c.l.b16 %v1130_v7  ;;  %v1174_v28 = vunpack.c.h.b16 %v1130_v7  ;;  %v1175_v38 = vunpack.c.l.b16 %v1131_v15 }
 0x170   :  { %v1135_v48 = vpack.c.bf16 %v404_v30, %v404_v30  ;;  %v1269_v5 = vrot.slane %v1178_v52, %v4865_v37  ;;  %v1274_v6 = vrot.slane %v1179_v53, %v4735_v61  ;;  %v1278_v7 = vrot.slane %v1180_v54, %v4738_v2  ;;  %v3867_v53 = vld [vmem:[#allocation13] sm:$0xff]  }
 0x171   :  { %v380_v21 = vpop.xlane.xlu0 %379  ;;  %v1200_v8 = vsel %vm1199_vm12, %v1198_v57, %v1193_v63  ;;  %v1246_v42 = vrot.slane %v1173_v27, %v4735_v61  ;;  %v1250_v43 = vrot.slane %v1174_v28, %v4738_v2  ;;  %v1255_v55 = vrot.slane %v1175_v38, %v4865_v37  ;;  %v3859_v38 = vld [vmem:[#allocation10] sm:$0xff]  }
 0x172   :  { %v406_v33 = vmul.f32 0.015625, %v380_v21  ;;  %v1299_v36 = vsel %vm815_vm5, %v1214_v10, %v1200_v8  ;;  %v1264_v57 = vrot.slane %v1177_v40, %v4738_v2  ;;  %v1181_v3 = vunpack.c.l.b16 %v1135_v48  ;;  %v3860_v40 = vld [vmem:[#allocation13 + $0x38] sm:$0xff]  }
 0x173   :  { %v1300_v59 = vsel %vm817_vm6, %v1228_v46, %v1299_v36  ;;  %v1251_v62 = vsel %vm750_vm4, %v1250_v43, %v1246_v42  ;;  %v1279_v15 = vsel %vm750_vm4, %v1278_v7, %v1274_v6  ;;  %v3861_v42 = vld [vmem:[#allocation13 + $0x30] sm:$0xff]   ;;  %v3862_v43 = vld [vmem:[#allocation13 + $0x28] sm:$0xff]   ;;  %v3864_v46 = vld [vmem:[#allocation13 + $0x18] sm:$0xff]   ;;  %v1119_v48 = vsub.s32 5, %v4730_v50 }
 0x174   :  { %v1136_v49 = vpack.c.bf16 %v406_v33, %v405_v32  ;;  %v1301_v10 = vsel %vm819_vm7, %v1242_v60, %v1300_v59  ;;  %v1256_v11 = vsel %vm1199_vm12, %v1255_v55, %v1251_v62  ;;  %v1265_v12 = vsel %vm750_vm4, %v1264_v57, %v1260_v56  ;;  %v3873_v62 = vld [vmem:[#allocation13 + $0x50] sm:$0xff]  }
 0x175   :  { %v1283_v17 = vrot.slane %v1181_v3, %v4865_v37  ;;  %v1302_v8 = vsel %vm821_vm8, %v1256_v11, %v1301_v10  ;;  %v1270_v9 = vsel %vm1199_vm12, %v1269_v5, %v1265_v12  ;;  %v1120_v52 = vrot.slane %v4812_v19, %v1119_v48  ;;  %3734 = vmatpush3.bf16.msra.mxu0 %v3873_v62  ;;  %v446_v3 = vpop.xlane.xlu1 %445 }
 0x176   :  { %v1182_v4 = vunpack.c.l.b16 %v1136_v49  ;;  %v1183_v63 = vunpack.c.h.b16 %v1136_v49  ;;  %v1303_v28 = vsel %vm823_vm9, %v1270_v9, %v1302_v8  ;;  %v3866_v49 = vld [vmem:[#allocation13 + $0x8] sm:$0xff]   ;;  %3735 = vmatprep.subr.bf16.mxu0 %v4330_v13 }
 0x177   :  { %v1284_v29 = vsel %vm1199_vm12, %v1283_v17, %v1279_v15  ;;  %v1121_v54 = vadd.f32 %v1120_v52, %v4816_v23  ;;  %v3874_v23 = vld [vmem:[#allocation13 + $0x48] sm:$0xff]  }
 0x178   :  { %v1288_v20 = vrot.slane %v1182_v4, %v4735_v61  ;;  %v1292_v21 = vrot.slane %v1183_v63, %v4738_v2  ;;  %v1304_v34 = vsel %vm825_vm10, %v1284_v29, %v1303_v28  ;;  %v443_v4 = vpop.xlane.xlu0 %442  ;;  %v538_v29 = vmul.f32 0.0625, %v446_v3 }
 0x179   :  { %v1396_v55 = vpack.c.bf16 %v1121_v54, %v1121_v54  ;;  %3736 = vmatpush3.bf16.msra.mxu0 %v3874_v23  ;;  %v458_v63 = vpop.xlane.xlu1 %457 }
 0x17a   :  { %v1293_v30 = vsel %vm750_vm4, %v1292_v21, %v1288_v20  ;;  %3737 = vmatprep.subr.bf16.mxu0 %v4330_v13 }
 0x17b   :  { %v1298_v35 = vsel %vm1199_vm12, %v1297_v26, %v1293_v30  ;;  %v537_v30 = vmul.f32 0.0625, %v443_v4 }
 0x17c   :  { %v1305_v39 = vsel %vm827_vm11, %v1298_v35, %v1304_v34  ;;  %v455_v5 = vpop.xlane.xlu0 %454 }
 0x17d   :  { %v1306_v41 = vpack.c.b16 %v1305_v39, %v1305_v39  ;;  %3738 = vmatpush3.bf16.msra.mxu0 %v3875_v1  ;;  %v452_v6 = vpop.xlane.xlu1 %451  ;;  %v1606_v34 = vpack.c.bf16 %v538_v29, %v537_v30 }
 0x17e   :  { %3763 = vmatprep.subr.bf16.mxu0 %v4330_v13 }
 0x180   :  { %v449_v7 = vpop.xlane.xlu0 %448 }
 0x181   :  { %v464_v10 = vpop.xlane.xlu1 %463 }
 0x182   :  { %v544_v39 = vmul.f32 0.0625, %v464_v10 }
 0x184   :  { %v461_v11 = vpop.xlane.xlu0 %460 }
 0x185   :  { %v470_v12 = vpop.xlane.xlu1 %469 }
 0x188   :  { %v467_v14 = vpop.xlane.xlu0 %466 }
 0x18c   :  { %v473_v17 = vpop.xlane.xlu0 %472 }
 0x18d   :  { %v547_v54 = vmul.f32 0.0625, %v473_v17 }
 0x190   :  { %v479_v21 = vpop.xlane.xlu0 %478 }
 0x191   :  { %v549_v4 = vmul.f32 0.0625, %v479_v21 }
 0x194   :  { %v485_v9 = vpop.xlane.xlu0 %484 }
 0x195   :  { %v551_v29 = vmul.f32 0.0625, %v485_v9 }
 0x198   :  { %v491_v24 = vpop.xlane.xlu0 %490 }
 0x19c   :  { %v4947_v26 = vpop.xlane.xlu0 %496 }
 0x1a0   :  { %v4951_v28 = vpop.xlane.xlu0 %502 }
 0x1f6   :  { %v873_v25 = vpop.f32.mrf.mxu0 }
 0x1f7   :  { %v874_v27 = vadd.f32 %v873_v25, %v714_v16  ;;  %v476_v16 = vpop.xlane.xlu1 %475 }
 0x1f8   :  { %v3673_v32 = vpop.f32.mrf.mxu0 }
 0x1f9   :  { %v912_v33 = vpack.c.bf16 %v874_v27, %v874_v27  ;;  %v542_v32 = vmul.f32 0.0625, %v458_v63 }
 0x1fa   :  { %v876_v31 = vpop.f32.mrf.mxu0 }
 0x1fb   :  { %3692 = vmatmul.mubr.bf16.vlgmr.msra.gmra.mxu1 %v912_v33  ;;  %v482_v20 = vpop.xlane.xlu1 %481  ;;  %v541_v33 = vmul.f32 0.0625, %v455_v5  ;;  %v539_v31 = vmul.f32 0.0625, %v449_v7 }
 0x1fc   :  { %3716 = vmatpush3.bf16.msra.mxu1 %v1322_v22  ;;  %v3674_v36 = vpop.f32.mrf.mxu0  ;;  %3719 = vmatprep.mubr.msk.bf16.mxu1 %vm4331_vm2, %v4330_v13  ;;  %v540_v22 = vmul.f32 0.0625, %v452_v6  ;;  %v550_v3 = vmul.f32 0.0625, %v482_v20 }
 0x1fd   :  { %3717 = vmatprep.subr.bf16.mxu1 %v4330_v13  ;;  %v4955_v36 = vpop.xlane.xlu0 %508 }
 0x1fe   :  { %v1612_v21 = vpack.c.bf16 %v550_v3, %v549_v4 }
 0x1ff   :  { %v488_v8 = vpop.xlane.xlu1 %487 }
 0x200   :  { %3718 = vmatpush3.bf16.msra.mxu1 %v3859_v38  ;;  %v1608_v38 = vpack.c.bf16 %v542_v32, %v541_v33  ;;  %v552_v17 = vmul.f32 0.0625, %v488_v8 }
 0x201   :  { %3743 = vmatprep.subr.bf16.mxu1 %v4330_v13  ;;  %v515_v62 = vpop.xlane.xlu0 %514 }
 0x202   :  { %v1613_v8 = vpack.c.bf16 %v552_v17, %v551_v29 }
 0x203   :  { %3720 = vmatmul.mubr.msk.bf16.vlgmr.msra.gmra.mxu1 %vm1316_vm14, %v1306_v41  ;;  %v494_v15 = vpop.xlane.xlu1 %493  ;;  %v1607_v41 = vpack.c.bf16 %v540_v22, %v539_v31 }
 0x204   :  { %3744 = vmatpush3.bf16.msra.mxu1 %v3860_v40  ;;  %3759 = vmatprep.mubr.msk.bf16.mxu1 %vm4331_vm2, %v4330_v13  ;;  %v543_v40 = vmul.f32 0.0625, %v461_v11  ;;  %v554_v9 = vmul.f32 0.0625, %v494_v15 }
 0x205   :  { %3745 = vmatprep.subr.bf16.mxu1 %v4330_v13  ;;  %v1649_v10 = vunpack.c.h.b16 %v1607_v41  ;;  %v521_v32 = vpop.xlane.xlu0 %520 }
 0x206   :  { %v1609_v52 = vpack.c.bf16 %v544_v39, %v543_v40 }
 0x207   :  { %v4945_v25 = vpop.xlane.xlu1 %499 }
 0x208   :  { %3746 = vmatpush3.bf16.msra.mxu1 %v3861_v42  ;;  %v546_v42 = vmul.f32 0.0625, %v470_v12  ;;  %v1653_v20 = vunpack.c.h.b16 %v1609_v52 }
 0x209   :  { %3747 = vmatprep.subr.bf16.mxu1 %v4330_v13  ;;  %v527_v15 = vpop.xlane.xlu0 %526 }
 0x20b   :  { %v4949_v27 = vpop.xlane.xlu1 %505 }
 0x20c   :  { %3748 = vmatpush3.bf16.msra.mxu1 %v3862_v43  ;;  %v545_v43 = vmul.f32 0.0625, %v467_v14 }
 0x20d   :  { %3749 = vmatprep.subr.bf16.mxu1 %v4330_v13 }
 0x20f   :  { %v4953_v35 = vpop.xlane.xlu1 %511 }
 0x210   :  { %3750 = vmatpush3.bf16.msra.mxu1 %v3863_v45  ;;  %v1646_v45 = vunpack.c.l.b16 %v1606_v34 }
 0x211   :  { %3751 = vmatprep.subr.bf16.mxu1 %v4330_v13 }
 0x212   :  { %v1681_v23 = vrot.slane %v1646_v45, %v4735_v61  ;;  %v1658_v45 = vunpack.c.l.b16 %v1612_v21 }
 0x214   :  { %3752 = vmatpush3.bf16.msra.mxu1 %v3864_v46  ;;  %v1647_v46 = vunpack.c.h.b16 %v1606_v34 }
 0x215   :  { %3753 = vmatprep.subr.bf16.mxu1 %v4330_v13 }
 0x216   :  { %v1685_v1 = vrot.slane %v1647_v46, %v4738_v2  ;;  %v1659_v46 = vunpack.c.h.b16 %v1612_v21 }
 0x218   :  { %3754 = vmatpush3.bf16.msra.mxu1 %v3865_v47  ;;  %v1692_v47 = vadd.s32 4294967272, %v4728_v44  ;;  %v1652_v44 = vunpack.c.l.b16 %v1609_v52  ;;  %v1686_v14 = vsel %vm750_vm4, %v1685_v1, %v1681_v23  ;;  %v556_v52 = vmul.f32 0.0625, %v4945_v25 }
 0x219   :  { %3755 = vmatprep.subr.bf16.mxu1 %v4330_v13  ;;  %v1660_v23 = vunpack.c.l.b16 %v1613_v8  ;;  %v1740_v25 = vrot.slane %v1658_v45, %v4735_v61  ;;  %v4998_v45 = vsub.s32 2, %v4730_v50 }
 0x21a   :  { %v4940_v56 = vpop.f32.mrf.mxu0  ;;  %v4962_v5 = vsub.s32 %v1692_v47, %v4730_v50  ;;  %v1711_v33 = vrot.slane %v1652_v44, %v4865_v37  ;;  %v561_v44 = vmul.f32 0.0625, %v515_v62 }
 0x21c   :  { %3756 = vmatpush3.bf16.msra.mxu1 %v3866_v49  ;;  %v3713_v57 = vpop.f32.mrf.mxu0  ;;  %v1650_v49 = vunpack.c.l.b16 %v1608_v38 }
 0x21d   :  { %3757 = vmatprep.subr.bf16.mxu1 %v4330_v13  ;;  %v1648_v57 = vunpack.c.l.b16 %v1607_v41  ;;  %v553_v41 = vmul.f32 0.0625, %v491_v24 }
 0x21e   :  { %v1086_v59 = vpop.f32.mrf.mxu0  ;;  %v1702_v63 = vrot.slane %v1650_v49, %v4735_v61 }
 0x21f   :  { %v1610_v59 = vpack.c.bf16 %v546_v42, %v545_v43  ;;  %v1690_v11 = vrot.slane %v1648_v57, %v4865_v37  ;;  %v1716_v42 = vrot.slane %v1653_v20, %v4962_v5  ;;  %v1614_v1 = vpack.c.bf16 %v554_v9, %v553_v41 }
 0x220   :  { %3758 = vmatpush3.bf16.msra.mxu1 %v3867_v53  ;;  %v3714_v60 = vpop.f32.mrf.mxu0  ;;  %v548_v53 = vmul.f32 0.0625, %v476_v16  ;;  %v563_v20 = vmul.f32 0.0625, %v521_v32 }
 0x221   :  { %3771 = vmatprep.subr.bf16.mxu1 %v4330_v13  ;;  %v518_v60 = vpop.xlane.xlu1 %517  ;;  %v1654_v12 = vunpack.c.l.b16 %v1610_v59  ;;  %v1655_v16 = vunpack.c.h.b16 %v1610_v59  ;;  %v1691_v34 = vsel %vm1199_vm12, %v1690_v11, %v1686_v14  ;;  %v1749_v14 = vrot.slane %v1660_v23, %v4865_v37 }
 0x222   :  { %v1611_v6 = vpack.c.bf16 %v548_v53, %v547_v54  ;;  %v555_v53 = vmul.f32 0.0625, %v4947_v26  ;;  %v558_v54 = vmul.f32 0.0625, %v4949_v27  ;;  %v1744_v26 = vrot.slane %v1659_v46, %v4738_v2 }
 0x223   :  { %3760 = vmatmul.mubr.bf16.vlgmr.msra.gmra.mxu1 %v1396_v55  ;;  %v1651_v55 = vunpack.c.h.b16 %v1608_v38  ;;  %v1696_v38 = vrot.slane %v1649_v10, %v4962_v5  ;;  %v1721_v39 = vrot.slane %v1654_v12, %v4735_v61  ;;  %v1725_v40 = vrot.slane %v1655_v16, %v4738_v2 }
 0x224   :  { %3787 = vmatprep.mubr.msk.bf16.mxu1 %vm4331_vm2, %v4330_v13  ;;  %v1656_v22 = vunpack.c.l.b16 %v1611_v6  ;;  %v1657_v43 = vunpack.c.h.b16 %v1611_v6  ;;  %v560_v27 = vmul.f32 0.0625, %v4953_v35  ;;  %v1615_v10 = vpack.c.bf16 %v556_v52, %v555_v53 }
 0x225   :  { %v1706_v7 = vrot.slane %v1651_v55, %v4738_v2  ;;  %v524_v30 = vpop.xlane.xlu1 %523  ;;  %v557_v55 = vmul.f32 0.0625, %v4951_v28  ;;  %v1698_v24 = vsel %vm1697_vm15, %v1696_v38, %v1691_v34  ;;  %v1726_v59 = vsel %vm750_vm4, %v1725_v40, %v1721_v39 }
 0x226   :  { %v1730_v49 = vrot.slane %v1656_v22, %v4865_v37  ;;  %v1735_v4 = vrot.slane %v1657_v43, %v4962_v5  ;;  %v559_v28 = vmul.f32 0.0625, %v4955_v36  ;;  %v1662_v16 = vunpack.c.l.b16 %v1614_v1  ;;  %v533_v22 = vpop.xlane.xlu0 %532 }
 0x227   :  { %v1707_v31 = vsel %vm750_vm4, %v1706_v7, %v1702_v63  ;;  %v562_v63 = vmul.f32 0.0625, %v518_v60  ;;  %v1661_v7 = vunpack.c.h.b16 %v1613_v8  ;;  %v1616_v11 = vpack.c.bf16 %v558_v54, %v557_v55 }
 0x228   :  { %v1712_v47 = vsel %vm1199_vm12, %v1711_v33, %v1707_v31  ;;  %v1731_v6 = vsel %vm1199_vm12, %v1730_v49, %v1726_v59  ;;  %v1663_v17 = vunpack.c.h.b16 %v1614_v1  ;;  %v564_v29 = vmul.f32 0.0625, %v524_v30 }
 0x229   :  { %v530_v57 = vpop.xlane.xlu1 %529  ;;  %v1717_v3 = vsel %vm1697_vm15, %v1716_v42, %v1712_v47  ;;  %v565_v33 = vmul.f32 0.0625, %v527_v15  ;;  %v1736_v36 = vsel %vm1697_vm15, %v1735_v4, %v1731_v6  ;;  %v1745_v60 = vsel %vm750_vm4, %v1744_v26, %v1740_v25 }
 0x22a   :  { %v1832_v12 = vsel %vm815_vm5, %v1717_v3, %v1698_v24  ;;  %v566_v21 = vmul.f32 0.0625, %v530_v57  ;;  %v1617_v62 = vpack.c.bf16 %v560_v27, %v559_v28  ;;  %v1618_v31 = vpack.c.bf16 %v562_v63, %v561_v44 }
 0x22b   :  { %v1754_v34 = vrot.slane %v1661_v7, %v4962_v5  ;;  %v1664_v38 = vunpack.c.l.b16 %v1615_v10  ;;  %v1666_v39 = vunpack.c.l.b16 %v1616_v11  ;;  %v1667_v40 = vunpack.c.h.b16 %v1616_v11 }
 0x22c   :  { %v1759_v8 = vrot.slane %v1662_v16, %v4735_v61  ;;  %v1763_v30 = vrot.slane %v1663_v17, %v4738_v2  ;;  %v567_v9 = vmul.f32 0.0625, %v533_v22  ;;  %v1750_v41 = vsel %vm1199_vm12, %v1749_v14, %v1745_v60 }
 0x22d   :  { %v536_v35 = vpop.xlane.xlu1 %535  ;;  %v1619_v42 = vpack.c.bf16 %v564_v29, %v563_v20  ;;  %v1620_v43 = vpack.c.bf16 %v566_v21, %v565_v33  ;;  %v1665_v46 = vunpack.c.h.b16 %v1615_v10  ;;  %v1668_v47 = vunpack.c.l.b16 %v1617_v62 }
 0x22e   :  { %v568_v32 = vmul.f32 0.0625, %v536_v35  ;;  %v1670_v49 = vunpack.c.l.b16 %v1618_v31  ;;  %v1671_v52 = vunpack.c.h.b16 %v1618_v31  ;;  %v1833_v53 = vsel %vm817_vm6, %v1736_v36, %v1832_v12 }
 0x22f   :  { %v1768_v54 = vrot.slane %v1664_v38, %v4865_v37  ;;  %v1778_v55 = vrot.slane %v1666_v39, %v4735_v61  ;;  %v1782_v57 = vrot.slane %v1667_v40, %v4738_v2  ;;  %v1755_v15 = vsel %vm1697_vm15, %v1754_v34, %v1750_v41 }
 0x230   :  { %v1764_v24 = vsel %vm750_vm4, %v1763_v30, %v1759_v8  ;;  %v1669_v59 = vunpack.c.h.b16 %v1617_v62  ;;  %v1621_v23 = vpack.c.bf16 %v568_v32, %v567_v9  ;;  %v1672_v1 = vunpack.c.l.b16 %v1619_v42 }
 0x231   :  { %v1674_v3 = vunpack.c.l.b16 %v1620_v43  ;;  %v1675_v4 = vunpack.c.h.b16 %v1620_v43  ;;  %v1092_v25 = vrot.slane %v4812_v19, %v4998_v45  ;;  %v1773_v26 = vrot.slane %v1665_v46, %v4962_v5  ;;  %v3876_v46 = vld [vmem:[#allocation11 + $0x8] sm:$0xff]  }
 0x232   :  { %v1787_v27 = vrot.slane %v1668_v47, %v4865_v37  ;;  %v1797_v28 = vrot.slane %v1670_v49, %v4735_v61  ;;  %v1801_v63 = vrot.slane %v1671_v52, %v4738_v2  ;;  %v1769_v6 = vsel %vm1199_vm12, %v1768_v54, %v1764_v24  ;;  %v3886_v24 = vld [vmem:[#allocation14 + $0x78] sm:$0xff]  }
 0x233   :  { %v1783_v7 = vsel %vm750_vm4, %v1782_v57, %v1778_v55  ;;  %v1143_v11 = vsub.s32 6, %v4730_v50  ;;  %v1792_v12 = vrot.slane %v1669_v59, %v4962_v5  ;;  %v1673_v14 = vunpack.c.h.b16 %v1619_v42  ;;  %v3877_v55 = vld [vmem:[#allocation11] sm:$0xff]   ;;  %v3878_v57 = vld [vmem:[#allocation14 + $0x38] sm:$0xff]   ;;  %3772 = vmatpush3.bf16.msra.mxu1 %v3886_v24 }
 0x234   :  { %v1676_v16 = vunpack.c.l.b16 %v1621_v23  ;;  %v1806_v29 = vrot.slane %v1672_v1, %v4865_v37  ;;  %v1816_v20 = vrot.slane %v1674_v3, %v4735_v61  ;;  %v1820_v21 = vrot.slane %v1675_v4, %v4738_v2  ;;  %v3887_v59 = vld [vmem:[#allocation14 + $0x70] sm:$0xff]   ;;  %3773 = vmatprep.subr.bf16.mxu1 %v4330_v13  ;;  %v3888_v1 = vld [vmem:[#allocation14 + $0x68] sm:$0xff]   ;;  %v3889_v4 = vld [vmem:[#allocation14 + $0x60] sm:$0xff]  }
 0x235   :  { %v1834_v35 = vsel %vm819_vm7, %v1755_v15, %v1833_v53  ;;  %v1774_v22 = vsel %vm1697_vm15, %v1773_v26, %v1769_v6  ;;  %v1802_v36 = vsel %vm750_vm4, %v1801_v63, %v1797_v28  ;;  %v1677_v62 = vunpack.c.h.b16 %v1621_v23  ;;  %v3879_v23 = vld [vmem:[#allocation14 + $0x30] sm:$0xff]   ;;  %v3880_v3 = vld [vmem:[#allocation14 + $0x28] sm:$0xff]   ;;  %v3890_v26 = vld [vmem:[#allocation14 + $0x58] sm:$0xff]  }
 0x236   :  { %v1144_v61 = vrot.slane %v4812_v19, %v1143_v11  ;;  %v1811_v2 = vrot.slane %v1673_v14, %v4962_v5  ;;  %v1825_v34 = vrot.slane %v1676_v16, %v4865_v37  ;;  %v1835_v39 = vsel %vm821_vm8, %v1774_v22, %v1834_v35  ;;  %v3883_v28 = vld [vmem:[#allocation14 + $0x10] sm:$0xff]   ;;  %v3885_v16 = vld [vmem:[#allocation14] sm:$0xff]  }
 0x237   :  { %v1807_v8 = vsel %vm1199_vm12, %v1806_v29, %v1802_v36  ;;  %v1821_v30 = vsel %vm750_vm4, %v1820_v21, %v1816_v20  ;;  %v1830_v9 = vrot.slane %v1677_v62, %v4962_v5  ;;  %3774 = vmatpush3.bf16.msra.mxu1 %v3887_v59  ;;  %v5065_v63 = vld [vmem:[%s5162_s11 + $0x8] sm:$0xff]  ;;  %v3893_v35 = vld [vmem:[#allocation14 + $0x40] sm:$0xff]   ;;  %v1576_v22 = vsub.s32 7, %v4730_v50 }
 0x238   :  { %v1812_v37 = vsel %vm1697_vm15, %v1811_v2, %v1807_v8  ;;  %v1826_v42 = vsel %vm1199_vm12, %v1825_v34, %v1821_v30  ;;  %3775 = vmatprep.subr.bf16.mxu1 %v4330_v13  ;;  %v3891_v20 = vld [vmem:[#allocation14 + $0x50] sm:$0xff]   ;;  %v3892_v21 = vld [vmem:[#allocation14 + $0x48] sm:$0xff]   ;;  %v5083_v62 = vsub.s32 3, %v4730_v50 }
 0x239   :  { %v1831_v53 = vsel %vm1697_vm15, %v1830_v9, %v1826_v42 }
 0x23b   :  { %3776 = vmatpush3.bf16.msra.mxu1 %v3888_v1  ;;  %v3911_v1 = vld [vmem:[#allocation16 + $0x1ac] ss:$16 sps:$4 sm:$0xff]  }
 0x23c   :  { %3777 = vmatprep.subr.bf16.mxu1 %v4330_v13 }
 0x23f   :  { %3778 = vmatpush3.bf16.msra.mxu1 %v3889_v4  ;;  %v3909_v4 = vld [vmem:[#allocation16 + $0x1a8] ss:$16 sps:$4 sm:$0xff]  }
 0x240   :  { %3779 = vmatprep.subr.bf16.mxu1 %v4330_v13 }
 0x243   :  { %3780 = vmatpush3.bf16.msra.mxu1 %v3890_v26  ;;  %v3914_v26 = vld [vmem:[#allocation16 + $0x184] ss:$16 sps:$4 sm:$0xff]  }
 0x244   :  { %3781 = vmatprep.subr.bf16.mxu1 %v4330_v13 }
 0x247   :  { %3782 = vmatpush3.bf16.msra.mxu1 %v3891_v20  ;;  %v3935_v20 = vld [vmem:[#allocation16 + $0x12c] ss:$16 sps:$4 sm:$0xff]  }
 0x248   :  { %3783 = vmatprep.subr.bf16.mxu1 %v4330_v13 }
 0x24b   :  { %3784 = vmatpush3.bf16.msra.mxu1 %v3892_v21  ;;  %v3930_v21 = vld [vmem:[#allocation16 + $0x120] ss:$16 sps:$4 sm:$0xff]  }
 0x24c   :  { %3785 = vmatprep.subr.bf16.mxu1 %v4330_v13 }
 0x24f   :  { %3786 = vmatpush3.bf16.msra.mxu1 %v3893_v35  ;;  %v3933_v35 = vld [vmem:[#allocation16 + $0x128] ss:$16 sps:$4 sm:$0xff]  }
 0x2bb   :  { %v995_v44 = vpop.f32.mrf.mxu1 }
 0x2bc   :  { %v1084_v10 = vadd.f32 %v4940_v56, %v995_v44  ;;  %v1788_v56 = vsel %vm1199_vm12, %v1787_v27, %v1783_v7  ;;  %v3882_v27 = vld [vmem:[#allocation14 + $0x18] sm:$0xff]   ;;  %v3884_v7 = vld [vmem:[#allocation14 + $0x8] sm:$0xff]  }
 0x2bd   :  { %v3693_v17 = vpop.f32.mrf.mxu1  ;;  %v1793_v40 = vsel %vm1697_vm15, %v1792_v12, %v1788_v56 }
 0x2be   :  { %v5020_v33 = vadd.f32 %v1092_v25, %v1084_v10  ;;  %v1836_v41 = vsel %vm823_vm9, %v1793_v40, %v1835_v39  ;;  %v3881_v25 = vld [vmem:[#allocation14 + $0x20] sm:$0xff]   ;;  %v1604_v10 = vrot.slane %v5065_v63, %v4998_v45 }
 0x2bf   :  { %v998_v60 = vpop.f32.mrf.mxu1  ;;  %v1837_v52 = vsel %vm825_vm10, %v1812_v37, %v1836_v41 }
 0x2c0   :  { %v1094_v31 = vmax.f32 %v5020_v33, 0.0  ;;  %v1838_v5 = vsel %vm827_vm11, %v1831_v53, %v1837_v52  ;;  %v1605_v17 = vadd.f32 %v1604_v10, %v4857_v51  ;;  %v5079_v51 = vld [vmem:[%s5162_s11] sm:$0xff]  ;;  %v3899_v52 = vld [vmem:[#allocation16 + $0x1ec] ss:$16 sps:$4 sm:$0xff]  }
 0x2c1   :  { %v3694_v38 = vpop.f32.mrf.mxu1  ;;  %v1839_v15 = vpack.c.b16 %v1838_v5, %v1838_v5  ;;  %v1577_v56 = vrot.slane %v5079_v51, %v1576_v22  ;;  %v3902_v53 = vld [vmem:[#allocation16 + $0x1c4] ss:$16 sps:$4 sm:$0xff]   ;;  %v3903_v5 = vld [vmem:[#allocation16 + $0x1c8] ss:$16 sps:$4 sm:$0xff]  }
 0x2c2   :  { %1095 = vadd.xlane.f32.xlu1 %v1094_v31  ;;  %v1927_v29 = vpack.c.bf16 %v1605_v17, %v1605_v17  ;;  %v1629_v38 = vrot.slane %v5065_v63, %v5083_v62  ;;  %v3921_v10 = vld [vmem:[#allocation16 + $0x168] ss:$16 sps:$4 sm:$0xff]   ;;  %v3938_v22 = vld [vmem:[#allocation16 + $0x104] ss:$16 sps:$4 sm:$0xff]  }
 0x2c3   :  { %v1358_v32 = vpop.f32.mrf.mxu1  ;;  %v3927_v17 = vld [vmem:[#allocation16 + $0x148] ss:$16 sps:$4 sm:$0xff]  }
 0x2c4   :  { %v1359_v19 = vadd.f32 %v1358_v32, %v1144_v61 }
 0x2c5   :  { %v3721_v43 = vpop.f32.mrf.mxu1 }
 0x2c6   :  { %v1397_v47 = vpack.c.bf16 %v1359_v19, %v1359_v19 }
 0x2c7   :  { %v1361_v49 = vpop.f32.mrf.mxu1 }
 0x2c8   :  { %3740 = vmatmul.mubr.bf16.vlgmr.msra.gmra.mxu0 %v1397_v47  ;;  %v3896_v47 = vld [vmem:[#allocation16 + $0x1e4] ss:$16 sps:$4 sm:$0xff]   ;;  %v3897_v49 = vld [vmem:[#allocation16 + $0x1e8] ss:$16 sps:$4 sm:$0xff]  }
 0x2c9   :  { %3764 = vmatpush3.bf16.msra.mxu0 %v3876_v46  ;;  %v3722_v54 = vpop.f32.mrf.mxu1  ;;  %3767 = vmatprep.mubr.msk.bf16.mxu0 %vm4331_vm2, %v4330_v13  ;;  %v3894_v46 = vld [vmem:[#allocation16 + $0x1e0] ss:$16 sps:$4 sm:$0xff]  }
 0x2ca   :  { %3765 = vmatprep.subr.bf16.mxu0 %v4330_v13  ;;  %2390 = vmatprep.subr.bf16.mxu1 %v3896_v47  ;;  %v3905_v54 = vld [vmem:[#allocation16 + $0x1cc] ss:$16 sps:$4 sm:$0xff]  }
 0x2cd   :  { %3766 = vmatpush3.bf16.msra.mxu0 %v3877_v55  ;;  %v3900_v55 = vld [vmem:[#allocation16 + $0x1c0] ss:$16 sps:$4 sm:$0xff]  }
 0x2ce   :  { %3791 = vmatprep.subr.bf16.mxu0 %v4330_v13 }
 0x2d0   :  { %3768 = vmatmul.mubr.msk.bf16.vlgmr.msra.gmra.mxu0 %vm611_vm1, %v1839_v15 }
 0x2d1   :  { %3792 = vmatpush3.bf16.msra.mxu0 %v3878_v57  ;;  %3807 = vmatprep.mubr.msk.bf16.mxu0 %vm4331_vm2, %v4330_v13 }
 0x2d2   :  { %3793 = vmatprep.subr.bf16.mxu0 %v4330_v13 }
 0x2d5   :  { %3794 = vmatpush3.bf16.msra.mxu0 %v3879_v23  ;;  %v3908_v23 = vld [vmem:[#allocation16 + $0x1a4] ss:$16 sps:$4 sm:$0xff]  }
 0x2d6   :  { %3795 = vmatprep.subr.bf16.mxu0 %v4330_v13 }
 0x2d9   :  { %3796 = vmatpush3.bf16.msra.mxu0 %v3880_v3  ;;  %v3906_v3 = vld [vmem:[#allocation16 + $0x1a0] ss:$16 sps:$4 sm:$0xff]  }
 0x2da   :  { %3797 = vmatprep.subr.bf16.mxu0 %v4330_v13 }
 0x2dd   :  { %3798 = vmatpush3.bf16.msra.mxu0 %v3881_v25  ;;  %v3912_v25 = vld [vmem:[#allocation16 + $0x180] ss:$16 sps:$4 sm:$0xff]  }
 0x2de   :  { %3799 = vmatprep.subr.bf16.mxu0 %v4330_v13 }
 0x2e1   :  { %3800 = vmatpush3.bf16.msra.mxu0 %v3882_v27  ;;  %v3915_v27 = vld [vmem:[#allocation16 + $0x188] ss:$16 sps:$4 sm:$0xff]  }
 0x2e2   :  { %3801 = vmatprep.subr.bf16.mxu0 %v4330_v13 }
 0x2e3   :  { %v1568_v44 = vpop.f32.mrf.mxu1 }
 0x2e5   :  { %v3761_v6 = vpop.f32.mrf.mxu1  ;;  %3802 = vmatpush3.bf16.msra.mxu0 %v3883_v28  ;;  %v3917_v28 = vld [vmem:[#allocation16 + $0x18c] ss:$16 sps:$4 sm:$0xff]  }
 0x2e6   :  { %3803 = vmatprep.subr.bf16.mxu0 %v4330_v13  ;;  %v3923_v6 = vld [vmem:[#allocation16 + $0x16c] ss:$16 sps:$4 sm:$0xff]  }
 0x2e7   :  { %v1571_v12 = vpop.f32.mrf.mxu1 }
 0x2e8   :  { %v3926_v12 = vld [vmem:[#allocation16 + $0x144] ss:$16 sps:$4 sm:$0xff]  }
 0x2e9   :  { %v3762_v14 = vpop.f32.mrf.mxu1  ;;  %3804 = vmatpush3.bf16.msra.mxu0 %v3884_v7  ;;  %v3918_v7 = vld [vmem:[#allocation16 + $0x160] ss:$16 sps:$4 sm:$0xff]  }
 0x2ea   :  { %3805 = vmatprep.subr.bf16.mxu0 %v4330_v13  ;;  %v3929_v14 = vld [vmem:[#allocation16 + $0x14c] ss:$16 sps:$4 sm:$0xff]  }
 0x2ed   :  { %3806 = vmatpush3.bf16.msra.mxu0 %v3885_v16  ;;  %v3924_v16 = vld [vmem:[#allocation16 + $0x140] ss:$16 sps:$4 sm:$0xff]  }
 0x2ee   :  { %2431 = vmatprep.subr.bf16.mxu0 %v3899_v52  ;;  %v1599_v52 = vrot.slane %v5065_v63, %v4893_v58 }
 0x2f0   :  { %3808 = vmatmul.mubr.bf16.vlgmr.msra.gmra.mxu0 %v1927_v29  ;;  %v3932_v29 = vld [vmem:[#allocation16 + $0x124] ss:$16 sps:$4 sm:$0xff]  }
 0x2f1   :  { %2463 = vmatprep.mubr.bf16.mxu0 %v4329_v0  ;;  %2432 = vmatpush1.bf16.msra.mxu0 %v3897_v49  ;;  %v1594_v49 = vrot.slane %v5065_v63, %v4807_v18 }
 0x2f2   :  { %2433 = vmatprep.subr.bf16.mxu0 %v3905_v54 }
 0x2f5   :  { %2434 = vmatpush1.bf16.msra.mxu0 %v3903_v5  ;;  %v3945_v5 = vld [vmem:[#allocation16 + $0xe8] ss:$16 sps:$4 sm:$0xff]  }
 0x2f6   :  { %2435 = vmatprep.subr.bf16.mxu0 %v3911_v1  ;;  %v3951_v1 = vld [vmem:[#allocation16 + $0xc8] ss:$16 sps:$4 sm:$0xff]  }
 0x2f9   :  { %2436 = vmatpush1.bf16.msra.mxu0 %v3909_v4  ;;  %v3954_v4 = vld [vmem:[#allocation16 + $0xa0] ss:$16 sps:$4 sm:$0xff]  }
 0x2fa   :  { %2437 = vmatprep.subr.bf16.mxu0 %v3917_v28  ;;  %v3960_v28 = vld [vmem:[#allocation16 + $0x80] ss:$16 sps:$4 sm:$0xff]  }
 0x2fd   :  { %2438 = vmatpush1.bf16.msra.mxu0 %v3915_v27  ;;  %v3965_v27 = vld [vmem:[#allocation16 + $0x8c] ss:$16 sps:$4 sm:$0xff]  }
 0x2fe   :  { %2439 = vmatprep.subr.bf16.mxu0 %v3923_v6  ;;  %v3968_v6 = vld [vmem:[#allocation16 + $0x64] ss:$16 sps:$4 sm:$0xff]  }
 0x301   :  { %2440 = vmatpush1.bf16.msra.mxu0 %v3921_v10  ;;  %v3966_v10 = vld [vmem:[#allocation16 + $0x60] ss:$16 sps:$4 sm:$0xff]  }
 0x302   :  { %2441 = vmatprep.subr.bf16.mxu0 %v3929_v14  ;;  %v3974_v14 = vld [vmem:[#allocation16 + $0x44] ss:$16 sps:$4 sm:$0xff]  }
 0x305   :  { %2442 = vmatpush1.bf16.msra.mxu0 %v3927_v17  ;;  %v3972_v17 = vld [vmem:[#allocation16 + $0x40] ss:$16 sps:$4 sm:$0xff]  }
 0x306   :  { %2443 = vmatprep.subr.bf16.mxu0 %v3935_v20  ;;  %v3980_v20 = vld [vmem:[#allocation16 + $0x24] ss:$16 sps:$4 sm:$0xff]  }
 0x309   :  { %2444 = vmatpush1.bf16.msra.mxu0 %v3933_v35  ;;  %v3978_v35 = vld [vmem:[#allocation16 + $0x20] ss:$16 sps:$4 sm:$0xff]  }
 0x388   :  { %v1480_v36 = vpop.f32.mrf.mxu0 }
 0x389   :  { %v1569_v60 = vadd.f32 %v1568_v44, %v1480_v36  ;;  %v3920_v44 = vld [vmem:[#allocation16 + $0x164] ss:$16 sps:$4 sm:$0xff]   ;;  %v3936_v36 = vld [vmem:[#allocation16 + $0x100] ss:$16 sps:$4 sm:$0xff]  }
 0x38a   :  { %v3741_v61 = vpop.f32.mrf.mxu0 }
 0x38b   :  { %v1578_v2 = vadd.f32 %v1577_v56, %v1569_v60  ;;  %v3941_v56 = vld [vmem:[#allocation16 + $0x10c] ss:$16 sps:$4 sm:$0xff]   ;;  %v3939_v60 = vld [vmem:[#allocation16 + $0x108] ss:$16 sps:$4 sm:$0xff]   ;;  %v3944_v61 = vld [vmem:[#allocation16 + $0xe4] ss:$16 sps:$4 sm:$0xff]  }
 0x38c   :  { %v1483_v34 = vpop.f32.mrf.mxu0  ;;  %2445 = vmatprep.subr.bf16.mxu0 %v3941_v56  ;;  %v3986_v56 = vld [vmem:[#allocation16 + $0x4] ss:$16 sps:$4 sm:$0xff]  }
 0x38d   :  { %v1579_v13 = vmax.f32 %v1578_v2, 0.0  ;;  %2446 = vmatpush1.bf16.msra.mxu0 %v3939_v60  ;;  %v3947_v2 = vld [vmem:[#allocation16 + $0xec] ss:$16 sps:$4 sm:$0xff]   ;;  %v1114_v34 = vsub.s32 4, %v4730_v50  ;;  %v3984_v60 = vld [vmem:[#allocation16] ss:$16 sps:$4 sm:$0xff]  }
 0x38e   :  { %v3742_v39 = vpop.f32.mrf.mxu0  ;;  %2673 = vmatprep.subr.bf16.mxu0 %v3947_v2  ;;  %v3992_v2 = vld [vmem:[#allocation16 + $0x2e4] ss:$16 sps:$4 sm:$0xff]   ;;  %v4046_v50 = vld [vmem:[#allocation17 + $0x68] sm:$0xff]  }
 0x38f   :  { %1580 = vadd.xlane.f32.xlu0 %v1579_v13 }
 0x390   :  { %v1889_v40 = vpop.f32.mrf.mxu0 }
 0x391   :  { %v1890_v8 = vadd.f32 %v1889_v40, %v1629_v38  ;;  %v2108_v38 = vrot.slane %v5065_v63, %v1114_v34 }
 0x392   :  { %v3769_v30 = vpop.f32.mrf.mxu0 }
 0x393   :  { %v1928_v32 = vpack.c.bf16 %v1890_v8, %v1890_v8 }
 0x394   :  { %v1892_v9 = vpop.f32.mrf.mxu0 }
 0x395   :  { %3788 = vmatmul.mubr.bf16.vlgmr.msra.gmra.mxu1 %v1928_v32 }
 0x396   :  { %v3770_v19 = vpop.f32.mrf.mxu0  ;;  %2422 = vmatprep.mubr.bf16.mxu1 %v4329_v0  ;;  %2391 = vmatpush1.bf16.msra.mxu1 %v3894_v46 }
 0x397   :  { %2392 = vmatprep.subr.bf16.mxu1 %v3902_v53 }
 0x39a   :  { %2393 = vmatpush1.bf16.msra.mxu1 %v3900_v55  ;;  %v3942_v55 = vld [vmem:[#allocation16 + $0xe0] ss:$16 sps:$4 sm:$0xff]  }
 0x39b   :  { %2394 = vmatprep.subr.bf16.mxu1 %v3908_v23  ;;  %v3948_v23 = vld [vmem:[#allocation16 + $0xc0] ss:$16 sps:$4 sm:$0xff]  }
 0x39e   :  { %2395 = vmatpush1.bf16.msra.mxu1 %v3906_v3  ;;  %v3956_v3 = vld [vmem:[#allocation16 + $0xa4] ss:$16 sps:$4 sm:$0xff]  }
 0x39f   :  { %2396 = vmatprep.subr.bf16.mxu1 %v3914_v26  ;;  %v3962_v26 = vld [vmem:[#allocation16 + $0x84] ss:$16 sps:$4 sm:$0xff]  }
 0x3a2   :  { %2397 = vmatpush1.bf16.msra.mxu1 %v3912_v25  ;;  %v3957_v25 = vld [vmem:[#allocation16 + $0xa8] ss:$16 sps:$4 sm:$0xff]  }
 0x3a3   :  { %2398 = vmatprep.subr.bf16.mxu1 %v3920_v44  ;;  %v3963_v44 = vld [vmem:[#allocation16 + $0x88] ss:$16 sps:$4 sm:$0xff]  }
 0x3a6   :  { %2399 = vmatpush1.bf16.msra.mxu1 %v3918_v7  ;;  %v3971_v7 = vld [vmem:[#allocation16 + $0x6c] ss:$16 sps:$4 sm:$0xff]  }
 0x3a7   :  { %2400 = vmatprep.subr.bf16.mxu1 %v3926_v12  ;;  %v3969_v12 = vld [vmem:[#allocation16 + $0x68] ss:$16 sps:$4 sm:$0xff]  }
 0x3aa   :  { %2401 = vmatpush1.bf16.msra.mxu1 %v3924_v16  ;;  %v3977_v16 = vld [vmem:[#allocation16 + $0x4c] ss:$16 sps:$4 sm:$0xff]  }
 0x3ab   :  { %2402 = vmatprep.subr.bf16.mxu1 %v3932_v29  ;;  %v3975_v29 = vld [vmem:[#allocation16 + $0x48] ss:$16 sps:$4 sm:$0xff]  }
 0x3ae   :  { %2403 = vmatpush1.bf16.msra.mxu1 %v3930_v21  ;;  %v3983_v21 = vld [vmem:[#allocation16 + $0x2c] ss:$16 sps:$4 sm:$0xff]  }
 0x3af   :  { %2404 = vmatprep.subr.bf16.mxu1 %v3938_v22  ;;  %v3981_v22 = vld [vmem:[#allocation16 + $0x28] ss:$16 sps:$4 sm:$0xff]  }
 0x3b0   :  { %v5088_v41 = vpop.f32.mrf.mxu0 }
 0x3b2   :  { %v3809_v37 = vpop.f32.mrf.mxu0  ;;  %2405 = vmatpush1.bf16.msra.mxu1 %v3936_v36  ;;  %v3989_v36 = vld [vmem:[#allocation16 + $0xc] ss:$16 sps:$4 sm:$0xff]  }
 0x3b3   :  { %2632 = vmatprep.subr.bf16.mxu1 %v3944_v61  ;;  %v3987_v61 = vld [vmem:[#allocation16 + $0x8] ss:$16 sps:$4 sm:$0xff]  }
 0x3b4   :  { %v2102_v42 = vpop.f32.mrf.mxu0 }
 0x3b6   :  { %v3810_v43 = vpop.f32.mrf.mxu0 }
 0x418   :  { %v1581_v57 = vpop.xlane.xlu0 %1580 }
 0x419   :  { %v1582_v15 = vmul.f32 0.0078125, %v1581_v57 }
 0x41b   :  { %v5090_v24 = vsub.f32 %v1579_v13, %v1582_v15  ;;  %v1096_v13 = vpop.xlane.xlu1 %1095  ;;  %v3950_v15 = vld [vmem:[#allocation16 + $0xc4] ss:$16 sps:$4 sm:$0xff]  }
 0x41c   :  { %v1098_v40 = vmul.f32 0.0078125, %v1096_v13  ;;  %v3995_v13 = vld [vmem:[#allocation16 + $0x2ec] ss:$16 sps:$4 sm:$0xff]  }
 0x41d   :  { %v1584_v59 = vmul.f32 %v5090_v24, %v5090_v24 }
 0x41e   :  { %v5103_v19 = vsub.f32 %v1094_v31, %v1098_v40 }
 0x41f   :  { %1585 = vadd.xlane.f32.xlu1 %v1584_v59  ;;  %v3953_v59 = vld [vmem:[#allocation16 + $0xcc] ss:$16 sps:$4 sm:$0xff]  }
 0x420   :  { %v1100_v43 = vmul.f32 %v5103_v19, %v5103_v19 }
 0x455   :  { %v2011_v39 = vpop.f32.mrf.mxu1 }
 0x456   :  { %v2100_v8 = vadd.f32 %v5088_v41, %v2011_v39 }
 0x457   :  { %v3789_v30 = vpop.f32.mrf.mxu1 }
 0x458   :  { %v5099_v32 = vadd.f32 %v2108_v38, %v2100_v8 }
 0x459   :  { %v2014_v9 = vpop.f32.mrf.mxu1 }
 0x45a   :  { %v2110_v37 = vmax.f32 %v5099_v32, 0.0 }
 0x45b   :  { %v3790_v42 = vpop.f32.mrf.mxu1 }
 0x45c   :  { %2111 = vadd.xlane.f32.xlu0 %v2110_v37 }
 0x460   :  { %1101 = vadd.xlane.f32.xlu0 %v1100_v43  ;;  %v1110_v43 = vrot.slane %v5079_v51, %v5083_v62 }
 0x4a8   :  { %v1586_v46 = vpop.xlane.xlu1 %1585 }
 0x4a9   :  { %v1587_v41 = vmul.f32 0.0078125, %v1586_v46 }
 0x4ab   :  { %v1588_v47 = vadd.f32 1e-05, %v1587_v41  ;;  %v1115_v41 = vrot.slane %v5079_v51, %v1114_v34  ;;  %v4002_v51 = vld [vmem:[#allocation16 + $0x2a0] ss:$16 sps:$4 sm:$0xff]   ;;  %v4005_v34 = vld [vmem:[#allocation16 + $0x2a8] ss:$16 sps:$4 sm:$0xff]  }
 0x4ad   :  { %4070 = vrsqrt.f32 %v1588_v47 }
 0x4ba   :  { %v4071_v33 = vpop.eup %4070 }
 0x4bb   :  { %v1590_v31 = vmul.f32 %v4071_v33, %v5090_v24  ;;  %v3959_v24 = vld [vmem:[#allocation16 + $0xac] ss:$16 sps:$4 sm:$0xff]   ;;  %v3993_v33 = vld [vmem:[#allocation16 + $0x2e8] ss:$16 sps:$4 sm:$0xff]  }
 0x4bd   :  { %v1595_v53 = vmul.f32 %v1594_v49, %v1590_v31  ;;  %v3990_v49 = vld [vmem:[#allocation16 + $0x2e0] ss:$16 sps:$4 sm:$0xff]  }
 0x4bf   :  { %v1600_v54 = vadd.f32 %v1599_v52, %v1595_v53  ;;  %v3998_v52 = vld [vmem:[#allocation16 + $0x2c4] ss:$16 sps:$4 sm:$0xff]   ;;  %v4001_v53 = vld [vmem:[#allocation16 + $0x2cc] ss:$16 sps:$4 sm:$0xff]  }
 0x4c1   :  { %v2229_v57 = vpack.c.bf16 %v1600_v54, %v1600_v54  ;;  %v3996_v54 = vld [vmem:[#allocation16 + $0x2c0] ss:$16 sps:$4 sm:$0xff]  }
 0x4c3   :  { %2423 = vmatmul.mubr.bf16.vlgmr.msra.gmra.mxu1 %v2229_v57  ;;  %2464 = vmatmul.mubr.bf16.vlgmr.msra.gmra.mxu0 %v2229_v57  ;;  %v4007_v57 = vld [vmem:[#allocation16 + $0x2ac] ss:$16 sps:$4 sm:$0xff]  }
 0x4c4   :  { %2633 = vmatpush1.bf16.msra.mxu1 %v3942_v55  ;;  %2674 = vmatpush1.bf16.msra.mxu0 %v3945_v5  ;;  %v3999_v55 = vld [vmem:[#allocation16 + $0x2c8] ss:$16 sps:$4 sm:$0xff]   ;;  %v4004_v5 = vld [vmem:[#allocation16 + $0x2a4] ss:$16 sps:$4 sm:$0xff]  }
 0x4c5   :  { %2634 = vmatprep.subr.bf16.mxu1 %v3950_v15  ;;  %2675 = vmatprep.subr.bf16.mxu0 %v3953_v59  ;;  %v4013_v15 = vld [vmem:[#allocation16 + $0x28c] ss:$16 sps:$4 sm:$0xff]   ;;  %v4008_v59 = vld [vmem:[#allocation16 + $0x280] ss:$16 sps:$4 sm:$0xff]  }
 0x4c6   :  { %2664 = vmatprep.mubr.bf16.mxu1 %v4329_v0  ;;  %2705 = vmatprep.mubr.bf16.mxu0 %v4329_v0 }
 0x4c8   :  { %2635 = vmatpush1.bf16.msra.mxu1 %v3948_v23  ;;  %2676 = vmatpush1.bf16.msra.mxu0 %v3951_v1  ;;  %v4011_v23 = vld [vmem:[#allocation16 + $0x288] ss:$16 sps:$4 sm:$0xff]   ;;  %v4016_v1 = vld [vmem:[#allocation16 + $0x264] ss:$16 sps:$4 sm:$0xff]  }
 0x4c9   :  { %2636 = vmatprep.subr.bf16.mxu1 %v3956_v3  ;;  %2677 = vmatprep.subr.bf16.mxu0 %v3959_v24  ;;  %v4019_v3 = vld [vmem:[#allocation16 + $0x26c] ss:$16 sps:$4 sm:$0xff]   ;;  %v4014_v24 = vld [vmem:[#allocation16 + $0x260] ss:$16 sps:$4 sm:$0xff]  }
 0x4cc   :  { %2637 = vmatpush1.bf16.msra.mxu1 %v3954_v4  ;;  %2678 = vmatpush1.bf16.msra.mxu0 %v3957_v25  ;;  %v4022_v4 = vld [vmem:[#allocation16 + $0x244] ss:$16 sps:$4 sm:$0xff]   ;;  %v4025_v25 = vld [vmem:[#allocation16 + $0x24c] ss:$16 sps:$4 sm:$0xff]  }
 0x4cd   :  { %2638 = vmatprep.subr.bf16.mxu1 %v3962_v26  ;;  %2679 = vmatprep.subr.bf16.mxu0 %v3965_v27  ;;  %v4020_v26 = vld [vmem:[#allocation16 + $0x240] ss:$16 sps:$4 sm:$0xff]   ;;  %v4023_v27 = vld [vmem:[#allocation16 + $0x248] ss:$16 sps:$4 sm:$0xff]  }
 0x4d0   :  { %2639 = vmatpush1.bf16.msra.mxu1 %v3960_v28  ;;  %2680 = vmatpush1.bf16.msra.mxu0 %v3963_v44  ;;  %v4028_v28 = vld [vmem:[#allocation16 + $0x224] ss:$16 sps:$4 sm:$0xff]   ;;  %v4031_v44 = vld [vmem:[#allocation16 + $0x22c] ss:$16 sps:$4 sm:$0xff]  }
 0x4d1   :  { %2640 = vmatprep.subr.bf16.mxu1 %v3968_v6  ;;  %2681 = vmatprep.subr.bf16.mxu0 %v3971_v7  ;;  %v4026_v6 = vld [vmem:[#allocation16 + $0x220] ss:$16 sps:$4 sm:$0xff]   ;;  %v4029_v7 = vld [vmem:[#allocation16 + $0x228] ss:$16 sps:$4 sm:$0xff]  }
 0x4d4   :  { %2641 = vmatpush1.bf16.msra.mxu1 %v3966_v10  ;;  %2682 = vmatpush1.bf16.msra.mxu0 %v3969_v12  ;;  %v4034_v10 = vld [vmem:[#allocation16 + $0x204] ss:$16 sps:$4 sm:$0xff]   ;;  %v4037_v12 = vld [vmem:[#allocation16 + $0x20c] ss:$16 sps:$4 sm:$0xff]  }
 0x4d5   :  { %2642 = vmatprep.subr.bf16.mxu1 %v3974_v14  ;;  %2683 = vmatprep.subr.bf16.mxu0 %v3977_v16  ;;  %v4032_v14 = vld [vmem:[#allocation16 + $0x200] ss:$16 sps:$4 sm:$0xff]   ;;  %v4035_v16 = vld [vmem:[#allocation16 + $0x208] ss:$16 sps:$4 sm:$0xff]  }
 0x4d8   :  { %2643 = vmatpush1.bf16.msra.mxu1 %v3972_v17  ;;  %2684 = vmatpush1.bf16.msra.mxu0 %v3975_v29  ;;  %v4038_v17 = vld [vmem:[#allocation17 + $0x78] sm:$0xff]  }
 0x4d9   :  { %2644 = vmatprep.subr.bf16.mxu1 %v3980_v20  ;;  %2685 = vmatprep.subr.bf16.mxu0 %v3983_v21  ;;  %v4039_v29 = vld [vmem:[#allocation17 + $0xf8] sm:$0xff]  }
 0x4dc   :  { %2645 = vmatpush1.bf16.msra.mxu1 %v3978_v35  ;;  %2686 = vmatpush1.bf16.msra.mxu0 %v3981_v22 }
 0x4dd   :  { %2646 = vmatprep.subr.bf16.mxu1 %v3986_v56  ;;  %2687 = vmatprep.subr.bf16.mxu0 %v3989_v36 }
 0x4e0   :  { %2647 = vmatpush1.bf16.msra.mxu1 %v3984_v60  ;;  %2688 = vmatpush1.bf16.msra.mxu0 %v3987_v61  ;;  %v2125_v61 = vrot.slane %v5065_v63, %v1119_v48  ;;  %v4044_v48 = vld [vmem:[#allocation17 + $0x30] sm:$0xff]  }
 0x4e1   :  { %2875 = vmatprep.subr.bf16.mxu1 %v3992_v2  ;;  %2916 = vmatprep.subr.bf16.mxu0 %v3995_v13 }
 0x4e5   :  { %v2112_v38 = vpop.xlane.xlu0 %2111 }
 0x4e6   :  { %v2113_v39 = vmul.f32 0.0078125, %v2112_v38 }
 0x4e8   :  { %v5119_v40 = vsub.f32 %v2110_v37, %v2113_v39  ;;  %v2130_v39 = vrot.slane %v5065_v63, %v1143_v11  ;;  %v4047_v11 = vld [vmem:[#allocation17 + $0xe8] sm:$0xff]  }
 0x4e9   :  { %v1102_v8 = vpop.xlane.xlu0 %1101  ;;  %v4048_v63 = vld [vmem:[#allocation17 + $0x28] sm:$0xff]  }
 0x4ea   :  { %v1103_v30 = vmul.f32 0.0078125, %v1102_v8  ;;  %v2115_v9 = vmul.f32 %v5119_v40, %v5119_v40 }
 0x4ec   :  { %v1104_v42 = vadd.f32 1e-05, %v1103_v30  ;;  %2116 = vadd.xlane.f32.xlu1 %v2115_v9 }
 0x4ee   :  { %4072 = vrsqrt.f32 %v1104_v42 }
 0x4fb   :  { %v4073_v46 = vpop.eup %4072 }
 0x4fc   :  { %v1106_v32 = vmul.f32 %v4073_v46, %v5103_v19  ;;  %v4010_v19 = vld [vmem:[#allocation16 + $0x284] ss:$16 sps:$4 sm:$0xff]   ;;  %v4040_v46 = vld [vmem:[#allocation17 + $0x38] sm:$0xff]  }
 0x4fe   :  { %v1111_v37 = vmul.f32 %v1110_v43, %v1106_v32 }
 0x500   :  { %v1116_v47 = vadd.f32 %v1115_v41, %v1111_v37  ;;  %v4041_v41 = vld [vmem:[#allocation17 + $0xb8] sm:$0xff]   ;;  %v4042_v37 = vld [vmem:[#allocation17 + $0x70] sm:$0xff]  }
 0x502   :  { %v2228_v31 = vpack.c.bf16 %v1116_v47, %v1116_v47  ;;  %v4043_v47 = vld [vmem:[#allocation17 + $0xf0] sm:$0xff]  }
 0x504   :  { %2665 = vmatmul.mubr.bf16.vlgmr.msra.gmra.mxu1 %v2228_v31  ;;  %2706 = vmatmul.mubr.bf16.vlgmr.msra.gmra.mxu0 %v2228_v31  ;;  %v4051_v31 = vld [vmem:[#allocation17 + $0xe0] sm:$0xff]  }
 0x505   :  { %2876 = vmatpush1.bf16.msra.mxu1 %v3990_v49  ;;  %2917 = vmatpush1.bf16.msra.mxu0 %v3993_v33  ;;  %v4045_v49 = vld [vmem:[#allocation17 + $0xb0] sm:$0xff]   ;;  %v4050_v33 = vld [vmem:[#allocation17 + $0x60] sm:$0xff]  }
 0x506   :  { %2877 = vmatprep.subr.bf16.mxu1 %v3998_v52  ;;  %2918 = vmatprep.subr.bf16.mxu0 %v4001_v53  ;;  %v4052_v52 = vld [vmem:[#allocation17 + $0x20] sm:$0xff]  }
 0x507   :  { %2907 = vmatprep.mubr.bf16.mxu1 %v4329_v0  ;;  %2948 = vmatprep.mubr.bf16.mxu0 %v4329_v0  ;;  %v4017_v0 = vld [vmem:[#allocation16 + $0x268] ss:$16 sps:$4 sm:$0xff]   ;;  %v4053_v53 = vld [vmem:[#allocation17 + $0xa0] sm:$0xff]  }
 0x509   :  { %2878 = vmatpush1.bf16.msra.mxu1 %v3996_v54  ;;  %2919 = vmatpush1.bf16.msra.mxu0 %v3999_v55  ;;  %v4054_v54 = vld [vmem:[#allocation17 + $0x58] sm:$0xff]  }
 0x50a   :  { %2879 = vmatprep.subr.bf16.mxu1 %v4004_v5  ;;  %2920 = vmatprep.subr.bf16.mxu0 %v4007_v57  ;;  %v4055_v55 = vld [vmem:[#allocation17 + $0xd8] sm:$0xff]  }
 0x50b   :  { %v4056_v5 = vld [vmem:[#allocation17 + $0x18] sm:$0xff]  }
 0x50c   :  { %v4057_v57 = vld [vmem:[#allocation17 + $0x98] sm:$0xff]  }
 0x50d   :  { %2880 = vmatpush1.bf16.msra.mxu1 %v4002_v51  ;;  %2921 = vmatpush1.bf16.msra.mxu0 %v4005_v34 }
 0x50e   :  { %2881 = vmatprep.subr.bf16.mxu1 %v4010_v19  ;;  %2922 = vmatprep.subr.bf16.mxu0 %v4013_v15 }
 0x511   :  { %2882 = vmatpush1.bf16.msra.mxu1 %v4008_v59  ;;  %2923 = vmatpush1.bf16.msra.mxu0 %v4011_v23 }
 0x512   :  { %2883 = vmatprep.subr.bf16.mxu1 %v4016_v1  ;;  %2924 = vmatprep.subr.bf16.mxu0 %v4019_v3 }
 0x515   :  { %2884 = vmatpush1.bf16.msra.mxu1 %v4014_v24  ;;  %2925 = vmatpush1.bf16.msra.mxu0 %v4017_v0 }
 0x516   :  { %2885 = vmatprep.subr.bf16.mxu1 %v4022_v4  ;;  %2926 = vmatprep.subr.bf16.mxu0 %v4025_v25 }
 0x519   :  { %2886 = vmatpush1.bf16.msra.mxu1 %v4020_v26  ;;  %2927 = vmatpush1.bf16.msra.mxu0 %v4023_v27  ;;  %v4058_v26 = vld [vmem:[#allocation17 + $0x50] sm:$0xff]  }
 0x51a   :  { %2887 = vmatprep.subr.bf16.mxu1 %v4028_v28  ;;  %2928 = vmatprep.subr.bf16.mxu0 %v4031_v44  ;;  %v4059_v27 = vld [vmem:[#allocation17 + $0xd0] sm:$0xff]  }
 0x51b   :  { %v4060_v28 = vld [vmem:[#allocation17 + $0x10] sm:$0xff]  }
 0x51c   :  { %v4061_v44 = vld [vmem:[#allocation17 + $0x90] sm:$0xff]  }
 0x51d   :  { %2888 = vmatpush1.bf16.msra.mxu1 %v4026_v6  ;;  %2929 = vmatpush1.bf16.msra.mxu0 %v4029_v7  ;;  %v4062_v6 = vld [vmem:[#allocation17 + $0x48] sm:$0xff]  }
 0x51e   :  { %2889 = vmatprep.subr.bf16.mxu1 %v4034_v10  ;;  %2930 = vmatprep.subr.bf16.mxu0 %v4037_v12  ;;  %v4063_v7 = vld [vmem:[#allocation17 + $0xc8] sm:$0xff]  }
 0x51f   :  { %v4064_v10 = vld [vmem:[#allocation17 + $0x8] sm:$0xff]  }
 0x520   :  { %v4065_v12 = vld [vmem:[#allocation17 + $0x88] sm:$0xff]  }
 0x521   :  { %2890 = vmatpush1.bf16.msra.mxu1 %v4032_v14  ;;  %2931 = vmatpush1.bf16.msra.mxu0 %v4035_v16  ;;  %v4066_v14 = vld [vmem:[#allocation17 + $0x40] sm:$0xff]  }
 0x522   :  { %3617 = vmatprep.subr.bf16.mxu1 %v4038_v17  ;;  %3639 = vmatprep.subr.bf16.mxu0 %v4039_v29  ;;  %v4067_v16 = vld [vmem:[#allocation17 + $0xc0] sm:$0xff]  }
 0x523   :  { %v4068_v17 = vld [vmem:[#allocation17] sm:$0xff]  }
 0x524   :  { %v4069_v29 = vld [vmem:[#allocation17 + $0x80] sm:$0xff]  }
 0x575   :  { %v2117_v20 = vpop.xlane.xlu1 %2116 }
 0x576   :  { %v2118_v21 = vmul.f32 0.0078125, %v2117_v20  ;;  %v2961_v20 = vld [vmem:[%s5164_s13] sm:$0xf] }
 0x578   :  { %v2119_v35 = vadd.f32 1e-05, %v2118_v21  ;;  %v2966_v21 = vrot.slane %v2961_v20, %v4807_v18 }
 0x57a   :  { %4074 = vrsqrt.f32 %v2119_v35  ;;  %v2974_v35 = vrot.slane %v2961_v20, %v4998_v45 }
 0x583   :  { %v2424_v22 = vpop.f32.mrf.mxu1  ;;  %v2465_v56 = vpop.f32.mrf.mxu0 }
 0x585   :  { %v2426_v36 = vpop.f32.mrf.mxu1  ;;  %v2467_v60 = vpop.f32.mrf.mxu0 }
 0x587   :  { %v4075_v2 = vpop.eup %4074  ;;  %v2428_v13 = vpop.f32.mrf.mxu1 }
 0x588   :  { %v2469_v38 = vpop.f32.mrf.mxu0  ;;  %v2121_v8 = vmul.f32 %v4075_v2, %v5119_v40  ;;  %v4049_v40 = vld [vmem:[#allocation17 + $0xa8] sm:$0xff]   ;;  %v2978_v2 = vrot.slane %v2961_v20, %v5083_v62 }
 0x589   :  { %v2429_v30 = vpop.f32.mrf.mxu1 }
 0x58a   :  { %v2470_v9 = vpop.f32.mrf.mxu0  ;;  %v2126_v42 = vmul.f32 %v2125_v61, %v2121_v8  ;;  %v2970_v61 = vrot.slane %v2961_v20, %v4893_v58 }
 0x58c   :  { %v2131_v43 = vadd.f32 %v2130_v39, %v2126_v42 }
 0x58e   :  { %v2714_v32 = vpack.c.bf16 %v2131_v43, %v2131_v43 }
 0x590   :  { %2908 = vmatmul.mubr.bf16.vlgmr.msra.gmra.mxu1 %v2714_v32  ;;  %2949 = vmatmul.mubr.bf16.vlgmr.msra.gmra.mxu0 %v2714_v32 }
 0x591   :  { %3618 = vmatpush3.bf16.msra.mxu1 %v4040_v46  ;;  %3640 = vmatpush3.bf16.msra.mxu0 %v4041_v41 }
 0x592   :  { %3619 = vmatprep.subr.bf16.mxu1 %v4042_v37  ;;  %3641 = vmatprep.subr.bf16.mxu0 %v4043_v47 }
 0x595   :  { %3620 = vmatpush3.bf16.msra.mxu1 %v4044_v48  ;;  %3642 = vmatpush3.bf16.msra.mxu0 %v4045_v49 }
 0x596   :  { %3621 = vmatprep.subr.bf16.mxu1 %v4046_v50  ;;  %3643 = vmatprep.subr.bf16.mxu0 %v4047_v11 }
 0x599   :  { %3622 = vmatpush3.bf16.msra.mxu1 %v4048_v63  ;;  %3644 = vmatpush3.bf16.msra.mxu0 %v4049_v40  ;;  %v3519_v40 = vld [vmem:[%s5166_s15] ss:$0 sm:$0xff] }
 0x59a   :  { %3623 = vmatprep.subr.bf16.mxu1 %v4050_v33  ;;  %3645 = vmatprep.subr.bf16.mxu0 %v4051_v31 }
 0x59d   :  { %3624 = vmatpush3.bf16.msra.mxu1 %v4052_v52  ;;  %3646 = vmatpush3.bf16.msra.mxu0 %v4053_v53 }
 0x59e   :  { %3625 = vmatprep.subr.bf16.mxu1 %v4054_v54  ;;  %3647 = vmatprep.subr.bf16.mxu0 %v4055_v55 }
 0x5a1   :  { %3626 = vmatpush3.bf16.msra.mxu1 %v4056_v5  ;;  %3648 = vmatpush3.bf16.msra.mxu0 %v4057_v57 }
 0x5a2   :  { %3627 = vmatprep.subr.bf16.mxu1 %v4058_v26  ;;  %3649 = vmatprep.subr.bf16.mxu0 %v4059_v27 }
 0x5a5   :  { %3628 = vmatpush3.bf16.msra.mxu1 %v4060_v28  ;;  %3650 = vmatpush3.bf16.msra.mxu0 %v4061_v44 }
 0x5a6   :  { %3629 = vmatprep.subr.bf16.mxu1 %v4062_v6  ;;  %3651 = vmatprep.subr.bf16.mxu0 %v4063_v7 }
 0x5a9   :  { %3630 = vmatpush3.bf16.msra.mxu1 %v4064_v10  ;;  %3652 = vmatpush3.bf16.msra.mxu0 %v4065_v12 }
 0x5aa   :  { %3631 = vmatprep.subr.bf16.mxu1 %v4066_v14  ;;  %3653 = vmatprep.subr.bf16.mxu0 %v4067_v16 }
 0x5ad   :  { %3632 = vmatpush3.bf16.msra.mxu1 %v4068_v17  ;;  %3654 = vmatpush3.bf16.msra.mxu0 %v4069_v29 }
 0x5c4   :  { %v2666_v51 = vpop.f32.mrf.mxu1  ;;  %v2707_v34 = vpop.f32.mrf.mxu0 }
 0x5c5   :  { %v2667_v19 = vadd.f32 %v2666_v51, %v2424_v22  ;;  %v2708_v15 = vadd.f32 %v2707_v34, %v2465_v56 }
 0x5c6   :  { %v2668_v59 = vpop.f32.mrf.mxu1  ;;  %v2709_v23 = vpop.f32.mrf.mxu0 }
 0x5c7   :  { %v2669_v1 = vadd.f32 %v2668_v59, %v2426_v36  ;;  %v2710_v3 = vadd.f32 %v2709_v23, %v2467_v60 }
 0x5c8   :  { %v2670_v24 = vpop.f32.mrf.mxu1  ;;  %v2711_v0 = vpop.f32.mrf.mxu0 }
 0x5ca   :  { %v2671_v4 = vpop.f32.mrf.mxu1  ;;  %v2712_v25 = vpop.f32.mrf.mxu0 }
 0x650   :  { %v2909_v22 = vpop.f32.mrf.mxu1  ;;  %v2950_v56 = vpop.f32.mrf.mxu0 }
 0x651   :  { %v2957_v36 = vadd.f32 %v2909_v22, %v2667_v19  ;;  %v2959_v60 = vadd.f32 %v2950_v56, %v2708_v15 }
 0x652   :  { %v2911_v13 = vpop.f32.mrf.mxu1  ;;  %v2952_v38 = vpop.f32.mrf.mxu0 }
 0x653   :  { %v2983_v39 = vadd.f32 %v2966_v21, %v2957_v36  ;;  %v2985_v8 = vadd.f32 %v2974_v35, %v2959_v60  ;;  %v2958_v30 = vadd.f32 %v2911_v13, %v2669_v1  ;;  %v2960_v9 = vadd.f32 %v2952_v38, %v2710_v3 }
 0x654   :  { %v2913_v42 = vpop.f32.mrf.mxu1  ;;  %v2954_v43 = vpop.f32.mrf.mxu0 }
 0x655   :  { %v2984_v46 = vadd.f32 %v2970_v61, %v2958_v30  ;;  %v2986_v18 = vadd.f32 %v2978_v2, %v2960_v9  ;;  %v2987_v41 = vmax.f32 %v2983_v39, 0.0  ;;  %v2989_v45 = vmax.f32 %v2985_v8, 0.0 }
 0x656   :  { %v2914_v32 = vpop.f32.mrf.mxu1  ;;  %v2955_v37 = vpop.f32.mrf.mxu0 }
 0x657   :  { %v2988_v47 = vmax.f32 %v2984_v46, 0.0  ;;  %v2990_v48 = vmax.f32 %v2986_v18, 0.0  ;;  %v2991_v50 = vpack.c.bf16 %v2987_v41, %v2987_v41  ;;  %v2993_v62 = vpack.c.bf16 %v2989_v45, %v2989_v45 }
 0x659   :  { %v2992_v49 = vpack.c.bf16 %v2988_v47, %v2988_v47  ;;  %v2994_v58 = vpack.c.bf16 %v2990_v48, %v2990_v48 }
 0x65b   :  { %3290 = vmatprep.mubr.bf16.mxu1 %v2992_v49  ;;  %3330 = vmatprep.mubr.bf16.mxu0 %v2994_v58 }
 0x65c   :  { %3291 = vmatmul.mubr.bf16.vlgmr.msra.gmra.mxu1 %v2991_v50  ;;  %3331 = vmatmul.mubr.bf16.vlgmr.msra.gmra.mxu0 %v2993_v62 }
 0x71c   :  { %v3633_v11 = vpop.f32.mrf.mxu1  ;;  %v3655_v63 = vpop.f32.mrf.mxu0 }
 0x71e   :  { %v3634_v33 = vpop.f32.mrf.mxu1  ;;  %v3656_v31 = vpop.f32.mrf.mxu0 }
 0x71f   :  { %v3635_v52 = vadd.f32 %v3634_v33, %v3633_v11  ;;  %v3657_v5 = vadd.f32 %v3656_v31, %v3655_v63 }
 0x720   :  { %v3636_v53 = vpop.f32.mrf.mxu1  ;;  %v3658_v54 = vpop.f32.mrf.mxu0 }
 0x721   :  { %v3293_v55 = vadd.f32 %v3635_v52, %v3519_v40 }
 0x722   :  { %v3637_v57 = vpop.f32.mrf.mxu1  ;;  %v3659_v51 = vpop.f32.mrf.mxu0 }
 0x723   :  { %v3333_v34 = vadd.f32 %v3657_v5, %v3293_v55 }
 0x725   :  { %3338 = vst [vmem:[#allocation19] sm:$0xff] %v3333_v34 }
 0x726   :  { %4288 = shalt.err (!%p4285_p12)
}
 0x727   :  { %3348 = dma.vmem_to_hbm [thread:$0]  %s3346_s22, 128, %s5167_s16, [#allocation4]  }
 0x728   :  { %4309 = dma.done.wait [#allocation4], 128  }
 0x729   :  { %4310 = vsyncadd [#allocation4], 4294967168 }
 0x72a   :  { %3352 = vsyncpa [#allocation3], 1 }
 0x72b   :  { %3353 = vsyncpa [#allocation6], 1 }
 0x72c   :  { %3354 = vsyncpa [#allocation9], 1 }
 0x72d   :  { %3355 = vsyncpa [#allocation12], 1 }
 0x72e   :  { %3356 = vsyncpa [#allocation15], 1 }
 0x72f   :  { %3357 = vsyncpa [#allocation18], 1 }
 0x730   :  { %3358 = vsyncpa [#allocation4], 1 }

</bundles_post_ra>
